<compile_context>
chip_gen: v5e
topology: v5e:2x2
jax: 0.10.0
libtpu: 0.0.40
codegen_flags: <defaults>
</compile_context>

<pallas_src>
import jax
import jax.numpy as jnp
from jax import lax
from jax.experimental import pallas as pl
from jax.experimental.pallas import tpu as pltpu


_VMEM_LIMIT = 32 * 1024 * 1024   # explicit scoped-VMEM limit, valid on v5e/v6e/v7x


# ----------------------------------------------------------------------------
# Kernel 1: fused bidirectional LSTM layer recurrence.
#   Both directions advance together inside one statically unrolled time loop,
#   so the serial chain is S steps (not 2S) on single-TC chips.
#   xp_ref : (8, S, B, H)  precomputed X@W_ih^T + b, index = dir*4 + gate (i,f,g,o)
#   whh_ref: (8, H, H)     recurrent weights, transposed to (in, out) per gate
#   out_ref: (S, B, 2H)    fwd hidden -> lanes [0:H], bwd hidden -> lanes [H:2H]
# ----------------------------------------------------------------------------
def _bilstm_fused_kernel(xp_ref, whh_ref, out_ref):
    _, S, B, H = xp_ref.shape

    def cell(h, c, pre):
        # pre: 4 pre-activation gate tiles (B, H), PyTorch order i, f, g, o
        i_g = jax.nn.sigmoid(pre[0])
        f_g = jax.nn.sigmoid(pre[1])
        g_g = jnp.tanh(pre[2])
        o_g = jax.nn.sigmoid(pre[3])
        c = f_g * c + i_g * g_g
        h = o_g * jnp.tanh(c)
        return h, c

    zeros = jnp.zeros((B, H), jnp.float32)
    hf, cf = zeros, zeros
    hb, cb = zeros, zeros

    for i in range(S):                       # fully static unroll: static indices
        tf, tb = i, S - 1 - i

        # forward direction, per-gate matmuls (no intra-tile gate slicing)
        pre_f = [xp_ref[g, tf] + jnp.dot(hf, whh_ref[g],
                                         preferred_element_type=jnp.float32)
                 for g in range(4)]
        hf, cf = cell(hf, cf, pre_f)
        out_ref[tf, :, 0:H] = hf

        # backward direction walks time in reverse with static indices
        pre_b = [xp_ref[4 + g, tb] + jnp.dot(hb, whh_ref[4 + g],
                                             preferred_element_type=jnp.float32)
                 for g in range(4)]
        hb, cb = cell(hb, cb, pre_b)
        out_ref[tb, :, H:2 * H] = hb


def bilstm_layer(x, p_fwd, p_bwd):
    """One bidirectional LSTM layer. x: (S, B, Din) f32 -> (S, B, 2H) f32."""
    S, B, Din = x.shape
    H = p_fwd[1].shape[1]

    # Hoisted input projection: one XLA matmul for the whole sequence, both
    # directions and all gates. Gate-major layout so the kernel never slices.
    wih = jnp.concatenate([p_fwd[0], p_bwd[0]], axis=0).reshape(8, H, Din)
    bias = jnp.concatenate([p_fwd[2] + p_fwd[3], p_bwd[2] + p_bwd[3]]).reshape(8, H)
    xp = jnp.einsum('sbd,khd->ksbh', x, wih) + bias[:, None, None, :]   # (8,S,B,H)

    # Recurrent weights per (direction, gate), transposed to (in, out).
    whh = jnp.transpose(
        jnp.concatenate([p_fwd[1], p_bwd[1]], axis=0).reshape(8, H, H),
        (0, 2, 1))                                                       # (8,H,H)

    return pl.pallas_call(
        _bilstm_fused_kernel,
        out_shape=jax.ShapeDtypeStruct((S, B, 2 * H), jnp.float32),
        grid_spec=pltpu.PrefetchScalarGridSpec(
            num_scalar_prefetch=0,
            grid=(1,),
            in_specs=[
                pl.BlockSpec((8, S, B, H), lambda i: (0, 0, 0, 0)),
                pl.BlockSpec((8, H, H), lambda i: (0, 0, 0)),
            ],
            out_specs=pl.BlockSpec((S, B, 2 * H), lambda i: (0, 0, 0)),
        ),
        compiler_params=pltpu.CompilerParams(
            dimension_semantics=("arbitrary",),
            vmem_limit_bytes=_VMEM_LIMIT,
        ),
    )(xp, whh)


def bilstm_2layer(U, params):
    """2-layer bidirectional LSTM, eval mode. Output already (S, B, 2*D_e)."""
    h0 = bilstm_layer(U, params["l0_fwd"], params["l0_bwd"])   # (S, B, 2*D_e)
    # TODO(synk): nn.LSTM inter-layer dropout omitted (eval-mode identity).
    h1 = bilstm_layer(h0, params["l1_fwd"], params["l1_bwd"])
    return h1                                                  # (S, B, 2*D_e)


# ----------------------------------------------------------------------------
# Kernel 2: MatchingAttention('general2') over all query steps + Linear + ReLU
#           + smax_fc + log_softmax, one grid step per batch element.
#   grid = (B,), "parallel"  -> the two batch elements split across the two
#   TensorCores on v7x; everything inside is 2-D f32.
# ----------------------------------------------------------------------------
def _attn_cls_kernel(m_ref, mrow_ref, mcol_ref, wt_ref, bt_ref, wl_ref, bl_ref,
                     wf_ref, bf_ref, lp_ref, alpha_ref):
    M = m_ref[...]                                   # (S, mem) memory & queries
    mrow = mrow_ref[...]                             # (1, S)   key mask (row form)
    mcol = mcol_ref[...]                             # (S, 1)   key mask (col form)

    # x_t = transform(M_t) for every query step at once: one MXU matmul
    xt = jnp.dot(M, wt_ref[...], preferred_element_type=jnp.float32) + bt_ref[...]

    Mm = M * mcol                                    # masked memory (keys)
    scores = lax.dot_general(xt, Mm, (((1,), (1,)), ((), ())),
                             preferred_element_type=jnp.float32) * mrow   # (S, S)
    scores = jnp.tanh(scores)                        # reference order: mask, then tanh
    sm = jax.nn.softmax(scores, axis=-1)
    am = sm * mrow
    alpha = am / jnp.sum(am, axis=-1, keepdims=True)       # exact renormalization

    # pooling uses the *unmasked* memory, exactly as the reference does
    attn = jnp.dot(alpha, M, preferred_element_type=jnp.float32)          # (S, mem)

    hid = jax.nn.relu(jnp.dot(attn, wl_ref[...],
                              preferred_element_type=jnp.float32) + bl_ref[...])
    # TODO(synk): nn.Dropout after the linear is an eval-mode identity here.
    logits = jnp.dot(hid, wf_ref[...],
                     preferred_element_type=jnp.float32) + bf_ref[...]    # (S, C)
    lp_ref[...] = jax.nn.log_softmax(logits, axis=-1)
    alpha_ref[...] = alpha


def attn_classifier(emotions, umask, p):
    """emotions: (S, B, mem); umask: (B, S). Returns log_prob (S,B,C), alpha (S,B,S)."""
    S, B, mem = emotions.shape
    Dh = p["w_lin"].shape[0]
    C = p["w_fc"].shape[0]

    em_b = jnp.transpose(emotions, (1, 0, 2))        # (B, S, mem) — batch-major head
    mask_row = umask.reshape(B, 1, S)
    mask_col = umask.reshape(B, S, 1)

    wt = p["w_att"].T                                # (mem, mem)
    bt = p["b_att"].reshape(1, mem)
    wl = p["w_lin"].T                                # (mem, Dh)
    bl = p["b_lin"].reshape(1, Dh)
    wf = p["w_fc"].T                                 # (Dh, C)
    bf = p["b_fc"].reshape(1, C)

    lp, alpha = pl.pallas_call(
        _attn_cls_kernel,
        out_shape=(
            jax.ShapeDtypeStruct((B, S, C), jnp.float32),
            jax.ShapeDtypeStruct((B, S, S), jnp.float32),
        ),
        grid_spec=pltpu.PrefetchScalarGridSpec(
            num_scalar_prefetch=0,
            grid=(B,),
            in_specs=[
                pl.BlockSpec((None, S, mem), lambda b: (b, 0, 0)),
                pl.BlockSpec((None, 1, S), lambda b: (b, 0, 0)),
                pl.BlockSpec((None, S, 1), lambda b: (b, 0, 0)),
                pl.BlockSpec((mem, mem), lambda b: (0, 0)),
                pl.BlockSpec((1, mem), lambda b: (0, 0)),
                pl.BlockSpec((mem, Dh), lambda b: (0, 0)),
                pl.BlockSpec((1, Dh), lambda b: (0, 0)),
                pl.BlockSpec((Dh, C), lambda b: (0, 0)),
                pl.BlockSpec((1, C), lambda b: (0, 0)),
            ],
            out_specs=[
                pl.BlockSpec((None, S, C), lambda b: (b, 0, 0)),
                pl.BlockSpec((None, S, S), lambda b: (b, 0, 0)),
            ],
        ),
        compiler_params=pltpu.CompilerParams(
            dimension_semantics=("parallel",),       # batch -> 2 TCs on v7x
            vmem_limit_bytes=_VMEM_LIMIT,
        ),
    )(em_b, mask_row, mask_col, wt, bt, wl, bl, wf, bf)

    log_prob = jnp.transpose(lp, (1, 0, 2))          # (S, B, C)
    alpha_out = jnp.transpose(alpha, (1, 0, 2))      # (S, B, S) == stack of alpha_[:,0,:]
    return log_prob, alpha_out


# ----------------------------------------------------------------------------
# Full forward (att2=True path), eval mode.
# ----------------------------------------------------------------------------
def lstm_model_forward(U, qmask, umask, params):
    del qmask  # unused in the reference forward
    emotions = bilstm_2layer(U, params["lstm"])                       # (S, B, 2*D_e)
    log_prob, alpha = attn_classifier(emotions, umask, params["head"])
    return log_prob, alpha, [], [], emotions


# ----------------------------------------------------------------------------
# Deterministic parameter init (PyTorch-style uniform(-1/sqrt(H), 1/sqrt(H))).
# ----------------------------------------------------------------------------
def _init_lstm_dir(key, din, hidden):
    ks = jax.random.split(key, 4)
    s = 1.0 / float(hidden) ** 0.5
    w_ih = jax.random.uniform(ks[0], (4 * hidden, din), jnp.float32, -s, s)
    w_hh = jax.random.uniform(ks[1], (4 * hidden, hidden), jnp.float32, -s, s)
    b_ih = jax.random.uniform(ks[2], (4 * hidden,), jnp.float32, -s, s)
    b_hh = jax.random.uniform(ks[3], (4 * hidden,), jnp.float32, -s, s)
    return (w_ih, w_hh, b_ih, b_hh)


def init_params(key, D_m, D_e, D_h, n_classes):
    ks = jax.random.split(key, 10)
    mem = 2 * D_e
    lstm = {
        "l0_fwd": _init_lstm_dir(ks[0], D_m, D_e),
        "l0_bwd": _init_lstm_dir(ks[1], D_m, D_e),
        "l1_fwd": _init_lstm_dir(ks[2], mem, D_e),
        "l1_bwd": _init_lstm_dir(ks[3], mem, D_e),
    }
    head = {
        "w_att": jax.random.uniform(ks[4], (mem, mem), jnp.float32, -0.1, 0.1),
        "b_att": jax.random.uniform(ks[5], (mem,), jnp.float32, -0.1, 0.1),
        "w_lin": jax.random.uniform(ks[6], (D_h, mem), jnp.float32, -0.1, 0.1),
        "b_lin": jax.random.uniform(ks[7], (D_h,), jnp.float32, -0.1, 0.1),
        "w_fc": jax.random.uniform(ks[8], (n_classes, D_h), jnp.float32, -0.1, 0.1),
        "b_fc": jax.random.uniform(ks[9], (n_classes,), jnp.float32, -0.1, 0.1),
    }
    return {"lstm": lstm, "head": head}


if __name__ == "__main__":
    D_m, D_e, D_h, n_classes = 16, 32, 32, 7
    S, B = 8, 2

    key = jax.random.PRNGKey(0)
    k_p, k_u = jax.random.split(key)
    params = init_params(k_p, D_m, D_e, D_h, n_classes)

    U = jax.random.normal(k_u, (S, B, D_m), jnp.float32)       # (seq, batch, D_m)
    qmask = jnp.zeros((S, B, 2), jnp.float32)                  # unused by forward
    umask = jnp.ones((B, S), jnp.float32)                      # (batch, seq)

    log_prob, alpha, alpha_f, alpha_b, emotions = lstm_model_forward(U, qmask, umask, params)
    jax.block_until_ready(log_prob)
    jax.block_until_ready(alpha)
    jax.block_until_ready(emotions)

    assert log_prob.shape == (S, B, n_classes)
    assert alpha.shape == (S, B, S)
    assert emotions.shape == (S, B, 2 * D_e)
    print("KERNEL_OK")
</pallas_src>

<mosaic_0001>
module attributes {stable_mosaic.version = 11 : i64} {
  func.func @_bilstm_fused_kernel(%arg0: i32, %arg1: memref<8x8x2x32xf32, #tpu.memory_space<vmem>>, %arg2: memref<8x32x32xf32, #tpu.memory_space<vmem>>, %arg3: memref<8x2x64xf32, #tpu.memory_space<vmem>>) attributes {dimension_semantics = [#tpu.dimension_semantics<arbitrary>], iteration_bounds = array<i64: 1>, scalar_prefetch = 0 : i64, scratch_operands = 0 : i64, tpu.core_type = #tpu.core_type<tc>, window_params = [{pipeline_mode = #tpu.pipeline_mode<synchronous>, transform_indices = @transform_0, window_bounds = array<i64: 8, 8, 2, 32>}, {pipeline_mode = #tpu.pipeline_mode<synchronous>, transform_indices = @transform_1, window_bounds = array<i64: 8, 32, 32>}, {pipeline_mode = #tpu.pipeline_mode<synchronous>, transform_indices = @transform_2, window_bounds = array<i64: 8, 2, 64>}]} {
    %cst = arith.constant 0.000000e+00 : f32
    %0 = vector.broadcast %cst : f32 to vector<2x32xf32>
    %c0 = arith.constant 0 : index
    %c0_0 = arith.constant 0 : index
    %c0_1 = arith.constant 0 : index
    %c0_2 = arith.constant 0 : index
    %1 = vector.load %arg1[%c0, %c0_0, %c0_1, %c0_2] : memref<8x8x2x32xf32, #tpu.memory_space<vmem>>, vector<1x1x2x32xf32>
    %2 = vector.shape_cast %1 : vector<1x1x2x32xf32> to vector<2x32xf32>
    %c0_3 = arith.constant 0 : index
    %c0_4 = arith.constant 0 : index
    %c0_5 = arith.constant 0 : index
    %3 = vector.load %arg2[%c0_3, %c0_4, %c0_5] : memref<8x32x32xf32, #tpu.memory_space<vmem>>, vector<1x32x32xf32>
    %4 = vector.shape_cast %3 : vector<1x32x32xf32> to vector<32x32xf32>
    %cst_6 = arith.constant dense<0.000000e+00> : vector<2x32xf32>
    %5 = tpu.matmul %0, %4, %cst_6 {dimension_numbers = #tpu.dot_dimension_numbers<[1], [0], [0], [1], [0, 0, 1, 1], [], []>} : vector<2x32xf32>, vector<32x32xf32>, vector<2x32xf32> -> vector<2x32xf32>
    %6 = arith.addf %2, %5 : vector<2x32xf32>
    %c1 = arith.constant 1 : index
    %c0_7 = arith.constant 0 : index
    %c0_8 = arith.constant 0 : index
    %c0_9 = arith.constant 0 : index
    %7 = vector.load %arg1[%c1, %c0_7, %c0_8, %c0_9] : memref<8x8x2x32xf32, #tpu.memory_space<vmem>>, vector<1x1x2x32xf32>
    %8 = vector.shape_cast %7 : vector<1x1x2x32xf32> to vector<2x32xf32>
    %c1_10 = arith.constant 1 : index
    %c0_11 = arith.constant 0 : index
    %c0_12 = arith.constant 0 : index
    %9 = vector.load %arg2[%c1_10, %c0_11, %c0_12] : memref<8x32x32xf32, #tpu.memory_space<vmem>>, vector<1x32x32xf32>
    %10 = vector.shape_cast %9 : vector<1x32x32xf32> to vector<32x32xf32>
    %cst_13 = arith.constant dense<0.000000e+00> : vector<2x32xf32>
    %11 = tpu.matmul %0, %10, %cst_13 {dimension_numbers = #tpu.dot_dimension_numbers<[1], [0], [0], [1], [0, 0, 1, 1], [], []>} : vector<2x32xf32>, vector<32x32xf32>, vector<2x32xf32> -> vector<2x32xf32>
    %12 = arith.addf %8, %11 : vector<2x32xf32>
    %c2 = arith.constant 2 : index
    %c0_14 = arith.constant 0 : index
    %c0_15 = arith.constant 0 : index
    %c0_16 = arith.constant 0 : index
    %13 = vector.load %arg1[%c2, %c0_14, %c0_15, %c0_16] : memref<8x8x2x32xf32, #tpu.memory_space<vmem>>, vector<1x1x2x32xf32>
    %14 = vector.shape_cast %13 : vector<1x1x2x32xf32> to vector<2x32xf32>
    %c2_17 = arith.constant 2 : index
    %c0_18 = arith.constant 0 : index
    %c0_19 = arith.constant 0 : index
    %15 = vector.load %arg2[%c2_17, %c0_18, %c0_19] : memref<8x32x32xf32, #tpu.memory_space<vmem>>, vector<1x32x32xf32>
    %16 = vector.shape_cast %15 : vector<1x32x32xf32> to vector<32x32xf32>
    %cst_20 = arith.constant dense<0.000000e+00> : vector<2x32xf32>
    %17 = tpu.matmul %0, %16, %cst_20 {dimension_numbers = #tpu.dot_dimension_numbers<[1], [0], [0], [1], [0, 0, 1, 1], [], []>} : vector<2x32xf32>, vector<32x32xf32>, vector<2x32xf32> -> vector<2x32xf32>
    %18 = arith.addf %14, %17 : vector<2x32xf32>
    %c3 = arith.constant 3 : index
    %c0_21 = arith.constant 0 : index
    %c0_22 = arith.constant 0 : index
    %c0_23 = arith.constant 0 : index
    %19 = vector.load %arg1[%c3, %c0_21, %c0_22, %c0_23] : memref<8x8x2x32xf32, #tpu.memory_space<vmem>>, vector<1x1x2x32xf32>
    %20 = vector.shape_cast %19 : vector<1x1x2x32xf32> to vector<2x32xf32>
    %c3_24 = arith.constant 3 : index
    %c0_25 = arith.constant 0 : index
    %c0_26 = arith.constant 0 : index
    %21 = vector.load %arg2[%c3_24, %c0_25, %c0_26] : memref<8x32x32xf32, #tpu.memory_space<vmem>>, vector<1x32x32xf32>
    %22 = vector.shape_cast %21 : vector<1x32x32xf32> to vector<32x32xf32>
    %cst_27 = arith.constant dense<0.000000e+00> : vector<2x32xf32>
    %23 = tpu.matmul %0, %22, %cst_27 {dimension_numbers = #tpu.dot_dimension_numbers<[1], [0], [0], [1], [0, 0, 1, 1], [], []>} : vector<2x32xf32>, vector<32x32xf32>, vector<2x32xf32> -> vector<2x32xf32>
    %24 = arith.addf %20, %23 : vector<2x32xf32>
    %25 = arith.negf %6 : vector<2x32xf32>
    %26 = math.exp %25 : vector<2x32xf32>
    %cst_28 = arith.constant 1.000000e+00 : f32
    %27 = vector.broadcast %cst_28 : f32 to vector<2x32xf32>
    %28 = arith.addf %27, %26 : vector<2x32xf32>
    %29 = arith.divf %27, %28 : vector<2x32xf32>
    %30 = arith.negf %12 : vector<2x32xf32>
    %31 = math.exp %30 : vector<2x32xf32>
    %cst_29 = arith.constant 1.000000e+00 : f32
    %32 = vector.broadcast %cst_29 : f32 to vector<2x32xf32>
    %33 = arith.addf %32, %31 : vector<2x32xf32>
    %34 = arith.divf %32, %33 : vector<2x32xf32>
    %35 = math.tanh %18 : vector<2x32xf32>
    %36 = arith.negf %24 : vector<2x32xf32>
    %37 = math.exp %36 : vector<2x32xf32>
    %cst_30 = arith.constant 1.000000e+00 : f32
    %38 = vector.broadcast %cst_30 : f32 to vector<2x32xf32>
    %39 = arith.addf %38, %37 : vector<2x32xf32>
    %40 = arith.divf %38, %39 : vector<2x32xf32>
    %41 = arith.mulf %34, %0 : vector<2x32xf32>
    %42 = arith.mulf %29, %35 : vector<2x32xf32>
    %43 = arith.addf %41, %42 : vector<2x32xf32>
    %44 = math.tanh %43 : vector<2x32xf32>
    %45 = arith.mulf %40, %44 : vector<2x32xf32>
    %c0_31 = arith.constant 0 : index
    %c0_32 = arith.constant 0 : index
    %c0_33 = arith.constant 0 : index
    %46 = vector.load %arg3[%c0_31, %c0_32, %c0_33] : memref<8x2x64xf32, #tpu.memory_space<vmem>>, vector<1x2x32xf32>
    %47 = vector.shape_cast %46 : vector<1x2x32xf32> to vector<2x32xf32>
    %48 = vector.shape_cast %45 : vector<2x32xf32> to vector<1x2x32xf32>
    tpu.vector_store %arg3[%c0_31, %c0_32, %c0_33], %48 {strides = array<i32>} : memref<8x2x64xf32, #tpu.memory_space<vmem>>, vector<1x2x32xf32>,
    %c4 = arith.constant 4 : index
    %c7 = arith.constant 7 : index
    %c0_34 = arith.constant 0 : index
    %c0_35 = arith.constant 0 : index
    %49 = vector.load %arg1[%c4, %c7, %c0_34, %c0_35] : memref<8x8x2x32xf32, #tpu.memory_space<vmem>>, vector<1x1x2x32xf32>
    %50 = vector.shape_cast %49 : vector<1x1x2x32xf32> to vector<2x32xf32>
    %c4_36 = arith.constant 4 : index
    %c0_37 = arith.constant 0 : index
    %c0_38 = arith.constant 0 : index
    %51 = vector.load %arg2[%c4_36, %c0_37, %c0_38] : memref<8x32x32xf32, #tpu.memory_space<vmem>>, vector<1x32x32xf32>
    %52 = vector.shape_cast %51 : vector<1x32x32xf32> to vector<32x32xf32>
    %cst_39 = arith.constant dense<0.000000e+00> : vector<2x32xf32>
    %53 = tpu.matmul %0, %52, %cst_39 {dimension_numbers = #tpu.dot_dimension_numbers<[1], [0], [0], [1], [0, 0, 1, 1], [], []>} : vector<2x32xf32>, vector<32x32xf32>, vector<2x32xf32> -> vector<2x32xf32>
    %54 = arith.addf %50, %53 : vector<2x32xf32>
    %c5 = arith.constant 5 : index
    %c7_40 = arith.constant 7 : index
    %c0_41 = arith.constant 0 : index
    %c0_42 = arith.constant 0 : index
    %55 = vector.load %arg1[%c5, %c7_40, %c0_41, %c0_42] : memref<8x8x2x32xf32, #tpu.memory_space<vmem>>, vector<1x1x2x32xf32>
    %56 = vector.shape_cast %55 : vector<1x1x2x32xf32> to vector<2x32xf32>
    %c5_43 = arith.constant 5 : index
    %c0_44 = arith.constant 0 : index
    %c0_45 = arith.constant 0 : index
    %57 = vector.load %arg2[%c5_43, %c0_44, %c0_45] : memref<8x32x32xf32, #tpu.memory_space<vmem>>, vector<1x32x32xf32>
    %58 = vector.shape_cast %57 : vector<1x32x32xf32> to vector<32x32xf32>
    %cst_46 = arith.constant dense<0.000000e+00> : vector<2x32xf32>
    %59 = tpu.matmul %0, %58, %cst_46 {dimension_numbers = #tpu.dot_dimension_numbers<[1], [0], [0], [1], [0, 0, 1, 1], [], []>} : vector<2x32xf32>, vector<32x32xf32>, vector<2x32xf32> -> vector<2x32xf32>
    %60 = arith.addf %56, %59 : vector<2x32xf32>
    %c6 = arith.constant 6 : index
    %c7_47 = arith.constant 7 : index
    %c0_48 = arith.constant 0 : index
    %c0_49 = arith.constant 0 : index
    %61 = vector.load %arg1[%c6, %c7_47, %c0_48, %c0_49] : memref<8x8x2x32xf32, #tpu.memory_space<vmem>>, vector<1x1x2x32xf32>
    %62 = vector.shape_cast %61 : vector<1x1x2x32xf32> to vector<2x32xf32>
    %c6_50 = arith.constant 6 : index
    %c0_51 = arith.constant 0 : index
    %c0_52 = arith.constant 0 : index
    %63 = vector.load %arg2[%c6_50, %c0_51, %c0_52] : memref<8x32x32xf32, #tpu.memory_space<vmem>>, vector<1x32x32xf32>
    %64 = vector.shape_cast %63 : vector<1x32x32xf32> to vector<32x32xf32>
    %cst_53 = arith.constant dense<0.000000e+00> : vector<2x32xf32>
    %65 = tpu.matmul %0, %64, %cst_53 {dimension_numbers = #tpu.dot_dimension_numbers<[1], [0], [0], [1], [0, 0, 1, 1], [], []>} : vector<2x32xf32>, vector<32x32xf32>, vector<2x32xf32> -> vector<2x32xf32>
    %66 = arith.addf %62, %65 : vector<2x32xf32>
    %c7_54 = arith.constant 7 : index
    %c7_55 = arith.constant 7 : index
    %c0_56 = arith.constant 0 : index
    %c0_57 = arith.constant 0 : index
    %67 = vector.load %arg1[%c7_54, %c7_55, %c0_56, %c0_57] : memref<8x8x2x32xf32, #tpu.memory_space<vmem>>, vector<1x1x2x32xf32>
    %68 = vector.shape_cast %67 : vector<1x1x2x32xf32> to vector<2x32xf32>
    %c7_58 = arith.constant 7 : index
    %c0_59 = arith.constant 0 : index
    %c0_60 = arith.constant 0 : index
    %69 = vector.load %arg2[%c7_58, %c0_59, %c0_60] : memref<8x32x32xf32, #tpu.memory_space<vmem>>, vector<1x32x32xf32>
    %70 = vector.shape_cast %69 : vector<1x32x32xf32> to vector<32x32xf32>
    %cst_61 = arith.constant dense<0.000000e+00> : vector<2x32xf32>
    %71 = tpu.matmul %0, %70, %cst_61 {dimension_numbers = #tpu.dot_dimension_numbers<[1], [0], [0], [1], [0, 0, 1, 1], [], []>} : vector<2x32xf32>, vector<32x32xf32>, vector<2x32xf32> -> vector<2x32xf32>
    %72 = arith.addf %68, %71 : vector<2x32xf32>
    %73 = arith.negf %54 : vector<2x32xf32>
    %74 = math.exp %73 : vector<2x32xf32>
    %cst_62 = arith.constant 1.000000e+00 : f32
    %75 = vector.broadcast %cst_62 : f32 to vector<2x32xf32>
    %76 = arith.addf %75, %74 : vector<2x32xf32>
    %77 = arith.divf %75, %76 : vector<2x32xf32>
    %78 = arith.negf %60 : vector<2x32xf32>
    %79 = math.exp %78 : vector<2x32xf32>
    %cst_63 = arith.constant 1.000000e+00 : f32
    %80 = vector.broadcast %cst_63 : f32 to vector<2x32xf32>
    %81 = arith.addf %80, %79 : vector<2x32xf32>
    %82 = arith.divf %80, %81 : vector<2x32xf32>
    %83 = math.tanh %66 : vector<2x32xf32>
    %84 = arith.negf %72 : vector<2x32xf32>
    %85 = math.exp %84 : vector<2x32xf32>
    %cst_64 = arith.constant 1.000000e+00 : f32
    %86 = vector.broadcast %cst_64 : f32 to vector<2x32xf32>
    %87 = arith.addf %86, %85 : vector<2x32xf32>
    %88 = arith.divf %86, %87 : vector<2x32xf32>
    %89 = arith.mulf %82, %0 : vector<2x32xf32>
    %90 = arith.mulf %77, %83 : vector<2x32xf32>
    %91 = arith.addf %89, %90 : vector<2x32xf32>
    %92 = math.tanh %91 : vector<2x32xf32>
    %93 = arith.mulf %88, %92 : vector<2x32xf32>
    %c7_65 = arith.constant 7 : index
    %c0_66 = arith.constant 0 : index
    %c32 = arith.constant 32 : index
    %94 = vector.load %arg3[%c7_65, %c0_66, %c32] : memref<8x2x64xf32, #tpu.memory_space<vmem>>, vector<1x2x32xf32>
    %95 = vector.shape_cast %94 : vector<1x2x32xf32> to vector<2x32xf32>
    %96 = vector.shape_cast %93 : vector<2x32xf32> to vector<1x2x32xf32>
    tpu.vector_store %arg3[%c7_65, %c0_66, %c32], %96 {strides = array<i32>} : memref<8x2x64xf32, #tpu.memory_space<vmem>>, vector<1x2x32xf32>,
    %c0_67 = arith.constant 0 : index
    %c1_68 = arith.constant 1 : index
    %c0_69 = arith.constant 0 : index
    %c0_70 = arith.constant 0 : index
    %97 = vector.load %arg1[%c0_67, %c1_68, %c0_69, %c0_70] : memref<8x8x2x32xf32, #tpu.memory_space<vmem>>, vector<1x1x2x32xf32>
    %98 = vector.shape_cast %97 : vector<1x1x2x32xf32> to vector<2x32xf32>
    %c0_71 = arith.constant 0 : index
    %c0_72 = arith.constant 0 : index
    %c0_73 = arith.constant 0 : index
    %99 = vector.load %arg2[%c0_71, %c0_72, %c0_73] : memref<8x32x32xf32, #tpu.memory_space<vmem>>, vector<1x32x32xf32>
    %100 = vector.shape_cast %99 : vector<1x32x32xf32> to vector<32x32xf32>
    %cst_74 = arith.constant dense<0.000000e+00> : vector<2x32xf32>
    %101 = tpu.matmul %45, %100, %cst_74 {dimension_numbers = #tpu.dot_dimension_numbers<[1], [0], [0], [1], [0, 0, 1, 1], [], []>} : vector<2x32xf32>, vector<32x32xf32>, vector<2x32xf32> -> vector<2x32xf32>
    %102 = arith.addf %98, %101 : vector<2x32xf32>
    %c1_75 = arith.constant 1 : index
    %c1_76 = arith.constant 1 : index
    %c0_77 = arith.constant 0 : index
    %c0_78 = arith.constant 0 : index
    %103 = vector.load %arg1[%c1_75, %c1_76, %c0_77, %c0_78] : memref<8x8x2x32xf32, #tpu.memory_space<vmem>>, vector<1x1x2x32xf32>
    %104 = vector.shape_cast %103 : vector<1x1x2x32xf32> to vector<2x32xf32>
    %c1_79 = arith.constant 1 : index
    %c0_80 = arith.constant 0 : index
    %c0_81 = arith.constant 0 : index
    %105 = vector.load %arg2[%c1_79, %c0_80, %c0_81] : memref<8x32x32xf32, #tpu.memory_space<vmem>>, vector<1x32x32xf32>
    %106 = vector.shape_cast %105 : vector<1x32x32xf32> to vector<32x32xf32>
    %cst_82 = arith.constant dense<0.000000e+00> : vector<2x32xf32>
    %107 = tpu.matmul %45, %106, %cst_82 {dimension_numbers = #tpu.dot_dimension_numbers<[1], [0], [0], [1], [0, 0, 1, 1], [], []>} : vector<2x32xf32>, vector<32x32xf32>, vector<2x32xf32> -> vector<2x32xf32>
    %108 = arith.addf %104, %107 : vector<2x32xf32>
    %c2_83 = arith.constant 2 : index
    %c1_84 = arith.constant 1 : index
    %c0_85 = arith.constant 0 : index
    %c0_86 = arith.constant 0 : index
    %109 = vector.load %arg1[%c2_83, %c1_84, %c0_85, %c0_86] : memref<8x8x2x32xf32, #tpu.memory_space<vmem>>, vector<1x1x2x32xf32>
    %110 = vector.shape_cast %109 : vector<1x1x2x32xf32> to vector<2x32xf32>
    %c2_87 = arith.constant 2 : index
    %c0_88 = arith.constant 0 : index
    %c0_89 = arith.constant 0 : index
    %111 = vector.load %arg2[%c2_87, %c0_88, %c0_89] : memref<8x32x32xf32, #tpu.memory_space<vmem>>, vector<1x32x32xf32>
    %112 = vector.shape_cast %111 : vector<1x32x32xf32> to vector<32x32xf32>
    %cst_90 = arith.constant dense<0.000000e+00> : vector<2x32xf32>
    %113 = tpu.matmul %45, %112, %cst_90 {dimension_numbers = #tpu.dot_dimension_numbers<[1], [0], [0], [1], [0, 0, 1, 1], [], []>} : vector<2x32xf32>, vector<32x32xf32>, vector<2x32xf32> -> vector<2x32xf32>
    %114 = arith.addf %110, %113 : vector<2x32xf32>
    %c3_91 = arith.constant 3 : index
    %c1_92 = arith.constant 1 : index
    %c0_93 = arith.constant 0 : index
    %c0_94 = arith.constant 0 : index
    %115 = vector.load %arg1[%c3_91, %c1_92, %c0_93, %c0_94] : memref<8x8x2x32xf32, #tpu.memory_space<vmem>>, vector<1x1x2x32xf32>
    %116 = vector.shape_cast %115 : vector<1x1x2x32xf32> to vector<2x32xf32>
    %c3_95 = arith.constant 3 : index
    %c0_96 = arith.constant 0 : index
    %c0_97 = arith.constant 0 : index
    %117 = vector.load %arg2[%c3_95, %c0_96, %c0_97] : memref<8x32x32xf32, #tpu.memory_space<vmem>>, vector<1x32x32xf32>
    %118 = vector.shape_cast %117 : vector<1x32x32xf32> to vector<32x32xf32>
    %cst_98 = arith.constant dense<0.000000e+00> : vector<2x32xf32>
    %119 = tpu.matmul %45, %118, %cst_98 {dimension_numbers = #tpu.dot_dimension_numbers<[1], [0], [0], [1], [0, 0, 1, 1], [], []>} : vector<2x32xf32>, vector<32x32xf32>, vector<2x32xf32> -> vector<2x32xf32>
    %120 = arith.addf %116, %119 : vector<2x32xf32>
    %121 = arith.negf %102 : vector<2x32xf32>
    %122 = math.exp %121 : vector<2x32xf32>
    %cst_99 = arith.constant 1.000000e+00 : f32
    %123 = vector.broadcast %cst_99 : f32 to vector<2x32xf32>
    %124 = arith.addf %123, %122 : vector<2x32xf32>
    %125 = arith.divf %123, %124 : vector<2x32xf32>
    %126 = arith.negf %108 : vector<2x32xf32>
    %127 = math.exp %126 : vector<2x32xf32>
    %cst_100 = arith.constant 1.000000e+00 : f32
    %128 = vector.broadcast %cst_100 : f32 to vector<2x32xf32>
    %129 = arith.addf %128, %127 : vector<2x32xf32>
    %130 = arith.divf %128, %129 : vector<2x32xf32>
    %131 = math.tanh %114 : vector<2x32xf32>
    %132 = arith.negf %120 : vector<2x32xf32>
    %133 = math.exp %132 : vector<2x32xf32>
    %cst_101 = arith.constant 1.000000e+00 : f32
    %134 = vector.broadcast %cst_101 : f32 to vector<2x32xf32>
    %135 = arith.addf %134, %133 : vector<2x32xf32>
    %136 = arith.divf %134, %135 : vector<2x32xf32>
    %137 = arith.mulf %130, %43 : vector<2x32xf32>
    %138 = arith.mulf %125, %131 : vector<2x32xf32>
    %139 = arith.addf %137, %138 : vector<2x32xf32>
    %140 = math.tanh %139 : vector<2x32xf32>
    %141 = arith.mulf %136, %140 : vector<2x32xf32>
    %c1_102 = arith.constant 1 : index
    %c0_103 = arith.constant 0 : index
    %c0_104 = arith.constant 0 : index
    %142 = vector.load %arg3[%c1_102, %c0_103, %c0_104] : memref<8x2x64xf32, #tpu.memory_space<vmem>>, vector<1x2x32xf32>
    %143 = vector.shape_cast %142 : vector<1x2x32xf32> to vector<2x32xf32>
    %144 = vector.shape_cast %141 : vector<2x32xf32> to vector<1x2x32xf32>
    tpu.vector_store %arg3[%c1_102, %c0_103, %c0_104], %144 {strides = array<i32>} : memref<8x2x64xf32, #tpu.memory_space<vmem>>, vector<1x2x32xf32>,
    %c4_105 = arith.constant 4 : index
    %c6_106 = arith.constant 6 : index
    %c0_107 = arith.constant 0 : index
    %c0_108 = arith.constant 0 : index
    %145 = vector.load %arg1[%c4_105, %c6_106, %c0_107, %c0_108] : memref<8x8x2x32xf32, #tpu.memory_space<vmem>>, vector<1x1x2x32xf32>
    %146 = vector.shape_cast %145 : vector<1x1x2x32xf32> to vector<2x32xf32>
    %c4_109 = arith.constant 4 : index
    %c0_110 = arith.constant 0 : index
    %c0_111 = arith.constant 0 : index
    %147 = vector.load %arg2[%c4_109, %c0_110, %c0_111] : memref<8x32x32xf32, #tpu.memory_space<vmem>>, vector<1x32x32xf32>
    %148 = vector.shape_cast %147 : vector<1x32x32xf32> to vector<32x32xf32>
    %cst_112 = arith.constant dense<0.000000e+00> : vector<2x32xf32>
    %149 = tpu.matmul %93, %148, %cst_112 {dimension_numbers = #tpu.dot_dimension_numbers<[1], [0], [0], [1], [0, 0, 1, 1], [], []>} : vector<2x32xf32>, vector<32x32xf32>, vector<2x32xf32> -> vector<2x32xf32>
    %150 = arith.addf %146, %149 : vector<2x32xf32>
    %c5_113 = arith.constant 5 : index
    %c6_114 = arith.constant 6 : index
    %c0_115 = arith.constant 0 : index
    %c0_116 = arith.constant 0 : index
    %151 = vector.load %arg1[%c5_113, %c6_114, %c0_115, %c0_116] : memref<8x8x2x32xf32, #tpu.memory_space<vmem>>, vector<1x1x2x32xf32>
    %152 = vector.shape_cast %151 : vector<1x1x2x32xf32> to vector<2x32xf32>
    %c5_117 = arith.constant 5 : index
    %c0_118 = arith.constant 0 : index
    %c0_119 = arith.constant 0 : index
    %153 = vector.load %arg2[%c5_117, %c0_118, %c0_119] : memref<8x32x32xf32, #tpu.memory_space<vmem>>, vector<1x32x32xf32>
    %154 = vector.shape_cast %153 : vector<1x32x32xf32> to vector<32x32xf32>
    %cst_120 = arith.constant dense<0.000000e+00> : vector<2x32xf32>
    %155 = tpu.matmul %93, %154, %cst_120 {dimension_numbers = #tpu.dot_dimension_numbers<[1], [0], [0], [1], [0, 0, 1, 1], [], []>} : vector<2x32xf32>, vector<32x32xf32>, vector<2x32xf32> -> vector<2x32xf32>
    %156 = arith.addf %152, %155 : vector<2x32xf32>
    %c6_121 = arith.constant 6 : index
    %c6_122 = arith.constant 6 : index
    %c0_123 = arith.constant 0 : index
    %c0_124 = arith.constant 0 : index
    %157 = vector.load %arg1[%c6_121, %c6_122, %c0_123, %c0_124] : memref<8x8x2x32xf32, #tpu.memory_space<vmem>>, vector<1x1x2x32xf32>
    %158 = vector.shape_cast %157 : vector<1x1x2x32xf32> to vector<2x32xf32>
    %c6_125 = arith.constant 6 : index
    %c0_126 = arith.constant 0 : index
    %c0_127 = arith.constant 0 : index
    %159 = vector.load %arg2[%c6_125, %c0_126, %c0_127] : memref<8x32x32xf32, #tpu.memory_space<vmem>>, vector<1x32x32xf32>
    %160 = vector.shape_cast %159 : vector<1x32x32xf32> to vector<32x32xf32>
    %cst_128 = arith.constant dense<0.000000e+00> : vector<2x32xf32>
    %161 = tpu.matmul %93, %160, %cst_128 {dimension_numbers = #tpu.dot_dimension_numbers<[1], [0], [0], [1], [0, 0, 1, 1], [], []>} : vector<2x32xf32>, vector<32x32xf32>, vector<2x32xf32> -> vector<2x32xf32>
    %162 = arith.addf %158, %161 : vector<2x32xf32>
    %c7_129 = arith.constant 7 : index
    %c6_130 = arith.constant 6 : index
    %c0_131 = arith.constant 0 : index
    %c0_132 = arith.constant 0 : index
    %163 = vector.load %arg1[%c7_129, %c6_130, %c0_131, %c0_132] : memref<8x8x2x32xf32, #tpu.memory_space<vmem>>, vector<1x1x2x32xf32>
    %164 = vector.shape_cast %163 : vector<1x1x2x32xf32> to vector<2x32xf32>
    %c7_133 = arith.constant 7 : index
    %c0_134 = arith.constant 0 : index
    %c0_135 = arith.constant 0 : index
    %165 = vector.load %arg2[%c7_133, %c0_134, %c0_135] : memref<8x32x32xf32, #tpu.memory_space<vmem>>, vector<1x32x32xf32>
    %166 = vector.shape_cast %165 : vector<1x32x32xf32> to vector<32x32xf32>
    %cst_136 = arith.constant dense<0.000000e+00> : vector<2x32xf32>
    %167 = tpu.matmul %93, %166, %cst_136 {dimension_numbers = #tpu.dot_dimension_numbers<[1], [0], [0], [1], [0, 0, 1, 1], [], []>} : vector<2x32xf32>, vector<32x32xf32>, vector<2x32xf32> -> vector<2x32xf32>
    %168 = arith.addf %164, %167 : vector<2x32xf32>
    %169 = arith.negf %150 : vector<2x32xf32>
    %170 = math.exp %169 : vector<2x32xf32>
    %cst_137 = arith.constant 1.000000e+00 : f32
    %171 = vector.broadcast %cst_137 : f32 to vector<2x32xf32>
    %172 = arith.addf %171, %170 : vector<2x32xf32>
    %173 = arith.divf %171, %172 : vector<2x32xf32>
    %174 = arith.negf %156 : vector<2x32xf32>
    %175 = math.exp %174 : vector<2x32xf32>
    %cst_138 = arith.constant 1.000000e+00 : f32
    %176 = vector.broadcast %cst_138 : f32 to vector<2x32xf32>
    %177 = arith.addf %176, %175 : vector<2x32xf32>
    %178 = arith.divf %176, %177 : vector<2x32xf32>
    %179 = math.tanh %162 : vector<2x32xf32>
    %180 = arith.negf %168 : vector<2x32xf32>
    %181 = math.exp %180 : vector<2x32xf32>
    %cst_139 = arith.constant 1.000000e+00 : f32
    %182 = vector.broadcast %cst_139 : f32 to vector<2x32xf32>
    %183 = arith.addf %182, %181 : vector<2x32xf32>
    %184 = arith.divf %182, %183 : vector<2x32xf32>
    %185 = arith.mulf %178, %91 : vector<2x32xf32>
    %186 = arith.mulf %173, %179 : vector<2x32xf32>
    %187 = arith.addf %185, %186 : vector<2x32xf32>
    %188 = math.tanh %187 : vector<2x32xf32>
    %189 = arith.mulf %184, %188 : vector<2x32xf32>
    %c6_140 = arith.constant 6 : index
    %c0_141 = arith.constant 0 : index
    %c32_142 = arith.constant 32 : index
    %190 = vector.load %arg3[%c6_140, %c0_141, %c32_142] : memref<8x2x64xf32, #tpu.memory_space<vmem>>, vector<1x2x32xf32>
    %191 = vector.shape_cast %190 : vector<1x2x32xf32> to vector<2x32xf32>
    %192 = vector.shape_cast %189 : vector<2x32xf32> to vector<1x2x32xf32>
    tpu.vector_store %arg3[%c6_140, %c0_141, %c32_142], %192 {strides = array<i32>} : memref<8x2x64xf32, #tpu.memory_space<vmem>>, vector<1x2x32xf32>,
    %c0_143 = arith.constant 0 : index
    %c2_144 = arith.constant 2 : index
    %c0_145 = arith.constant 0 : index
    %c0_146 = arith.constant 0 : index
    %193 = vector.load %arg1[%c0_143, %c2_144, %c0_145, %c0_146] : memref<8x8x2x32xf32, #tpu.memory_space<vmem>>, vector<1x1x2x32xf32>
    %194 = vector.shape_cast %193 : vector<1x1x2x32xf32> to vector<2x32xf32>
    %c0_147 = arith.constant 0 : index
    %c0_148 = arith.constant 0 : index
    %c0_149 = arith.constant 0 : index
    %195 = vector.load %arg2[%c0_147, %c0_148, %c0_149] : memref<8x32x32xf32, #tpu.memory_space<vmem>>, vector<1x32x32xf32>
    %196 = vector.shape_cast %195 : vector<1x32x32xf32> to vector<32x32xf32>
    %cst_150 = arith.constant dense<0.000000e+00> : vector<2x32xf32>
    %197 = tpu.matmul %141, %196, %cst_150 {dimension_numbers = #tpu.dot_dimension_numbers<[1], [0], [0], [1], [0, 0, 1, 1], [], []>} : vector<2x32xf32>, vector<32x32xf32>, vector<2x32xf32> -> vector<2x32xf32>
    %198 = arith.addf %194, %197 : vector<2x32xf32>
    %c1_151 = arith.constant 1 : index
    %c2_152 = arith.constant 2 : index
    %c0_153 = arith.constant 0 : index
    %c0_154 = arith.constant 0 : index
    %199 = vector.load %arg1[%c1_151, %c2_152, %c0_153, %c0_154] : memref<8x8x2x32xf32, #tpu.memory_space<vmem>>, vector<1x1x2x32xf32>
    %200 = vector.shape_cast %199 : vector<1x1x2x32xf32> to vector<2x32xf32>
    %c1_155 = arith.constant 1 : index
    %c0_156 = arith.constant 0 : index
    %c0_157 = arith.constant 0 : index
    %201 = vector.load %arg2[%c1_155, %c0_156, %c0_157] : memref<8x32x32xf32, #tpu.memory_space<vmem>>, vector<1x32x32xf32>
    %202 = vector.shape_cast %201 : vector<1x32x32xf32> to vector<32x32xf32>
    %cst_158 = arith.constant dense<0.000000e+00> : vector<2x32xf32>
    %203 = tpu.matmul %141, %202, %cst_158 {dimension_numbers = #tpu.dot_dimension_numbers<[1], [0], [0], [1], [0, 0, 1, 1], [], []>} : vector<2x32xf32>, vector<32x32xf32>, vector<2x32xf32> -> vector<2x32xf32>
    %204 = arith.addf %200, %203 : vector<2x32xf32>
    %c2_159 = arith.constant 2 : index
    %c2_160 = arith.constant 2 : index
    %c0_161 = arith.constant 0 : index
    %c0_162 = arith.constant 0 : index
    %205 = vector.load %arg1[%c2_159, %c2_160, %c0_161, %c0_162] : memref<8x8x2x32xf32, #tpu.memory_space<vmem>>, vector<1x1x2x32xf32>
    %206 = vector.shape_cast %205 : vector<1x1x2x32xf32> to vector<2x32xf32>
    %c2_163 = arith.constant 2 : index
    %c0_164 = arith.constant 0 : index
    %c0_165 = arith.constant 0 : index
    %207 = vector.load %arg2[%c2_163, %c0_164, %c0_165] : memref<8x32x32xf32, #tpu.memory_space<vmem>>, vector<1x32x32xf32>
    %208 = vector.shape_cast %207 : vector<1x32x32xf32> to vector<32x32xf32>
    %cst_166 = arith.constant dense<0.000000e+00> : vector<2x32xf32>
    %209 = tpu.matmul %141, %208, %cst_166 {dimension_numbers = #tpu.dot_dimension_numbers<[1], [0], [0], [1], [0, 0, 1, 1], [], []>} : vector<2x32xf32>, vector<32x32xf32>, vector<2x32xf32> -> vector<2x32xf32>
    %210 = arith.addf %206, %209 : vector<2x32xf32>
    %c3_167 = arith.constant 3 : index
    %c2_168 = arith.constant 2 : index
    %c0_169 = arith.constant 0 : index
    %c0_170 = arith.constant 0 : index
    %211 = vector.load %arg1[%c3_167, %c2_168, %c0_169, %c0_170] : memref<8x8x2x32xf32, #tpu.memory_space<vmem>>, vector<1x1x2x32xf32>
    %212 = vector.shape_cast %211 : vector<1x1x2x32xf32> to vector<2x32xf32>
    %c3_171 = arith.constant 3 : index
    %c0_172 = arith.constant 0 : index
    %c0_173 = arith.constant 0 : index
    %213 = vector.load %arg2[%c3_171, %c0_172, %c0_173] : memref<8x32x32xf32, #tpu.memory_space<vmem>>, vector<1x32x32xf32>
    %214 = vector.shape_cast %213 : vector<1x32x32xf32> to vector<32x32xf32>
    %cst_174 = arith.constant dense<0.000000e+00> : vector<2x32xf32>
    %215 = tpu.matmul %141, %214, %cst_174 {dimension_numbers = #tpu.dot_dimension_numbers<[1], [0], [0], [1], [0, 0, 1, 1], [], []>} : vector<2x32xf32>, vector<32x32xf32>, vector<2x32xf32> -> vector<2x32xf32>
    %216 = arith.addf %212, %215 : vector<2x32xf32>
    %217 = arith.negf %198 : vector<2x32xf32>
    %218 = math.exp %217 : vector<2x32xf32>
    %cst_175 = arith.constant 1.000000e+00 : f32
    %219 = vector.broadcast %cst_175 : f32 to vector<2x32xf32>
    %220 = arith.addf %219, %218 : vector<2x32xf32>
    %221 = arith.divf %219, %220 : vector<2x32xf32>
    %222 = arith.negf %204 : vector<2x32xf32>
    %223 = math.exp %222 : vector<2x32xf32>
    %cst_176 = arith.constant 1.000000e+00 : f32
    %224 = vector.broadcast %cst_176 : f32 to vector<2x32xf32>
    %225 = arith.addf %224, %223 : vector<2x32xf32>
    %226 = arith.divf %224, %225 : vector<2x32xf32>
    %227 = math.tanh %210 : vector<2x32xf32>
    %228 = arith.negf %216 : vector<2x32xf32>
    %229 = math.exp %228 : vector<2x32xf32>
    %cst_177 = arith.constant 1.000000e+00 : f32
    %230 = vector.broadcast %cst_177 : f32 to vector<2x32xf32>
    %231 = arith.addf %230, %229 : vector<2x32xf32>
    %232 = arith.divf %230, %231 : vector<2x32xf32>
    %233 = arith.mulf %226, %139 : vector<2x32xf32>
    %234 = arith.mulf %221, %227 : vector<2x32xf32>
    %235 = arith.addf %233, %234 : vector<2x32xf32>
    %236 = math.tanh %235 : vector<2x32xf32>
    %237 = arith.mulf %232, %236 : vector<2x32xf32>
    %c2_178 = arith.constant 2 : index
    %c0_179 = arith.constant 0 : index
    %c0_180 = arith.constant 0 : index
    %238 = vector.load %arg3[%c2_178, %c0_179, %c0_180] : memref<8x2x64xf32, #tpu.memory_space<vmem>>, vector<1x2x32xf32>
    %239 = vector.shape_cast %238 : vector<1x2x32xf32> to vector<2x32xf32>
    %240 = vector.shape_cast %237 : vector<2x32xf32> to vector<1x2x32xf32>
    tpu.vector_store %arg3[%c2_178, %c0_179, %c0_180], %240 {strides = array<i32>} : memref<8x2x64xf32, #tpu.memory_space<vmem>>, vector<1x2x32xf32>,
    %c4_181 = arith.constant 4 : index
    %c5_182 = arith.constant 5 : index
    %c0_183 = arith.constant 0 : index
    %c0_184 = arith.constant 0 : index
    %241 = vector.load %arg1[%c4_181, %c5_182, %c0_183, %c0_184] : memref<8x8x2x32xf32, #tpu.memory_space<vmem>>, vector<1x1x2x32xf32>
    %242 = vector.shape_cast %241 : vector<1x1x2x32xf32> to vector<2x32xf32>
    %c4_185 = arith.constant 4 : index
    %c0_186 = arith.constant 0 : index
    %c0_187 = arith.constant 0 : index
    %243 = vector.load %arg2[%c4_185, %c0_186, %c0_187] : memref<8x32x32xf32, #tpu.memory_space<vmem>>, vector<1x32x32xf32>
    %244 = vector.shape_cast %243 : vector<1x32x32xf32> to vector<32x32xf32>
    %cst_188 = arith.constant dense<0.000000e+00> : vector<2x32xf32>
    %245 = tpu.matmul %189, %244, %cst_188 {dimension_numbers = #tpu.dot_dimension_numbers<[1], [0], [0], [1], [0, 0, 1, 1], [], []>} : vector<2x32xf32>, vector<32x32xf32>, vector<2x32xf32> -> vector<2x32xf32>
    %246 = arith.addf %242, %245 : vector<2x32xf32>
    %c5_189 = arith.constant 5 : index
    %c5_190 = arith.constant 5 : index
    %c0_191 = arith.constant 0 : index
    %c0_192 = arith.constant 0 : index
    %247 = vector.load %arg1[%c5_189, %c5_190, %c0_191, %c0_192] : memref<8x8x2x32xf32, #tpu.memory_space<vmem>>, vector<1x1x2x32xf32>
    %248 = vector.shape_cast %247 : vector<1x1x2x32xf32> to vector<2x32xf32>
    %c5_193 = arith.constant 5 : index
    %c0_194 = arith.constant 0 : index
    %c0_195 = arith.constant 0 : index
    %249 = vector.load %arg2[%c5_193, %c0_194, %c0_195] : memref<8x32x32xf32, #tpu.memory_space<vmem>>, vector<1x32x32xf32>
    %250 = vector.shape_cast %249 : vector<1x32x32xf32> to vector<32x32xf32>
    %cst_196 = arith.constant dense<0.000000e+00> : vector<2x32xf32>
    %251 = tpu.matmul %189, %250, %cst_196 {dimension_numbers = #tpu.dot_dimension_numbers<[1], [0], [0], [1], [0, 0, 1, 1], [], []>} : vector<2x32xf32>, vector<32x32xf32>, vector<2x32xf32> -> vector<2x32xf32>
    %252 = arith.addf %248, %251 : vector<2x32xf32>
    %c6_197 = arith.constant 6 : index
    %c5_198 = arith.constant 5 : index
    %c0_199 = arith.constant 0 : index
    %c0_200 = arith.constant 0 : index
    %253 = vector.load %arg1[%c6_197, %c5_198, %c0_199, %c0_200] : memref<8x8x2x32xf32, #tpu.memory_space<vmem>>, vector<1x1x2x32xf32>
    %254 = vector.shape_cast %253 : vector<1x1x2x32xf32> to vector<2x32xf32>
    %c6_201 = arith.constant 6 : index
    %c0_202 = arith.constant 0 : index
    %c0_203 = arith.constant 0 : index
    %255 = vector.load %arg2[%c6_201, %c0_202, %c0_203] : memref<8x32x32xf32, #tpu.memory_space<vmem>>, vector<1x32x32xf32>
    %256 = vector.shape_cast %255 : vector<1x32x32xf32> to vector<32x32xf32>
    %cst_204 = arith.constant dense<0.000000e+00> : vector<2x32xf32>
    %257 = tpu.matmul %189, %256, %cst_204 {dimension_numbers = #tpu.dot_dimension_numbers<[1], [0], [0], [1], [0, 0, 1, 1], [], []>} : vector<2x32xf32>, vector<32x32xf32>, vector<2x32xf32> -> vector<2x32xf32>
    %258 = arith.addf %254, %257 : vector<2x32xf32>
    %c7_205 = arith.constant 7 : index
    %c5_206 = arith.constant 5 : index
    %c0_207 = arith.constant 0 : index
    %c0_208 = arith.constant 0 : index
    %259 = vector.load %arg1[%c7_205, %c5_206, %c0_207, %c0_208] : memref<8x8x2x32xf32, #tpu.memory_space<vmem>>, vector<1x1x2x32xf32>
    %260 = vector.shape_cast %259 : vector<1x1x2x32xf32> to vector<2x32xf32>
    %c7_209 = arith.constant 7 : index
    %c0_210 = arith.constant 0 : index
    %c0_211 = arith.constant 0 : index
    %261 = vector.load %arg2[%c7_209, %c0_210, %c0_211] : memref<8x32x32xf32, #tpu.memory_space<vmem>>, vector<1x32x32xf32>
    %262 = vector.shape_cast %261 : vector<1x32x32xf32> to vector<32x32xf32>
    %cst_212 = arith.constant dense<0.000000e+00> : vector<2x32xf32>
    %263 = tpu.matmul %189, %262, %cst_212 {dimension_numbers = #tpu.dot_dimension_numbers<[1], [0], [0], [1], [0, 0, 1, 1], [], []>} : vector<2x32xf32>, vector<32x32xf32>, vector<2x32xf32> -> vector<2x32xf32>
    %264 = arith.addf %260, %263 : vector<2x32xf32>
    %265 = arith.negf %246 : vector<2x32xf32>
    %266 = math.exp %265 : vector<2x32xf32>
    %cst_213 = arith.constant 1.000000e+00 : f32
    %267 = vector.broadcast %cst_213 : f32 to vector<2x32xf32>
    %268 = arith.addf %267, %266 : vector<2x32xf32>
    %269 = arith.divf %267, %268 : vector<2x32xf32>
    %270 = arith.negf %252 : vector<2x32xf32>
    %271 = math.exp %270 : vector<2x32xf32>
    %cst_214 = arith.constant 1.000000e+00 : f32
    %272 = vector.broadcast %cst_214 : f32 to vector<2x32xf32>
    %273 = arith.addf %272, %271 : vector<2x32xf32>
    %274 = arith.divf %272, %273 : vector<2x32xf32>
    %275 = math.tanh %258 : vector<2x32xf32>
    %276 = arith.negf %264 : vector<2x32xf32>
    %277 = math.exp %276 : vector<2x32xf32>
    %cst_215 = arith.constant 1.000000e+00 : f32
    %278 = vector.broadcast %cst_215 : f32 to vector<2x32xf32>
    %279 = arith.addf %278, %277 : vector<2x32xf32>
    %280 = arith.divf %278, %279 : vector<2x32xf32>
    %281 = arith.mulf %274, %187 : vector<2x32xf32>
    %282 = arith.mulf %269, %275 : vector<2x32xf32>
    %283 = arith.addf %281, %282 : vector<2x32xf32>
    %284 = math.tanh %283 : vector<2x32xf32>
    %285 = arith.mulf %280, %284 : vector<2x32xf32>
    %c5_216 = arith.constant 5 : index
    %c0_217 = arith.constant 0 : index
    %c32_218 = arith.constant 32 : index
    %286 = vector.load %arg3[%c5_216, %c0_217, %c32_218] : memref<8x2x64xf32, #tpu.memory_space<vmem>>, vector<1x2x32xf32>
    %287 = vector.shape_cast %286 : vector<1x2x32xf32> to vector<2x32xf32>
    %288 = vector.shape_cast %285 : vector<2x32xf32> to vector<1x2x32xf32>
    tpu.vector_store %arg3[%c5_216, %c0_217, %c32_218], %288 {strides = array<i32>} : memref<8x2x64xf32, #tpu.memory_space<vmem>>, vector<1x2x32xf32>,
    %c0_219 = arith.constant 0 : index
    %c3_220 = arith.constant 3 : index
    %c0_221 = arith.constant 0 : index
    %c0_222 = arith.constant 0 : index
    %289 = vector.load %arg1[%c0_219, %c3_220, %c0_221, %c0_222] : memref<8x8x2x32xf32, #tpu.memory_space<vmem>>, vector<1x1x2x32xf32>
    %290 = vector.shape_cast %289 : vector<1x1x2x32xf32> to vector<2x32xf32>
    %c0_223 = arith.constant 0 : index
    %c0_224 = arith.constant 0 : index
    %c0_225 = arith.constant 0 : index
    %291 = vector.load %arg2[%c0_223, %c0_224, %c0_225] : memref<8x32x32xf32, #tpu.memory_space<vmem>>, vector<1x32x32xf32>
    %292 = vector.shape_cast %291 : vector<1x32x32xf32> to vector<32x32xf32>
    %cst_226 = arith.constant dense<0.000000e+00> : vector<2x32xf32>
    %293 = tpu.matmul %237, %292, %cst_226 {dimension_numbers = #tpu.dot_dimension_numbers<[1], [0], [0], [1], [0, 0, 1, 1], [], []>} : vector<2x32xf32>, vector<32x32xf32>, vector<2x32xf32> -> vector<2x32xf32>
    %294 = arith.addf %290, %293 : vector<2x32xf32>
    %c1_227 = arith.constant 1 : index
    %c3_228 = arith.constant 3 : index
    %c0_229 = arith.constant 0 : index
    %c0_230 = arith.constant 0 : index
    %295 = vector.load %arg1[%c1_227, %c3_228, %c0_229, %c0_230] : memref<8x8x2x32xf32, #tpu.memory_space<vmem>>, vector<1x1x2x32xf32>
    %296 = vector.shape_cast %295 : vector<1x1x2x32xf32> to vector<2x32xf32>
    %c1_231 = arith.constant 1 : index
    %c0_232 = arith.constant 0 : index
    %c0_233 = arith.constant 0 : index
    %297 = vector.load %arg2[%c1_231, %c0_232, %c0_233] : memref<8x32x32xf32, #tpu.memory_space<vmem>>, vector<1x32x32xf32>
    %298 = vector.shape_cast %297 : vector<1x32x32xf32> to vector<32x32xf32>
    %cst_234 = arith.constant dense<0.000000e+00> : vector<2x32xf32>
    %299 = tpu.matmul %237, %298, %cst_234 {dimension_numbers = #tpu.dot_dimension_numbers<[1], [0], [0], [1], [0, 0, 1, 1], [], []>} : vector<2x32xf32>, vector<32x32xf32>, vector<2x32xf32> -> vector<2x32xf32>
    %300 = arith.addf %296, %299 : vector<2x32xf32>
    %c2_235 = arith.constant 2 : index
    %c3_236 = arith.constant 3 : index
    %c0_237 = arith.constant 0 : index
    %c0_238 = arith.constant 0 : index
    %301 = vector.load %arg1[%c2_235, %c3_236, %c0_237, %c0_238] : memref<8x8x2x32xf32, #tpu.memory_space<vmem>>, vector<1x1x2x32xf32>
    %302 = vector.shape_cast %301 : vector<1x1x2x32xf32> to vector<2x32xf32>
    %c2_239 = arith.constant 2 : index
    %c0_240 = arith.constant 0 : index
    %c0_241 = arith.constant 0 : index
    %303 = vector.load %arg2[%c2_239, %c0_240, %c0_241] : memref<8x32x32xf32, #tpu.memory_space<vmem>>, vector<1x32x32xf32>
    %304 = vector.shape_cast %303 : vector<1x32x32xf32> to vector<32x32xf32>
    %cst_242 = arith.constant dense<0.000000e+00> : vector<2x32xf32>
    %305 = tpu.matmul %237, %304, %cst_242 {dimension_numbers = #tpu.dot_dimension_numbers<[1], [0], [0], [1], [0, 0, 1, 1], [], []>} : vector<2x32xf32>, vector<32x32xf32>, vector<2x32xf32> -> vector<2x32xf32>
    %306 = arith.addf %302, %305 : vector<2x32xf32>
    %c3_243 = arith.constant 3 : index
    %c3_244 = arith.constant 3 : index
    %c0_245 = arith.constant 0 : index
    %c0_246 = arith.constant 0 : index
    %307 = vector.load %arg1[%c3_243, %c3_244, %c0_245, %c0_246] : memref<8x8x2x32xf32, #tpu.memory_space<vmem>>, vector<1x1x2x32xf32>
    %308 = vector.shape_cast %307 : vector<1x1x2x32xf32> to vector<2x32xf32>
    %c3_247 = arith.constant 3 : index
    %c0_248 = arith.constant 0 : index
    %c0_249 = arith.constant 0 : index
    %309 = vector.load %arg2[%c3_247, %c0_248, %c0_249] : memref<8x32x32xf32, #tpu.memory_space<vmem>>, vector<1x32x32xf32>
    %310 = vector.shape_cast %309 : vector<1x32x32xf32> to vector<32x32xf32>
    %cst_250 = arith.constant dense<0.000000e+00> : vector<2x32xf32>
    %311 = tpu.matmul %237, %310, %cst_250 {dimension_numbers = #tpu.dot_dimension_numbers<[1], [0], [0], [1], [0, 0, 1, 1], [], []>} : vector<2x32xf32>, vector<32x32xf32>, vector<2x32xf32> -> vector<2x32xf32>
    %312 = arith.addf %308, %311 : vector<2x32xf32>
    %313 = arith.negf %294 : vector<2x32xf32>
    %314 = math.exp %313 : vector<2x32xf32>
    %cst_251 = arith.constant 1.000000e+00 : f32
    %315 = vector.broadcast %cst_251 : f32 to vector<2x32xf32>
    %316 = arith.addf %315, %314 : vector<2x32xf32>
    %317 = arith.divf %315, %316 : vector<2x32xf32>
    %318 = arith.negf %300 : vector<2x32xf32>
    %319 = math.exp %318 : vector<2x32xf32>
    %cst_252 = arith.constant 1.000000e+00 : f32
    %320 = vector.broadcast %cst_252 : f32 to vector<2x32xf32>
    %321 = arith.addf %320, %319 : vector<2x32xf32>
    %322 = arith.divf %320, %321 : vector<2x32xf32>
    %323 = math.tanh %306 : vector<2x32xf32>
    %324 = arith.negf %312 : vector<2x32xf32>
    %325 = math.exp %324 : vector<2x32xf32>
    %cst_253 = arith.constant 1.000000e+00 : f32
    %326 = vector.broadcast %cst_253 : f32 to vector<2x32xf32>
    %327 = arith.addf %326, %325 : vector<2x32xf32>
    %328 = arith.divf %326, %327 : vector<2x32xf32>
    %329 = arith.mulf %322, %235 : vector<2x32xf32>
    %330 = arith.mulf %317, %323 : vector<2x32xf32>
    %331 = arith.addf %329, %330 : vector<2x32xf32>
    %332 = math.tanh %331 : vector<2x32xf32>
    %333 = arith.mulf %328, %332 : vector<2x32xf32>
    %c3_254 = arith.constant 3 : index
    %c0_255 = arith.constant 0 : index
    %c0_256 = arith.constant 0 : index
    %334 = vector.load %arg3[%c3_254, %c0_255, %c0_256] : memref<8x2x64xf32, #tpu.memory_space<vmem>>, vector<1x2x32xf32>
    %335 = vector.shape_cast %334 : vector<1x2x32xf32> to vector<2x32xf32>
    %336 = vector.shape_cast %333 : vector<2x32xf32> to vector<1x2x32xf32>
    tpu.vector_store %arg3[%c3_254, %c0_255, %c0_256], %336 {strides = array<i32>} : memref<8x2x64xf32, #tpu.memory_space<vmem>>, vector<1x2x32xf32>,
    %c4_257 = arith.constant 4 : index
    %c4_258 = arith.constant 4 : index
    %c0_259 = arith.constant 0 : index
    %c0_260 = arith.constant 0 : index
    %337 = vector.load %arg1[%c4_257, %c4_258, %c0_259, %c0_260] : memref<8x8x2x32xf32, #tpu.memory_space<vmem>>, vector<1x1x2x32xf32>
    %338 = vector.shape_cast %337 : vector<1x1x2x32xf32> to vector<2x32xf32>
    %c4_261 = arith.constant 4 : index
    %c0_262 = arith.constant 0 : index
    %c0_263 = arith.constant 0 : index
    %339 = vector.load %arg2[%c4_261, %c0_262, %c0_263] : memref<8x32x32xf32, #tpu.memory_space<vmem>>, vector<1x32x32xf32>
    %340 = vector.shape_cast %339 : vector<1x32x32xf32> to vector<32x32xf32>
    %cst_264 = arith.constant dense<0.000000e+00> : vector<2x32xf32>
    %341 = tpu.matmul %285, %340, %cst_264 {dimension_numbers = #tpu.dot_dimension_numbers<[1], [0], [0], [1], [0, 0, 1, 1], [], []>} : vector<2x32xf32>, vector<32x32xf32>, vector<2x32xf32> -> vector<2x32xf32>
    %342 = arith.addf %338, %341 : vector<2x32xf32>
    %c5_265 = arith.constant 5 : index
    %c4_266 = arith.constant 4 : index
    %c0_267 = arith.constant 0 : index
    %c0_268 = arith.constant 0 : index
    %343 = vector.load %arg1[%c5_265, %c4_266, %c0_267, %c0_268] : memref<8x8x2x32xf32, #tpu.memory_space<vmem>>, vector<1x1x2x32xf32>
    %344 = vector.shape_cast %343 : vector<1x1x2x32xf32> to vector<2x32xf32>
    %c5_269 = arith.constant 5 : index
    %c0_270 = arith.constant 0 : index
    %c0_271 = arith.constant 0 : index
    %345 = vector.load %arg2[%c5_269, %c0_270, %c0_271] : memref<8x32x32xf32, #tpu.memory_space<vmem>>, vector<1x32x32xf32>
    %346 = vector.shape_cast %345 : vector<1x32x32xf32> to vector<32x32xf32>
    %cst_272 = arith.constant dense<0.000000e+00> : vector<2x32xf32>
    %347 = tpu.matmul %285, %346, %cst_272 {dimension_numbers = #tpu.dot_dimension_numbers<[1], [0], [0], [1], [0, 0, 1, 1], [], []>} : vector<2x32xf32>, vector<32x32xf32>, vector<2x32xf32> -> vector<2x32xf32>
    %348 = arith.addf %344, %347 : vector<2x32xf32>
    %c6_273 = arith.constant 6 : index
    %c4_274 = arith.constant 4 : index
    %c0_275 = arith.constant 0 : index
    %c0_276 = arith.constant 0 : index
    %349 = vector.load %arg1[%c6_273, %c4_274, %c0_275, %c0_276] : memref<8x8x2x32xf32, #tpu.memory_space<vmem>>, vector<1x1x2x32xf32>
    %350 = vector.shape_cast %349 : vector<1x1x2x32xf32> to vector<2x32xf32>
    %c6_277 = arith.constant 6 : index
    %c0_278 = arith.constant 0 : index
    %c0_279 = arith.constant 0 : index
    %351 = vector.load %arg2[%c6_277, %c0_278, %c0_279] : memref<8x32x32xf32, #tpu.memory_space<vmem>>, vector<1x32x32xf32>
    %352 = vector.shape_cast %351 : vector<1x32x32xf32> to vector<32x32xf32>
    %cst_280 = arith.constant dense<0.000000e+00> : vector<2x32xf32>
    %353 = tpu.matmul %285, %352, %cst_280 {dimension_numbers = #tpu.dot_dimension_numbers<[1], [0], [0], [1], [0, 0, 1, 1], [], []>} : vector<2x32xf32>, vector<32x32xf32>, vector<2x32xf32> -> vector<2x32xf32>
    %354 = arith.addf %350, %353 : vector<2x32xf32>
    %c7_281 = arith.constant 7 : index
    %c4_282 = arith.constant 4 : index
    %c0_283 = arith.constant 0 : index
    %c0_284 = arith.constant 0 : index
    %355 = vector.load %arg1[%c7_281, %c4_282, %c0_283, %c0_284] : memref<8x8x2x32xf32, #tpu.memory_space<vmem>>, vector<1x1x2x32xf32>
    %356 = vector.shape_cast %355 : vector<1x1x2x32xf32> to vector<2x32xf32>
    %c7_285 = arith.constant 7 : index
    %c0_286 = arith.constant 0 : index
    %c0_287 = arith.constant 0 : index
    %357 = vector.load %arg2[%c7_285, %c0_286, %c0_287] : memref<8x32x32xf32, #tpu.memory_space<vmem>>, vector<1x32x32xf32>
    %358 = vector.shape_cast %357 : vector<1x32x32xf32> to vector<32x32xf32>
    %cst_288 = arith.constant dense<0.000000e+00> : vector<2x32xf32>
    %359 = tpu.matmul %285, %358, %cst_288 {dimension_numbers = #tpu.dot_dimension_numbers<[1], [0], [0], [1], [0, 0, 1, 1], [], []>} : vector<2x32xf32>, vector<32x32xf32>, vector<2x32xf32> -> vector<2x32xf32>
    %360 = arith.addf %356, %359 : vector<2x32xf32>
    %361 = arith.negf %342 : vector<2x32xf32>
    %362 = math.exp %361 : vector<2x32xf32>
    %cst_289 = arith.constant 1.000000e+00 : f32
    %363 = vector.broadcast %cst_289 : f32 to vector<2x32xf32>
    %364 = arith.addf %363, %362 : vector<2x32xf32>
    %365 = arith.divf %363, %364 : vector<2x32xf32>
    %366 = arith.negf %348 : vector<2x32xf32>
    %367 = math.exp %366 : vector<2x32xf32>
    %cst_290 = arith.constant 1.000000e+00 : f32
    %368 = vector.broadcast %cst_290 : f32 to vector<2x32xf32>
    %369 = arith.addf %368, %367 : vector<2x32xf32>
    %370 = arith.divf %368, %369 : vector<2x32xf32>
    %371 = math.tanh %354 : vector<2x32xf32>
    %372 = arith.negf %360 : vector<2x32xf32>
    %373 = math.exp %372 : vector<2x32xf32>
    %cst_291 = arith.constant 1.000000e+00 : f32
    %374 = vector.broadcast %cst_291 : f32 to vector<2x32xf32>
    %375 = arith.addf %374, %373 : vector<2x32xf32>
    %376 = arith.divf %374, %375 : vector<2x32xf32>
    %377 = arith.mulf %370, %283 : vector<2x32xf32>
    %378 = arith.mulf %365, %371 : vector<2x32xf32>
    %379 = arith.addf %377, %378 : vector<2x32xf32>
    %380 = math.tanh %379 : vector<2x32xf32>
    %381 = arith.mulf %376, %380 : vector<2x32xf32>
    %c4_292 = arith.constant 4 : index
    %c0_293 = arith.constant 0 : index
    %c32_294 = arith.constant 32 : index
    %382 = vector.load %arg3[%c4_292, %c0_293, %c32_294] : memref<8x2x64xf32, #tpu.memory_space<vmem>>, vector<1x2x32xf32>
    %383 = vector.shape_cast %382 : vector<1x2x32xf32> to vector<2x32xf32>
    %384 = vector.shape_cast %381 : vector<2x32xf32> to vector<1x2x32xf32>
    tpu.vector_store %arg3[%c4_292, %c0_293, %c32_294], %384 {strides = array<i32>} : memref<8x2x64xf32, #tpu.memory_space<vmem>>, vector<1x2x32xf32>,
    %c0_295 = arith.constant 0 : index
    %c4_296 = arith.constant 4 : index
    %c0_297 = arith.constant 0 : index
    %c0_298 = arith.constant 0 : index
    %385 = vector.load %arg1[%c0_295, %c4_296, %c0_297, %c0_298] : memref<8x8x2x32xf32, #tpu.memory_space<vmem>>, vector<1x1x2x32xf32>
    %386 = vector.shape_cast %385 : vector<1x1x2x32xf32> to vector<2x32xf32>
    %c0_299 = arith.constant 0 : index
    %c0_300 = arith.constant 0 : index
    %c0_301 = arith.constant 0 : index
    %387 = vector.load %arg2[%c0_299, %c0_300, %c0_301] : memref<8x32x32xf32, #tpu.memory_space<vmem>>, vector<1x32x32xf32>
    %388 = vector.shape_cast %387 : vector<1x32x32xf32> to vector<32x32xf32>
    %cst_302 = arith.constant dense<0.000000e+00> : vector<2x32xf32>
    %389 = tpu.matmul %333, %388, %cst_302 {dimension_numbers = #tpu.dot_dimension_numbers<[1], [0], [0], [1], [0, 0, 1, 1], [], []>} : vector<2x32xf32>, vector<32x32xf32>, vector<2x32xf32> -> vector<2x32xf32>
    %390 = arith.addf %386, %389 : vector<2x32xf32>
    %c1_303 = arith.constant 1 : index
    %c4_304 = arith.constant 4 : index
    %c0_305 = arith.constant 0 : index
    %c0_306 = arith.constant 0 : index
    %391 = vector.load %arg1[%c1_303, %c4_304, %c0_305, %c0_306] : memref<8x8x2x32xf32, #tpu.memory_space<vmem>>, vector<1x1x2x32xf32>
    %392 = vector.shape_cast %391 : vector<1x1x2x32xf32> to vector<2x32xf32>
    %c1_307 = arith.constant 1 : index
    %c0_308 = arith.constant 0 : index
    %c0_309 = arith.constant 0 : index
    %393 = vector.load %arg2[%c1_307, %c0_308, %c0_309] : memref<8x32x32xf32, #tpu.memory_space<vmem>>, vector<1x32x32xf32>
    %394 = vector.shape_cast %393 : vector<1x32x32xf32> to vector<32x32xf32>
    %cst_310 = arith.constant dense<0.000000e+00> : vector<2x32xf32>
    %395 = tpu.matmul %333, %394, %cst_310 {dimension_numbers = #tpu.dot_dimension_numbers<[1], [0], [0], [1], [0, 0, 1, 1], [], []>} : vector<2x32xf32>, vector<32x32xf32>, vector<2x32xf32> -> vector<2x32xf32>
    %396 = arith.addf %392, %395 : vector<2x32xf32>
    %c2_311 = arith.constant 2 : index
    %c4_312 = arith.constant 4 : index
    %c0_313 = arith.constant 0 : index
    %c0_314 = arith.constant 0 : index
    %397 = vector.load %arg1[%c2_311, %c4_312, %c0_313, %c0_314] : memref<8x8x2x32xf32, #tpu.memory_space<vmem>>, vector<1x1x2x32xf32>
    %398 = vector.shape_cast %397 : vector<1x1x2x32xf32> to vector<2x32xf32>
    %c2_315 = arith.constant 2 : index
    %c0_316 = arith.constant 0 : index
    %c0_317 = arith.constant 0 : index
    %399 = vector.load %arg2[%c2_315, %c0_316, %c0_317] : memref<8x32x32xf32, #tpu.memory_space<vmem>>, vector<1x32x32xf32>
    %400 = vector.shape_cast %399 : vector<1x32x32xf32> to vector<32x32xf32>
    %cst_318 = arith.constant dense<0.000000e+00> : vector<2x32xf32>
    %401 = tpu.matmul %333, %400, %cst_318 {dimension_numbers = #tpu.dot_dimension_numbers<[1], [0], [0], [1], [0, 0, 1, 1], [], []>} : vector<2x32xf32>, vector<32x32xf32>, vector<2x32xf32> -> vector<2x32xf32>
    %402 = arith.addf %398, %401 : vector<2x32xf32>
    %c3_319 = arith.constant 3 : index
    %c4_320 = arith.constant 4 : index
    %c0_321 = arith.constant 0 : index
    %c0_322 = arith.constant 0 : index
    %403 = vector.load %arg1[%c3_319, %c4_320, %c0_321, %c0_322] : memref<8x8x2x32xf32, #tpu.memory_space<vmem>>, vector<1x1x2x32xf32>
    %404 = vector.shape_cast %403 : vector<1x1x2x32xf32> to vector<2x32xf32>
    %c3_323 = arith.constant 3 : index
    %c0_324 = arith.constant 0 : index
    %c0_325 = arith.constant 0 : index
    %405 = vector.load %arg2[%c3_323, %c0_324, %c0_325] : memref<8x32x32xf32, #tpu.memory_space<vmem>>, vector<1x32x32xf32>
    %406 = vector.shape_cast %405 : vector<1x32x32xf32> to vector<32x32xf32>
    %cst_326 = arith.constant dense<0.000000e+00> : vector<2x32xf32>
    %407 = tpu.matmul %333, %406, %cst_326 {dimension_numbers = #tpu.dot_dimension_numbers<[1], [0], [0], [1], [0, 0, 1, 1], [], []>} : vector<2x32xf32>, vector<32x32xf32>, vector<2x32xf32> -> vector<2x32xf32>
    %408 = arith.addf %404, %407 : vector<2x32xf32>
    %409 = arith.negf %390 : vector<2x32xf32>
    %410 = math.exp %409 : vector<2x32xf32>
    %cst_327 = arith.constant 1.000000e+00 : f32
    %411 = vector.broadcast %cst_327 : f32 to vector<2x32xf32>
    %412 = arith.addf %411, %410 : vector<2x32xf32>
    %413 = arith.divf %411, %412 : vector<2x32xf32>
    %414 = arith.negf %396 : vector<2x32xf32>
    %415 = math.exp %414 : vector<2x32xf32>
    %cst_328 = arith.constant 1.000000e+00 : f32
    %416 = vector.broadcast %cst_328 : f32 to vector<2x32xf32>
    %417 = arith.addf %416, %415 : vector<2x32xf32>
    %418 = arith.divf %416, %417 : vector<2x32xf32>
    %419 = math.tanh %402 : vector<2x32xf32>
    %420 = arith.negf %408 : vector<2x32xf32>
    %421 = math.exp %420 : vector<2x32xf32>
    %cst_329 = arith.constant 1.000000e+00 : f32
    %422 = vector.broadcast %cst_329 : f32 to vector<2x32xf32>
    %423 = arith.addf %422, %421 : vector<2x32xf32>
    %424 = arith.divf %422, %423 : vector<2x32xf32>
    %425 = arith.mulf %418, %331 : vector<2x32xf32>
    %426 = arith.mulf %413, %419 : vector<2x32xf32>
    %427 = arith.addf %425, %426 : vector<2x32xf32>
    %428 = math.tanh %427 : vector<2x32xf32>
    %429 = arith.mulf %424, %428 : vector<2x32xf32>
    %c4_330 = arith.constant 4 : index
    %c0_331 = arith.constant 0 : index
    %c0_332 = arith.constant 0 : index
    %430 = vector.load %arg3[%c4_330, %c0_331, %c0_332] : memref<8x2x64xf32, #tpu.memory_space<vmem>>, vector<1x2x32xf32>
    %431 = vector.shape_cast %430 : vector<1x2x32xf32> to vector<2x32xf32>
    %432 = vector.shape_cast %429 : vector<2x32xf32> to vector<1x2x32xf32>
    tpu.vector_store %arg3[%c4_330, %c0_331, %c0_332], %432 {strides = array<i32>} : memref<8x2x64xf32, #tpu.memory_space<vmem>>, vector<1x2x32xf32>,
    %c4_333 = arith.constant 4 : index
    %c3_334 = arith.constant 3 : index
    %c0_335 = arith.constant 0 : index
    %c0_336 = arith.constant 0 : index
    %433 = vector.load %arg1[%c4_333, %c3_334, %c0_335, %c0_336] : memref<8x8x2x32xf32, #tpu.memory_space<vmem>>, vector<1x1x2x32xf32>
    %434 = vector.shape_cast %433 : vector<1x1x2x32xf32> to vector<2x32xf32>
    %c4_337 = arith.constant 4 : index
    %c0_338 = arith.constant 0 : index
    %c0_339 = arith.constant 0 : index
    %435 = vector.load %arg2[%c4_337, %c0_338, %c0_339] : memref<8x32x32xf32, #tpu.memory_space<vmem>>, vector<1x32x32xf32>
    %436 = vector.shape_cast %435 : vector<1x32x32xf32> to vector<32x32xf32>
    %cst_340 = arith.constant dense<0.000000e+00> : vector<2x32xf32>
    %437 = tpu.matmul %381, %436, %cst_340 {dimension_numbers = #tpu.dot_dimension_numbers<[1], [0], [0], [1], [0, 0, 1, 1], [], []>} : vector<2x32xf32>, vector<32x32xf32>, vector<2x32xf32> -> vector<2x32xf32>
    %438 = arith.addf %434, %437 : vector<2x32xf32>
    %c5_341 = arith.constant 5 : index
    %c3_342 = arith.constant 3 : index
    %c0_343 = arith.constant 0 : index
    %c0_344 = arith.constant 0 : index
    %439 = vector.load %arg1[%c5_341, %c3_342, %c0_343, %c0_344] : memref<8x8x2x32xf32, #tpu.memory_space<vmem>>, vector<1x1x2x32xf32>
    %440 = vector.shape_cast %439 : vector<1x1x2x32xf32> to vector<2x32xf32>
    %c5_345 = arith.constant 5 : index
    %c0_346 = arith.constant 0 : index
    %c0_347 = arith.constant 0 : index
    %441 = vector.load %arg2[%c5_345, %c0_346, %c0_347] : memref<8x32x32xf32, #tpu.memory_space<vmem>>, vector<1x32x32xf32>
    %442 = vector.shape_cast %441 : vector<1x32x32xf32> to vector<32x32xf32>
    %cst_348 = arith.constant dense<0.000000e+00> : vector<2x32xf32>
    %443 = tpu.matmul %381, %442, %cst_348 {dimension_numbers = #tpu.dot_dimension_numbers<[1], [0], [0], [1], [0, 0, 1, 1], [], []>} : vector<2x32xf32>, vector<32x32xf32>, vector<2x32xf32> -> vector<2x32xf32>
    %444 = arith.addf %440, %443 : vector<2x32xf32>
    %c6_349 = arith.constant 6 : index
    %c3_350 = arith.constant 3 : index
    %c0_351 = arith.constant 0 : index
    %c0_352 = arith.constant 0 : index
    %445 = vector.load %arg1[%c6_349, %c3_350, %c0_351, %c0_352] : memref<8x8x2x32xf32, #tpu.memory_space<vmem>>, vector<1x1x2x32xf32>
    %446 = vector.shape_cast %445 : vector<1x1x2x32xf32> to vector<2x32xf32>
    %c6_353 = arith.constant 6 : index
    %c0_354 = arith.constant 0 : index
    %c0_355 = arith.constant 0 : index
    %447 = vector.load %arg2[%c6_353, %c0_354, %c0_355] : memref<8x32x32xf32, #tpu.memory_space<vmem>>, vector<1x32x32xf32>
    %448 = vector.shape_cast %447 : vector<1x32x32xf32> to vector<32x32xf32>
    %cst_356 = arith.constant dense<0.000000e+00> : vector<2x32xf32>
    %449 = tpu.matmul %381, %448, %cst_356 {dimension_numbers = #tpu.dot_dimension_numbers<[1], [0], [0], [1], [0, 0, 1, 1], [], []>} : vector<2x32xf32>, vector<32x32xf32>, vector<2x32xf32> -> vector<2x32xf32>
    %450 = arith.addf %446, %449 : vector<2x32xf32>
    %c7_357 = arith.constant 7 : index
    %c3_358 = arith.constant 3 : index
    %c0_359 = arith.constant 0 : index
    %c0_360 = arith.constant 0 : index
    %451 = vector.load %arg1[%c7_357, %c3_358, %c0_359, %c0_360] : memref<8x8x2x32xf32, #tpu.memory_space<vmem>>, vector<1x1x2x32xf32>
    %452 = vector.shape_cast %451 : vector<1x1x2x32xf32> to vector<2x32xf32>
    %c7_361 = arith.constant 7 : index
    %c0_362 = arith.constant 0 : index
    %c0_363 = arith.constant 0 : index
    %453 = vector.load %arg2[%c7_361, %c0_362, %c0_363] : memref<8x32x32xf32, #tpu.memory_space<vmem>>, vector<1x32x32xf32>
    %454 = vector.shape_cast %453 : vector<1x32x32xf32> to vector<32x32xf32>
    %cst_364 = arith.constant dense<0.000000e+00> : vector<2x32xf32>
    %455 = tpu.matmul %381, %454, %cst_364 {dimension_numbers = #tpu.dot_dimension_numbers<[1], [0], [0], [1], [0, 0, 1, 1], [], []>} : vector<2x32xf32>, vector<32x32xf32>, vector<2x32xf32> -> vector<2x32xf32>
    %456 = arith.addf %452, %455 : vector<2x32xf32>
    %457 = arith.negf %438 : vector<2x32xf32>
    %458 = math.exp %457 : vector<2x32xf32>
    %cst_365 = arith.constant 1.000000e+00 : f32
    %459 = vector.broadcast %cst_365 : f32 to vector<2x32xf32>
    %460 = arith.addf %459, %458 : vector<2x32xf32>
    %461 = arith.divf %459, %460 : vector<2x32xf32>
    %462 = arith.negf %444 : vector<2x32xf32>
    %463 = math.exp %462 : vector<2x32xf32>
    %cst_366 = arith.constant 1.000000e+00 : f32
    %464 = vector.broadcast %cst_366 : f32 to vector<2x32xf32>
    %465 = arith.addf %464, %463 : vector<2x32xf32>
    %466 = arith.divf %464, %465 : vector<2x32xf32>
    %467 = math.tanh %450 : vector<2x32xf32>
    %468 = arith.negf %456 : vector<2x32xf32>
    %469 = math.exp %468 : vector<2x32xf32>
    %cst_367 = arith.constant 1.000000e+00 : f32
    %470 = vector.broadcast %cst_367 : f32 to vector<2x32xf32>
    %471 = arith.addf %470, %469 : vector<2x32xf32>
    %472 = arith.divf %470, %471 : vector<2x32xf32>
    %473 = arith.mulf %466, %379 : vector<2x32xf32>
    %474 = arith.mulf %461, %467 : vector<2x32xf32>
    %475 = arith.addf %473, %474 : vector<2x32xf32>
    %476 = math.tanh %475 : vector<2x32xf32>
    %477 = arith.mulf %472, %476 : vector<2x32xf32>
    %c3_368 = arith.constant 3 : index
    %c0_369 = arith.constant 0 : index
    %c32_370 = arith.constant 32 : index
    %478 = vector.load %arg3[%c3_368, %c0_369, %c32_370] : memref<8x2x64xf32, #tpu.memory_space<vmem>>, vector<1x2x32xf32>
    %479 = vector.shape_cast %478 : vector<1x2x32xf32> to vector<2x32xf32>
    %480 = vector.shape_cast %477 : vector<2x32xf32> to vector<1x2x32xf32>
    tpu.vector_store %arg3[%c3_368, %c0_369, %c32_370], %480 {strides = array<i32>} : memref<8x2x64xf32, #tpu.memory_space<vmem>>, vector<1x2x32xf32>,
    %c0_371 = arith.constant 0 : index
    %c5_372 = arith.constant 5 : index
    %c0_373 = arith.constant 0 : index
    %c0_374 = arith.constant 0 : index
    %481 = vector.load %arg1[%c0_371, %c5_372, %c0_373, %c0_374] : memref<8x8x2x32xf32, #tpu.memory_space<vmem>>, vector<1x1x2x32xf32>
    %482 = vector.shape_cast %481 : vector<1x1x2x32xf32> to vector<2x32xf32>
    %c0_375 = arith.constant 0 : index
    %c0_376 = arith.constant 0 : index
    %c0_377 = arith.constant 0 : index
    %483 = vector.load %arg2[%c0_375, %c0_376, %c0_377] : memref<8x32x32xf32, #tpu.memory_space<vmem>>, vector<1x32x32xf32>
    %484 = vector.shape_cast %483 : vector<1x32x32xf32> to vector<32x32xf32>
    %cst_378 = arith.constant dense<0.000000e+00> : vector<2x32xf32>
    %485 = tpu.matmul %429, %484, %cst_378 {dimension_numbers = #tpu.dot_dimension_numbers<[1], [0], [0], [1], [0, 0, 1, 1], [], []>} : vector<2x32xf32>, vector<32x32xf32>, vector<2x32xf32> -> vector<2x32xf32>
    %486 = arith.addf %482, %485 : vector<2x32xf32>
    %c1_379 = arith.constant 1 : index
    %c5_380 = arith.constant 5 : index
    %c0_381 = arith.constant 0 : index
    %c0_382 = arith.constant 0 : index
    %487 = vector.load %arg1[%c1_379, %c5_380, %c0_381, %c0_382] : memref<8x8x2x32xf32, #tpu.memory_space<vmem>>, vector<1x1x2x32xf32>
    %488 = vector.shape_cast %487 : vector<1x1x2x32xf32> to vector<2x32xf32>
    %c1_383 = arith.constant 1 : index
    %c0_384 = arith.constant 0 : index
    %c0_385 = arith.constant 0 : index
    %489 = vector.load %arg2[%c1_383, %c0_384, %c0_385] : memref<8x32x32xf32, #tpu.memory_space<vmem>>, vector<1x32x32xf32>
    %490 = vector.shape_cast %489 : vector<1x32x32xf32> to vector<32x32xf32>
    %cst_386 = arith.constant dense<0.000000e+00> : vector<2x32xf32>
    %491 = tpu.matmul %429, %490, %cst_386 {dimension_numbers = #tpu.dot_dimension_numbers<[1], [0], [0], [1], [0, 0, 1, 1], [], []>} : vector<2x32xf32>, vector<32x32xf32>, vector<2x32xf32> -> vector<2x32xf32>
    %492 = arith.addf %488, %491 : vector<2x32xf32>
    %c2_387 = arith.constant 2 : index
    %c5_388 = arith.constant 5 : index
    %c0_389 = arith.constant 0 : index
    %c0_390 = arith.constant 0 : index
    %493 = vector.load %arg1[%c2_387, %c5_388, %c0_389, %c0_390] : memref<8x8x2x32xf32, #tpu.memory_space<vmem>>, vector<1x1x2x32xf32>
    %494 = vector.shape_cast %493 : vector<1x1x2x32xf32> to vector<2x32xf32>
    %c2_391 = arith.constant 2 : index
    %c0_392 = arith.constant 0 : index
    %c0_393 = arith.constant 0 : index
    %495 = vector.load %arg2[%c2_391, %c0_392, %c0_393] : memref<8x32x32xf32, #tpu.memory_space<vmem>>, vector<1x32x32xf32>
    %496 = vector.shape_cast %495 : vector<1x32x32xf32> to vector<32x32xf32>
    %cst_394 = arith.constant dense<0.000000e+00> : vector<2x32xf32>
    %497 = tpu.matmul %429, %496, %cst_394 {dimension_numbers = #tpu.dot_dimension_numbers<[1], [0], [0], [1], [0, 0, 1, 1], [], []>} : vector<2x32xf32>, vector<32x32xf32>, vector<2x32xf32> -> vector<2x32xf32>
    %498 = arith.addf %494, %497 : vector<2x32xf32>
    %c3_395 = arith.constant 3 : index
    %c5_396 = arith.constant 5 : index
    %c0_397 = arith.constant 0 : index
    %c0_398 = arith.constant 0 : index
    %499 = vector.load %arg1[%c3_395, %c5_396, %c0_397, %c0_398] : memref<8x8x2x32xf32, #tpu.memory_space<vmem>>, vector<1x1x2x32xf32>
    %500 = vector.shape_cast %499 : vector<1x1x2x32xf32> to vector<2x32xf32>
    %c3_399 = arith.constant 3 : index
    %c0_400 = arith.constant 0 : index
    %c0_401 = arith.constant 0 : index
    %501 = vector.load %arg2[%c3_399, %c0_400, %c0_401] : memref<8x32x32xf32, #tpu.memory_space<vmem>>, vector<1x32x32xf32>
    %502 = vector.shape_cast %501 : vector<1x32x32xf32> to vector<32x32xf32>
    %cst_402 = arith.constant dense<0.000000e+00> : vector<2x32xf32>
    %503 = tpu.matmul %429, %502, %cst_402 {dimension_numbers = #tpu.dot_dimension_numbers<[1], [0], [0], [1], [0, 0, 1, 1], [], []>} : vector<2x32xf32>, vector<32x32xf32>, vector<2x32xf32> -> vector<2x32xf32>
    %504 = arith.addf %500, %503 : vector<2x32xf32>
    %505 = arith.negf %486 : vector<2x32xf32>
    %506 = math.exp %505 : vector<2x32xf32>
    %cst_403 = arith.constant 1.000000e+00 : f32
    %507 = vector.broadcast %cst_403 : f32 to vector<2x32xf32>
    %508 = arith.addf %507, %506 : vector<2x32xf32>
    %509 = arith.divf %507, %508 : vector<2x32xf32>
    %510 = arith.negf %492 : vector<2x32xf32>
    %511 = math.exp %510 : vector<2x32xf32>
    %cst_404 = arith.constant 1.000000e+00 : f32
    %512 = vector.broadcast %cst_404 : f32 to vector<2x32xf32>
    %513 = arith.addf %512, %511 : vector<2x32xf32>
    %514 = arith.divf %512, %513 : vector<2x32xf32>
    %515 = math.tanh %498 : vector<2x32xf32>
    %516 = arith.negf %504 : vector<2x32xf32>
    %517 = math.exp %516 : vector<2x32xf32>
    %cst_405 = arith.constant 1.000000e+00 : f32
    %518 = vector.broadcast %cst_405 : f32 to vector<2x32xf32>
    %519 = arith.addf %518, %517 : vector<2x32xf32>
    %520 = arith.divf %518, %519 : vector<2x32xf32>
    %521 = arith.mulf %514, %427 : vector<2x32xf32>
    %522 = arith.mulf %509, %515 : vector<2x32xf32>
    %523 = arith.addf %521, %522 : vector<2x32xf32>
    %524 = math.tanh %523 : vector<2x32xf32>
    %525 = arith.mulf %520, %524 : vector<2x32xf32>
    %c5_406 = arith.constant 5 : index
    %c0_407 = arith.constant 0 : index
    %c0_408 = arith.constant 0 : index
    %526 = vector.load %arg3[%c5_406, %c0_407, %c0_408] : memref<8x2x64xf32, #tpu.memory_space<vmem>>, vector<1x2x32xf32>
    %527 = vector.shape_cast %526 : vector<1x2x32xf32> to vector<2x32xf32>
    %528 = vector.shape_cast %525 : vector<2x32xf32> to vector<1x2x32xf32>
    tpu.vector_store %arg3[%c5_406, %c0_407, %c0_408], %528 {strides = array<i32>} : memref<8x2x64xf32, #tpu.memory_space<vmem>>, vector<1x2x32xf32>,
    %c4_409 = arith.constant 4 : index
    %c2_410 = arith.constant 2 : index
    %c0_411 = arith.constant 0 : index
    %c0_412 = arith.constant 0 : index
    %529 = vector.load %arg1[%c4_409, %c2_410, %c0_411, %c0_412] : memref<8x8x2x32xf32, #tpu.memory_space<vmem>>, vector<1x1x2x32xf32>
    %530 = vector.shape_cast %529 : vector<1x1x2x32xf32> to vector<2x32xf32>
    %c4_413 = arith.constant 4 : index
    %c0_414 = arith.constant 0 : index
    %c0_415 = arith.constant 0 : index
    %531 = vector.load %arg2[%c4_413, %c0_414, %c0_415] : memref<8x32x32xf32, #tpu.memory_space<vmem>>, vector<1x32x32xf32>
    %532 = vector.shape_cast %531 : vector<1x32x32xf32> to vector<32x32xf32>
    %cst_416 = arith.constant dense<0.000000e+00> : vector<2x32xf32>
    %533 = tpu.matmul %477, %532, %cst_416 {dimension_numbers = #tpu.dot_dimension_numbers<[1], [0], [0], [1], [0, 0, 1, 1], [], []>} : vector<2x32xf32>, vector<32x32xf32>, vector<2x32xf32> -> vector<2x32xf32>
    %534 = arith.addf %530, %533 : vector<2x32xf32>
    %c5_417 = arith.constant 5 : index
    %c2_418 = arith.constant 2 : index
    %c0_419 = arith.constant 0 : index
    %c0_420 = arith.constant 0 : index
    %535 = vector.load %arg1[%c5_417, %c2_418, %c0_419, %c0_420] : memref<8x8x2x32xf32, #tpu.memory_space<vmem>>, vector<1x1x2x32xf32>
    %536 = vector.shape_cast %535 : vector<1x1x2x32xf32> to vector<2x32xf32>
    %c5_421 = arith.constant 5 : index
    %c0_422 = arith.constant 0 : index
    %c0_423 = arith.constant 0 : index
    %537 = vector.load %arg2[%c5_421, %c0_422, %c0_423] : memref<8x32x32xf32, #tpu.memory_space<vmem>>, vector<1x32x32xf32>
    %538 = vector.shape_cast %537 : vector<1x32x32xf32> to vector<32x32xf32>
    %cst_424 = arith.constant dense<0.000000e+00> : vector<2x32xf32>
    %539 = tpu.matmul %477, %538, %cst_424 {dimension_numbers = #tpu.dot_dimension_numbers<[1], [0], [0], [1], [0, 0, 1, 1], [], []>} : vector<2x32xf32>, vector<32x32xf32>, vector<2x32xf32> -> vector<2x32xf32>
    %540 = arith.addf %536, %539 : vector<2x32xf32>
    %c6_425 = arith.constant 6 : index
    %c2_426 = arith.constant 2 : index
    %c0_427 = arith.constant 0 : index
    %c0_428 = arith.constant 0 : index
    %541 = vector.load %arg1[%c6_425, %c2_426, %c0_427, %c0_428] : memref<8x8x2x32xf32, #tpu.memory_space<vmem>>, vector<1x1x2x32xf32>
    %542 = vector.shape_cast %541 : vector<1x1x2x32xf32> to vector<2x32xf32>
    %c6_429 = arith.constant 6 : index
    %c0_430 = arith.constant 0 : index
    %c0_431 = arith.constant 0 : index
    %543 = vector.load %arg2[%c6_429, %c0_430, %c0_431] : memref<8x32x32xf32, #tpu.memory_space<vmem>>, vector<1x32x32xf32>
    %544 = vector.shape_cast %543 : vector<1x32x32xf32> to vector<32x32xf32>
    %cst_432 = arith.constant dense<0.000000e+00> : vector<2x32xf32>
    %545 = tpu.matmul %477, %544, %cst_432 {dimension_numbers = #tpu.dot_dimension_numbers<[1], [0], [0], [1], [0, 0, 1, 1], [], []>} : vector<2x32xf32>, vector<32x32xf32>, vector<2x32xf32> -> vector<2x32xf32>
    %546 = arith.addf %542, %545 : vector<2x32xf32>
    %c7_433 = arith.constant 7 : index
    %c2_434 = arith.constant 2 : index
    %c0_435 = arith.constant 0 : index
    %c0_436 = arith.constant 0 : index
    %547 = vector.load %arg1[%c7_433, %c2_434, %c0_435, %c0_436] : memref<8x8x2x32xf32, #tpu.memory_space<vmem>>, vector<1x1x2x32xf32>
    %548 = vector.shape_cast %547 : vector<1x1x2x32xf32> to vector<2x32xf32>
    %c7_437 = arith.constant 7 : index
    %c0_438 = arith.constant 0 : index
    %c0_439 = arith.constant 0 : index
    %549 = vector.load %arg2[%c7_437, %c0_438, %c0_439] : memref<8x32x32xf32, #tpu.memory_space<vmem>>, vector<1x32x32xf32>
    %550 = vector.shape_cast %549 : vector<1x32x32xf32> to vector<32x32xf32>
    %cst_440 = arith.constant dense<0.000000e+00> : vector<2x32xf32>
    %551 = tpu.matmul %477, %550, %cst_440 {dimension_numbers = #tpu.dot_dimension_numbers<[1], [0], [0], [1], [0, 0, 1, 1], [], []>} : vector<2x32xf32>, vector<32x32xf32>, vector<2x32xf32> -> vector<2x32xf32>
    %552 = arith.addf %548, %551 : vector<2x32xf32>
    %553 = arith.negf %534 : vector<2x32xf32>
    %554 = math.exp %553 : vector<2x32xf32>
    %cst_441 = arith.constant 1.000000e+00 : f32
    %555 = vector.broadcast %cst_441 : f32 to vector<2x32xf32>
    %556 = arith.addf %555, %554 : vector<2x32xf32>
    %557 = arith.divf %555, %556 : vector<2x32xf32>
    %558 = arith.negf %540 : vector<2x32xf32>
    %559 = math.exp %558 : vector<2x32xf32>
    %cst_442 = arith.constant 1.000000e+00 : f32
    %560 = vector.broadcast %cst_442 : f32 to vector<2x32xf32>
    %561 = arith.addf %560, %559 : vector<2x32xf32>
    %562 = arith.divf %560, %561 : vector<2x32xf32>
    %563 = math.tanh %546 : vector<2x32xf32>
    %564 = arith.negf %552 : vector<2x32xf32>
    %565 = math.exp %564 : vector<2x32xf32>
    %cst_443 = arith.constant 1.000000e+00 : f32
    %566 = vector.broadcast %cst_443 : f32 to vector<2x32xf32>
    %567 = arith.addf %566, %565 : vector<2x32xf32>
    %568 = arith.divf %566, %567 : vector<2x32xf32>
    %569 = arith.mulf %562, %475 : vector<2x32xf32>
    %570 = arith.mulf %557, %563 : vector<2x32xf32>
    %571 = arith.addf %569, %570 : vector<2x32xf32>
    %572 = math.tanh %571 : vector<2x32xf32>
    %573 = arith.mulf %568, %572 : vector<2x32xf32>
    %c2_444 = arith.constant 2 : index
    %c0_445 = arith.constant 0 : index
    %c32_446 = arith.constant 32 : index
    %574 = vector.load %arg3[%c2_444, %c0_445, %c32_446] : memref<8x2x64xf32, #tpu.memory_space<vmem>>, vector<1x2x32xf32>
    %575 = vector.shape_cast %574 : vector<1x2x32xf32> to vector<2x32xf32>
    %576 = vector.shape_cast %573 : vector<2x32xf32> to vector<1x2x32xf32>
    tpu.vector_store %arg3[%c2_444, %c0_445, %c32_446], %576 {strides = array<i32>} : memref<8x2x64xf32, #tpu.memory_space<vmem>>, vector<1x2x32xf32>,
    %c0_447 = arith.constant 0 : index
    %c6_448 = arith.constant 6 : index
    %c0_449 = arith.constant 0 : index
    %c0_450 = arith.constant 0 : index
    %577 = vector.load %arg1[%c0_447, %c6_448, %c0_449, %c0_450] : memref<8x8x2x32xf32, #tpu.memory_space<vmem>>, vector<1x1x2x32xf32>
    %578 = vector.shape_cast %577 : vector<1x1x2x32xf32> to vector<2x32xf32>
    %c0_451 = arith.constant 0 : index
    %c0_452 = arith.constant 0 : index
    %c0_453 = arith.constant 0 : index
    %579 = vector.load %arg2[%c0_451, %c0_452, %c0_453] : memref<8x32x32xf32, #tpu.memory_space<vmem>>, vector<1x32x32xf32>
    %580 = vector.shape_cast %579 : vector<1x32x32xf32> to vector<32x32xf32>
    %cst_454 = arith.constant dense<0.000000e+00> : vector<2x32xf32>
    %581 = tpu.matmul %525, %580, %cst_454 {dimension_numbers = #tpu.dot_dimension_numbers<[1], [0], [0], [1], [0, 0, 1, 1], [], []>} : vector<2x32xf32>, vector<32x32xf32>, vector<2x32xf32> -> vector<2x32xf32>
    %582 = arith.addf %578, %581 : vector<2x32xf32>
    %c1_455 = arith.constant 1 : index
    %c6_456 = arith.constant 6 : index
    %c0_457 = arith.constant 0 : index
    %c0_458 = arith.constant 0 : index
    %583 = vector.load %arg1[%c1_455, %c6_456, %c0_457, %c0_458] : memref<8x8x2x32xf32, #tpu.memory_space<vmem>>, vector<1x1x2x32xf32>
    %584 = vector.shape_cast %583 : vector<1x1x2x32xf32> to vector<2x32xf32>
    %c1_459 = arith.constant 1 : index
    %c0_460 = arith.constant 0 : index
    %c0_461 = arith.constant 0 : index
    %585 = vector.load %arg2[%c1_459, %c0_460, %c0_461] : memref<8x32x32xf32, #tpu.memory_space<vmem>>, vector<1x32x32xf32>
    %586 = vector.shape_cast %585 : vector<1x32x32xf32> to vector<32x32xf32>
    %cst_462 = arith.constant dense<0.000000e+00> : vector<2x32xf32>
    %587 = tpu.matmul %525, %586, %cst_462 {dimension_numbers = #tpu.dot_dimension_numbers<[1], [0], [0], [1], [0, 0, 1, 1], [], []>} : vector<2x32xf32>, vector<32x32xf32>, vector<2x32xf32> -> vector<2x32xf32>
    %588 = arith.addf %584, %587 : vector<2x32xf32>
    %c2_463 = arith.constant 2 : index
    %c6_464 = arith.constant 6 : index
    %c0_465 = arith.constant 0 : index
    %c0_466 = arith.constant 0 : index
    %589 = vector.load %arg1[%c2_463, %c6_464, %c0_465, %c0_466] : memref<8x8x2x32xf32, #tpu.memory_space<vmem>>, vector<1x1x2x32xf32>
    %590 = vector.shape_cast %589 : vector<1x1x2x32xf32> to vector<2x32xf32>
    %c2_467 = arith.constant 2 : index
    %c0_468 = arith.constant 0 : index
    %c0_469 = arith.constant 0 : index
    %591 = vector.load %arg2[%c2_467, %c0_468, %c0_469] : memref<8x32x32xf32, #tpu.memory_space<vmem>>, vector<1x32x32xf32>
    %592 = vector.shape_cast %591 : vector<1x32x32xf32> to vector<32x32xf32>
    %cst_470 = arith.constant dense<0.000000e+00> : vector<2x32xf32>
    %593 = tpu.matmul %525, %592, %cst_470 {dimension_numbers = #tpu.dot_dimension_numbers<[1], [0], [0], [1], [0, 0, 1, 1], [], []>} : vector<2x32xf32>, vector<32x32xf32>, vector<2x32xf32> -> vector<2x32xf32>
    %594 = arith.addf %590, %593 : vector<2x32xf32>
    %c3_471 = arith.constant 3 : index
    %c6_472 = arith.constant 6 : index
    %c0_473 = arith.constant 0 : index
    %c0_474 = arith.constant 0 : index
    %595 = vector.load %arg1[%c3_471, %c6_472, %c0_473, %c0_474] : memref<8x8x2x32xf32, #tpu.memory_space<vmem>>, vector<1x1x2x32xf32>
    %596 = vector.shape_cast %595 : vector<1x1x2x32xf32> to vector<2x32xf32>
    %c3_475 = arith.constant 3 : index
    %c0_476 = arith.constant 0 : index
    %c0_477 = arith.constant 0 : index
    %597 = vector.load %arg2[%c3_475, %c0_476, %c0_477] : memref<8x32x32xf32, #tpu.memory_space<vmem>>, vector<1x32x32xf32>
    %598 = vector.shape_cast %597 : vector<1x32x32xf32> to vector<32x32xf32>
    %cst_478 = arith.constant dense<0.000000e+00> : vector<2x32xf32>
    %599 = tpu.matmul %525, %598, %cst_478 {dimension_numbers = #tpu.dot_dimension_numbers<[1], [0], [0], [1], [0, 0, 1, 1], [], []>} : vector<2x32xf32>, vector<32x32xf32>, vector<2x32xf32> -> vector<2x32xf32>
    %600 = arith.addf %596, %599 : vector<2x32xf32>
    %601 = arith.negf %582 : vector<2x32xf32>
    %602 = math.exp %601 : vector<2x32xf32>
    %cst_479 = arith.constant 1.000000e+00 : f32
    %603 = vector.broadcast %cst_479 : f32 to vector<2x32xf32>
    %604 = arith.addf %603, %602 : vector<2x32xf32>
    %605 = arith.divf %603, %604 : vector<2x32xf32>
    %606 = arith.negf %588 : vector<2x32xf32>
    %607 = math.exp %606 : vector<2x32xf32>
    %cst_480 = arith.constant 1.000000e+00 : f32
    %608 = vector.broadcast %cst_480 : f32 to vector<2x32xf32>
    %609 = arith.addf %608, %607 : vector<2x32xf32>
    %610 = arith.divf %608, %609 : vector<2x32xf32>
    %611 = math.tanh %594 : vector<2x32xf32>
    %612 = arith.negf %600 : vector<2x32xf32>
    %613 = math.exp %612 : vector<2x32xf32>
    %cst_481 = arith.constant 1.000000e+00 : f32
    %614 = vector.broadcast %cst_481 : f32 to vector<2x32xf32>
    %615 = arith.addf %614, %613 : vector<2x32xf32>
    %616 = arith.divf %614, %615 : vector<2x32xf32>
    %617 = arith.mulf %610, %523 : vector<2x32xf32>
    %618 = arith.mulf %605, %611 : vector<2x32xf32>
    %619 = arith.addf %617, %618 : vector<2x32xf32>
    %620 = math.tanh %619 : vector<2x32xf32>
    %621 = arith.mulf %616, %620 : vector<2x32xf32>
    %c6_482 = arith.constant 6 : index
    %c0_483 = arith.constant 0 : index
    %c0_484 = arith.constant 0 : index
    %622 = vector.load %arg3[%c6_482, %c0_483, %c0_484] : memref<8x2x64xf32, #tpu.memory_space<vmem>>, vector<1x2x32xf32>
    %623 = vector.shape_cast %622 : vector<1x2x32xf32> to vector<2x32xf32>
    %624 = vector.shape_cast %621 : vector<2x32xf32> to vector<1x2x32xf32>
    tpu.vector_store %arg3[%c6_482, %c0_483, %c0_484], %624 {strides = array<i32>} : memref<8x2x64xf32, #tpu.memory_space<vmem>>, vector<1x2x32xf32>,
    %c4_485 = arith.constant 4 : index
    %c1_486 = arith.constant 1 : index
    %c0_487 = arith.constant 0 : index
    %c0_488 = arith.constant 0 : index
    %625 = vector.load %arg1[%c4_485, %c1_486, %c0_487, %c0_488] : memref<8x8x2x32xf32, #tpu.memory_space<vmem>>, vector<1x1x2x32xf32>
    %626 = vector.shape_cast %625 : vector<1x1x2x32xf32> to vector<2x32xf32>
    %c4_489 = arith.constant 4 : index
    %c0_490 = arith.constant 0 : index
    %c0_491 = arith.constant 0 : index
    %627 = vector.load %arg2[%c4_489, %c0_490, %c0_491] : memref<8x32x32xf32, #tpu.memory_space<vmem>>, vector<1x32x32xf32>
    %628 = vector.shape_cast %627 : vector<1x32x32xf32> to vector<32x32xf32>
    %cst_492 = arith.constant dense<0.000000e+00> : vector<2x32xf32>
    %629 = tpu.matmul %573, %628, %cst_492 {dimension_numbers = #tpu.dot_dimension_numbers<[1], [0], [0], [1], [0, 0, 1, 1], [], []>} : vector<2x32xf32>, vector<32x32xf32>, vector<2x32xf32> -> vector<2x32xf32>
    %630 = arith.addf %626, %629 : vector<2x32xf32>
    %c5_493 = arith.constant 5 : index
    %c1_494 = arith.constant 1 : index
    %c0_495 = arith.constant 0 : index
    %c0_496 = arith.constant 0 : index
    %631 = vector.load %arg1[%c5_493, %c1_494, %c0_495, %c0_496] : memref<8x8x2x32xf32, #tpu.memory_space<vmem>>, vector<1x1x2x32xf32>
    %632 = vector.shape_cast %631 : vector<1x1x2x32xf32> to vector<2x32xf32>
    %c5_497 = arith.constant 5 : index
    %c0_498 = arith.constant 0 : index
    %c0_499 = arith.constant 0 : index
    %633 = vector.load %arg2[%c5_497, %c0_498, %c0_499] : memref<8x32x32xf32, #tpu.memory_space<vmem>>, vector<1x32x32xf32>
    %634 = vector.shape_cast %633 : vector<1x32x32xf32> to vector<32x32xf32>
    %cst_500 = arith.constant dense<0.000000e+00> : vector<2x32xf32>
    %635 = tpu.matmul %573, %634, %cst_500 {dimension_numbers = #tpu.dot_dimension_numbers<[1], [0], [0], [1], [0, 0, 1, 1], [], []>} : vector<2x32xf32>, vector<32x32xf32>, vector<2x32xf32> -> vector<2x32xf32>
    %636 = arith.addf %632, %635 : vector<2x32xf32>
    %c6_501 = arith.constant 6 : index
    %c1_502 = arith.constant 1 : index
    %c0_503 = arith.constant 0 : index
    %c0_504 = arith.constant 0 : index
    %637 = vector.load %arg1[%c6_501, %c1_502, %c0_503, %c0_504] : memref<8x8x2x32xf32, #tpu.memory_space<vmem>>, vector<1x1x2x32xf32>
    %638 = vector.shape_cast %637 : vector<1x1x2x32xf32> to vector<2x32xf32>
    %c6_505 = arith.constant 6 : index
    %c0_506 = arith.constant 0 : index
    %c0_507 = arith.constant 0 : index
    %639 = vector.load %arg2[%c6_505, %c0_506, %c0_507] : memref<8x32x32xf32, #tpu.memory_space<vmem>>, vector<1x32x32xf32>
    %640 = vector.shape_cast %639 : vector<1x32x32xf32> to vector<32x32xf32>
    %cst_508 = arith.constant dense<0.000000e+00> : vector<2x32xf32>
    %641 = tpu.matmul %573, %640, %cst_508 {dimension_numbers = #tpu.dot_dimension_numbers<[1], [0], [0], [1], [0, 0, 1, 1], [], []>} : vector<2x32xf32>, vector<32x32xf32>, vector<2x32xf32> -> vector<2x32xf32>
    %642 = arith.addf %638, %641 : vector<2x32xf32>
    %c7_509 = arith.constant 7 : index
    %c1_510 = arith.constant 1 : index
    %c0_511 = arith.constant 0 : index
    %c0_512 = arith.constant 0 : index
    %643 = vector.load %arg1[%c7_509, %c1_510, %c0_511, %c0_512] : memref<8x8x2x32xf32, #tpu.memory_space<vmem>>, vector<1x1x2x32xf32>
    %644 = vector.shape_cast %643 : vector<1x1x2x32xf32> to vector<2x32xf32>
    %c7_513 = arith.constant 7 : index
    %c0_514 = arith.constant 0 : index
    %c0_515 = arith.constant 0 : index
    %645 = vector.load %arg2[%c7_513, %c0_514, %c0_515] : memref<8x32x32xf32, #tpu.memory_space<vmem>>, vector<1x32x32xf32>
    %646 = vector.shape_cast %645 : vector<1x32x32xf32> to vector<32x32xf32>
    %cst_516 = arith.constant dense<0.000000e+00> : vector<2x32xf32>
    %647 = tpu.matmul %573, %646, %cst_516 {dimension_numbers = #tpu.dot_dimension_numbers<[1], [0], [0], [1], [0, 0, 1, 1], [], []>} : vector<2x32xf32>, vector<32x32xf32>, vector<2x32xf32> -> vector<2x32xf32>
    %648 = arith.addf %644, %647 : vector<2x32xf32>
    %649 = arith.negf %630 : vector<2x32xf32>
    %650 = math.exp %649 : vector<2x32xf32>
    %cst_517 = arith.constant 1.000000e+00 : f32
    %651 = vector.broadcast %cst_517 : f32 to vector<2x32xf32>
    %652 = arith.addf %651, %650 : vector<2x32xf32>
    %653 = arith.divf %651, %652 : vector<2x32xf32>
    %654 = arith.negf %636 : vector<2x32xf32>
    %655 = math.exp %654 : vector<2x32xf32>
    %cst_518 = arith.constant 1.000000e+00 : f32
    %656 = vector.broadcast %cst_518 : f32 to vector<2x32xf32>
    %657 = arith.addf %656, %655 : vector<2x32xf32>
    %658 = arith.divf %656, %657 : vector<2x32xf32>
    %659 = math.tanh %642 : vector<2x32xf32>
    %660 = arith.negf %648 : vector<2x32xf32>
    %661 = math.exp %660 : vector<2x32xf32>
    %cst_519 = arith.constant 1.000000e+00 : f32
    %662 = vector.broadcast %cst_519 : f32 to vector<2x32xf32>
    %663 = arith.addf %662, %661 : vector<2x32xf32>
    %664 = arith.divf %662, %663 : vector<2x32xf32>
    %665 = arith.mulf %658, %571 : vector<2x32xf32>
    %666 = arith.mulf %653, %659 : vector<2x32xf32>
    %667 = arith.addf %665, %666 : vector<2x32xf32>
    %668 = math.tanh %667 : vector<2x32xf32>
    %669 = arith.mulf %664, %668 : vector<2x32xf32>
    %c1_520 = arith.constant 1 : index
    %c0_521 = arith.constant 0 : index
    %c32_522 = arith.constant 32 : index
    %670 = vector.load %arg3[%c1_520, %c0_521, %c32_522] : memref<8x2x64xf32, #tpu.memory_space<vmem>>, vector<1x2x32xf32>
    %671 = vector.shape_cast %670 : vector<1x2x32xf32> to vector<2x32xf32>
    %672 = vector.shape_cast %669 : vector<2x32xf32> to vector<1x2x32xf32>
    tpu.vector_store %arg3[%c1_520, %c0_521, %c32_522], %672 {strides = array<i32>} : memref<8x2x64xf32, #tpu.memory_space<vmem>>, vector<1x2x32xf32>,
    %c0_523 = arith.constant 0 : index
    %c7_524 = arith.constant 7 : index
    %c0_525 = arith.constant 0 : index
    %c0_526 = arith.constant 0 : index
    %673 = vector.load %arg1[%c0_523, %c7_524, %c0_525, %c0_526] : memref<8x8x2x32xf32, #tpu.memory_space<vmem>>, vector<1x1x2x32xf32>
    %674 = vector.shape_cast %673 : vector<1x1x2x32xf32> to vector<2x32xf32>
    %c0_527 = arith.constant 0 : index
    %c0_528 = arith.constant 0 : index
    %c0_529 = arith.constant 0 : index
    %675 = vector.load %arg2[%c0_527, %c0_528, %c0_529] : memref<8x32x32xf32, #tpu.memory_space<vmem>>, vector<1x32x32xf32>
    %676 = vector.shape_cast %675 : vector<1x32x32xf32> to vector<32x32xf32>
    %cst_530 = arith.constant dense<0.000000e+00> : vector<2x32xf32>
    %677 = tpu.matmul %621, %676, %cst_530 {dimension_numbers = #tpu.dot_dimension_numbers<[1], [0], [0], [1], [0, 0, 1, 1], [], []>} : vector<2x32xf32>, vector<32x32xf32>, vector<2x32xf32> -> vector<2x32xf32>
    %678 = arith.addf %674, %677 : vector<2x32xf32>
    %c1_531 = arith.constant 1 : index
    %c7_532 = arith.constant 7 : index
    %c0_533 = arith.constant 0 : index
    %c0_534 = arith.constant 0 : index
    %679 = vector.load %arg1[%c1_531, %c7_532, %c0_533, %c0_534] : memref<8x8x2x32xf32, #tpu.memory_space<vmem>>, vector<1x1x2x32xf32>
    %680 = vector.shape_cast %679 : vector<1x1x2x32xf32> to vector<2x32xf32>
    %c1_535 = arith.constant 1 : index
    %c0_536 = arith.constant 0 : index
    %c0_537 = arith.constant 0 : index
    %681 = vector.load %arg2[%c1_535, %c0_536, %c0_537] : memref<8x32x32xf32, #tpu.memory_space<vmem>>, vector<1x32x32xf32>
    %682 = vector.shape_cast %681 : vector<1x32x32xf32> to vector<32x32xf32>
    %cst_538 = arith.constant dense<0.000000e+00> : vector<2x32xf32>
    %683 = tpu.matmul %621, %682, %cst_538 {dimension_numbers = #tpu.dot_dimension_numbers<[1], [0], [0], [1], [0, 0, 1, 1], [], []>} : vector<2x32xf32>, vector<32x32xf32>, vector<2x32xf32> -> vector<2x32xf32>
    %684 = arith.addf %680, %683 : vector<2x32xf32>
    %c2_539 = arith.constant 2 : index
    %c7_540 = arith.constant 7 : index
    %c0_541 = arith.constant 0 : index
    %c0_542 = arith.constant 0 : index
    %685 = vector.load %arg1[%c2_539, %c7_540, %c0_541, %c0_542] : memref<8x8x2x32xf32, #tpu.memory_space<vmem>>, vector<1x1x2x32xf32>
    %686 = vector.shape_cast %685 : vector<1x1x2x32xf32> to vector<2x32xf32>
    %c2_543 = arith.constant 2 : index
    %c0_544 = arith.constant 0 : index
    %c0_545 = arith.constant 0 : index
    %687 = vector.load %arg2[%c2_543, %c0_544, %c0_545] : memref<8x32x32xf32, #tpu.memory_space<vmem>>, vector<1x32x32xf32>
    %688 = vector.shape_cast %687 : vector<1x32x32xf32> to vector<32x32xf32>
    %cst_546 = arith.constant dense<0.000000e+00> : vector<2x32xf32>
    %689 = tpu.matmul %621, %688, %cst_546 {dimension_numbers = #tpu.dot_dimension_numbers<[1], [0], [0], [1], [0, 0, 1, 1], [], []>} : vector<2x32xf32>, vector<32x32xf32>, vector<2x32xf32> -> vector<2x32xf32>
    %690 = arith.addf %686, %689 : vector<2x32xf32>
    %c3_547 = arith.constant 3 : index
    %c7_548 = arith.constant 7 : index
    %c0_549 = arith.constant 0 : index
    %c0_550 = arith.constant 0 : index
    %691 = vector.load %arg1[%c3_547, %c7_548, %c0_549, %c0_550] : memref<8x8x2x32xf32, #tpu.memory_space<vmem>>, vector<1x1x2x32xf32>
    %692 = vector.shape_cast %691 : vector<1x1x2x32xf32> to vector<2x32xf32>
    %c3_551 = arith.constant 3 : index
    %c0_552 = arith.constant 0 : index
    %c0_553 = arith.constant 0 : index
    %693 = vector.load %arg2[%c3_551, %c0_552, %c0_553] : memref<8x32x32xf32, #tpu.memory_space<vmem>>, vector<1x32x32xf32>
    %694 = vector.shape_cast %693 : vector<1x32x32xf32> to vector<32x32xf32>
    %cst_554 = arith.constant dense<0.000000e+00> : vector<2x32xf32>
    %695 = tpu.matmul %621, %694, %cst_554 {dimension_numbers = #tpu.dot_dimension_numbers<[1], [0], [0], [1], [0, 0, 1, 1], [], []>} : vector<2x32xf32>, vector<32x32xf32>, vector<2x32xf32> -> vector<2x32xf32>
    %696 = arith.addf %692, %695 : vector<2x32xf32>
    %697 = arith.negf %678 : vector<2x32xf32>
    %698 = math.exp %697 : vector<2x32xf32>
    %cst_555 = arith.constant 1.000000e+00 : f32
    %699 = vector.broadcast %cst_555 : f32 to vector<2x32xf32>
    %700 = arith.addf %699, %698 : vector<2x32xf32>
    %701 = arith.divf %699, %700 : vector<2x32xf32>
    %702 = arith.negf %684 : vector<2x32xf32>
    %703 = math.exp %702 : vector<2x32xf32>
    %cst_556 = arith.constant 1.000000e+00 : f32
    %704 = vector.broadcast %cst_556 : f32 to vector<2x32xf32>
    %705 = arith.addf %704, %703 : vector<2x32xf32>
    %706 = arith.divf %704, %705 : vector<2x32xf32>
    %707 = math.tanh %690 : vector<2x32xf32>
    %708 = arith.negf %696 : vector<2x32xf32>
    %709 = math.exp %708 : vector<2x32xf32>
    %cst_557 = arith.constant 1.000000e+00 : f32
    %710 = vector.broadcast %cst_557 : f32 to vector<2x32xf32>
    %711 = arith.addf %710, %709 : vector<2x32xf32>
    %712 = arith.divf %710, %711 : vector<2x32xf32>
    %713 = arith.mulf %706, %619 : vector<2x32xf32>
    %714 = arith.mulf %701, %707 : vector<2x32xf32>
    %715 = arith.addf %713, %714 : vector<2x32xf32>
    %716 = math.tanh %715 : vector<2x32xf32>
    %717 = arith.mulf %712, %716 : vector<2x32xf32>
    %c7_558 = arith.constant 7 : index
    %c0_559 = arith.constant 0 : index
    %c0_560 = arith.constant 0 : index
    %718 = vector.load %arg3[%c7_558, %c0_559, %c0_560] : memref<8x2x64xf32, #tpu.memory_space<vmem>>, vector<1x2x32xf32>
    %719 = vector.shape_cast %718 : vector<1x2x32xf32> to vector<2x32xf32>
    %720 = vector.shape_cast %717 : vector<2x32xf32> to vector<1x2x32xf32>
    tpu.vector_store %arg3[%c7_558, %c0_559, %c0_560], %720 {strides = array<i32>} : memref<8x2x64xf32, #tpu.memory_space<vmem>>, vector<1x2x32xf32>,
    %c4_561 = arith.constant 4 : index
    %c0_562 = arith.constant 0 : index
    %c0_563 = arith.constant 0 : index
    %c0_564 = arith.constant 0 : index
    %721 = vector.load %arg1[%c4_561, %c0_562, %c0_563, %c0_564] : memref<8x8x2x32xf32, #tpu.memory_space<vmem>>, vector<1x1x2x32xf32>
    %722 = vector.shape_cast %721 : vector<1x1x2x32xf32> to vector<2x32xf32>
    %c4_565 = arith.constant 4 : index
    %c0_566 = arith.constant 0 : index
    %c0_567 = arith.constant 0 : index
    %723 = vector.load %arg2[%c4_565, %c0_566, %c0_567] : memref<8x32x32xf32, #tpu.memory_space<vmem>>, vector<1x32x32xf32>
    %724 = vector.shape_cast %723 : vector<1x32x32xf32> to vector<32x32xf32>
    %cst_568 = arith.constant dense<0.000000e+00> : vector<2x32xf32>
    %725 = tpu.matmul %669, %724, %cst_568 {dimension_numbers = #tpu.dot_dimension_numbers<[1], [0], [0], [1], [0, 0, 1, 1], [], []>} : vector<2x32xf32>, vector<32x32xf32>, vector<2x32xf32> -> vector<2x32xf32>
    %726 = arith.addf %722, %725 : vector<2x32xf32>
    %c5_569 = arith.constant 5 : index
    %c0_570 = arith.constant 0 : index
    %c0_571 = arith.constant 0 : index
    %c0_572 = arith.constant 0 : index
    %727 = vector.load %arg1[%c5_569, %c0_570, %c0_571, %c0_572] : memref<8x8x2x32xf32, #tpu.memory_space<vmem>>, vector<1x1x2x32xf32>
    %728 = vector.shape_cast %727 : vector<1x1x2x32xf32> to vector<2x32xf32>
    %c5_573 = arith.constant 5 : index
    %c0_574 = arith.constant 0 : index
    %c0_575 = arith.constant 0 : index
    %729 = vector.load %arg2[%c5_573, %c0_574, %c0_575] : memref<8x32x32xf32, #tpu.memory_space<vmem>>, vector<1x32x32xf32>
    %730 = vector.shape_cast %729 : vector<1x32x32xf32> to vector<32x32xf32>
    %cst_576 = arith.constant dense<0.000000e+00> : vector<2x32xf32>
    %731 = tpu.matmul %669, %730, %cst_576 {dimension_numbers = #tpu.dot_dimension_numbers<[1], [0], [0], [1], [0, 0, 1, 1], [], []>} : vector<2x32xf32>, vector<32x32xf32>, vector<2x32xf32> -> vector<2x32xf32>
    %732 = arith.addf %728, %731 : vector<2x32xf32>
    %c6_577 = arith.constant 6 : index
    %c0_578 = arith.constant 0 : index
    %c0_579 = arith.constant 0 : index
    %c0_580 = arith.constant 0 : index
    %733 = vector.load %arg1[%c6_577, %c0_578, %c0_579, %c0_580] : memref<8x8x2x32xf32, #tpu.memory_space<vmem>>, vector<1x1x2x32xf32>
    %734 = vector.shape_cast %733 : vector<1x1x2x32xf32> to vector<2x32xf32>
    %c6_581 = arith.constant 6 : index
    %c0_582 = arith.constant 0 : index
    %c0_583 = arith.constant 0 : index
    %735 = vector.load %arg2[%c6_581, %c0_582, %c0_583] : memref<8x32x32xf32, #tpu.memory_space<vmem>>, vector<1x32x32xf32>
    %736 = vector.shape_cast %735 : vector<1x32x32xf32> to vector<32x32xf32>
    %cst_584 = arith.constant dense<0.000000e+00> : vector<2x32xf32>
    %737 = tpu.matmul %669, %736, %cst_584 {dimension_numbers = #tpu.dot_dimension_numbers<[1], [0], [0], [1], [0, 0, 1, 1], [], []>} : vector<2x32xf32>, vector<32x32xf32>, vector<2x32xf32> -> vector<2x32xf32>
    %738 = arith.addf %734, %737 : vector<2x32xf32>
    %c7_585 = arith.constant 7 : index
    %c0_586 = arith.constant 0 : index
    %c0_587 = arith.constant 0 : index
    %c0_588 = arith.constant 0 : index
    %739 = vector.load %arg1[%c7_585, %c0_586, %c0_587, %c0_588] : memref<8x8x2x32xf32, #tpu.memory_space<vmem>>, vector<1x1x2x32xf32>
    %740 = vector.shape_cast %739 : vector<1x1x2x32xf32> to vector<2x32xf32>
    %c7_589 = arith.constant 7 : index
    %c0_590 = arith.constant 0 : index
    %c0_591 = arith.constant 0 : index
    %741 = vector.load %arg2[%c7_589, %c0_590, %c0_591] : memref<8x32x32xf32, #tpu.memory_space<vmem>>, vector<1x32x32xf32>
    %742 = vector.shape_cast %741 : vector<1x32x32xf32> to vector<32x32xf32>
    %cst_592 = arith.constant dense<0.000000e+00> : vector<2x32xf32>
    %743 = tpu.matmul %669, %742, %cst_592 {dimension_numbers = #tpu.dot_dimension_numbers<[1], [0], [0], [1], [0, 0, 1, 1], [], []>} : vector<2x32xf32>, vector<32x32xf32>, vector<2x32xf32> -> vector<2x32xf32>
    %744 = arith.addf %740, %743 : vector<2x32xf32>
    %745 = arith.negf %726 : vector<2x32xf32>
    %746 = math.exp %745 : vector<2x32xf32>
    %cst_593 = arith.constant 1.000000e+00 : f32
    %747 = vector.broadcast %cst_593 : f32 to vector<2x32xf32>
    %748 = arith.addf %747, %746 : vector<2x32xf32>
    %749 = arith.divf %747, %748 : vector<2x32xf32>
    %750 = arith.negf %732 : vector<2x32xf32>
    %751 = math.exp %750 : vector<2x32xf32>
    %cst_594 = arith.constant 1.000000e+00 : f32
    %752 = vector.broadcast %cst_594 : f32 to vector<2x32xf32>
    %753 = arith.addf %752, %751 : vector<2x32xf32>
    %754 = arith.divf %752, %753 : vector<2x32xf32>
    %755 = math.tanh %738 : vector<2x32xf32>
    %756 = arith.negf %744 : vector<2x32xf32>
    %757 = math.exp %756 : vector<2x32xf32>
    %cst_595 = arith.constant 1.000000e+00 : f32
    %758 = vector.broadcast %cst_595 : f32 to vector<2x32xf32>
    %759 = arith.addf %758, %757 : vector<2x32xf32>
    %760 = arith.divf %758, %759 : vector<2x32xf32>
    %761 = arith.mulf %754, %667 : vector<2x32xf32>
    %762 = arith.mulf %749, %755 : vector<2x32xf32>
    %763 = arith.addf %761, %762 : vector<2x32xf32>
    %764 = math.tanh %763 : vector<2x32xf32>
    %765 = arith.mulf %760, %764 : vector<2x32xf32>
    %c0_596 = arith.constant 0 : index
    %c0_597 = arith.constant 0 : index
    %c32_598 = arith.constant 32 : index
    %766 = vector.load %arg3[%c0_596, %c0_597, %c32_598] : memref<8x2x64xf32, #tpu.memory_space<vmem>>, vector<1x2x32xf32>
    %767 = vector.shape_cast %766 : vector<1x2x32xf32> to vector<2x32xf32>
    %768 = vector.shape_cast %765 : vector<2x32xf32> to vector<1x2x32xf32>
    tpu.vector_store %arg3[%c0_596, %c0_597, %c32_598], %768 {strides = array<i32>} : memref<8x2x64xf32, #tpu.memory_space<vmem>>, vector<1x2x32xf32>,
    return
  }
  func.func @transform_0(%arg0: i32) -> (i32, i32, i32, i32) {
    %c0_i32 = arith.constant 0 : i32
    %c0_i32_0 = arith.constant 0 : i32
    %c0_i32_1 = arith.constant 0 : i32
    %c0_i32_2 = arith.constant 0 : i32
    %c0_i32_3 = arith.constant 0 : i32
    return %c0_i32, %c0_i32_0, %c0_i32_1, %c0_i32_2 : i32, i32, i32, i32
  }
  func.func @transform_1(%arg0: i32) -> (i32, i32, i32) {
    %c0_i32 = arith.constant 0 : i32
    %c0_i32_0 = arith.constant 0 : i32
    %c0_i32_1 = arith.constant 0 : i32
    %c0_i32_2 = arith.constant 0 : i32
    return %c0_i32, %c0_i32_0, %c0_i32_1 : i32, i32, i32
  }
  func.func @transform_2(%arg0: i32) -> (i32, i32, i32) {
    %c0_i32 = arith.constant 0 : i32
    %c0_i32_0 = arith.constant 0 : i32
    %c0_i32_1 = arith.constant 0 : i32
    %c0_i32_2 = arith.constant 0 : i32
    return %c0_i32, %c0_i32_0, %c0_i32_1 : i32, i32, i32
  }
}

</mosaic_0001>

<bundles_post_ra>
// kernel: tpu_custom_call.1
= control target key start
LH: loop header
LB: loop body
LE: loop exit
PB: predicated region body
PF: predicated region fallthrough
CT: control target
= control target key end

     0   :  { %7 = vsyncpa [#allocation3], 0  ;;  %s4296_s0 = inlined_call_operand.hbm [shape: f32[8,8,2,32], index: 0, kind: input, shape index: {}]   ;;  %s4297_s1 = inlined_call_operand.hbm [shape: f32[8,32,32], index: 1, kind: input, shape index: {}]   ;;  %s4298_s2 = inlined_call_operand.hbm [shape: f32[8,2,64], index: 2, kind: output, shape index: {}]  }
   0x1   :  { %8 = vsyncpa [#allocation6], 0 }
   0x2   :  { %9 = vsyncpa [#allocation4], 0  ;;  %s14_s11 = sshll.u32 %s4296_s0, 4  ;;  %s3348_s12 = smov [#allocation2]   ;;  %s15_s11 = int_to_ptr.hbm [resolvable:$true] %s14_s11 }
   0x3   :  { %s16_s13 = sshll.u32 %s3348_s12, 4  ;;  %s27_s16 = sshll.u32 %s4297_s1, 4  ;;  %s17_s13 = int_to_ptr.vmem [resolvable:$true] %s16_s13  ;;  %s28_s16 = int_to_ptr.hbm [resolvable:$true] %s27_s16 }
   0x4   :  { %s3349_s17 = smov 32   ;;  %s3350_s18 = smov 2  }
   0x5   :  { %22 = dma.hbm_to_vmem [thread:$0]  %s15_s11, 2048, %s17_s13, [#allocation3], %s3349_s17, %s3349_s17, %s3350_s18  }
   0x6   :  { %s3351_s19 = smov [#allocation5]   ;;  %s3352_s21 = smov 128  }
   0x7   :  { %s29_s20 = sshll.u32 %s3351_s19, 4  ;;  %s3353_s0 = smov 8   ;;  %s30_s20 = int_to_ptr.vmem [resolvable:$true] %s29_s20 }
   0x8   :  { %35 = dma.hbm_to_vmem [thread:$0]  %s28_s16, 4096, %s30_s20, [#allocation6], %s3352_s21, %s3352_s21, %s3353_s0  }
   0x9   :  { %3342 = dma.done.wait [#allocation3], 2048  }
   0xa   :  { %3343 = vsyncadd [#allocation3], 4294965248 }
   0xb   :  { %3344 = dma.done.wait [#allocation6], 4096  }
   0xc   :  { %3345 = vsyncadd [#allocation6], 4294963200  ;;  %v3380_v0 = vld [vmem:[#allocation5 + $0x18] sm:$0xff]  ;;  %v3388_v3 = vld [vmem:[#allocation5 + $0x10] sm:$0xff]  ;;  %v3354_v14 = vmov 0.0   ;;  %vm49_vm9 = vcmask 261120  }
   0xd   :  { %v3382_v1 = vld [vmem:[#allocation5 + $0x38] sm:$0xff]  ;;  %65 = vmatpush.msra.mxu0 %v3380_v0  ;;  %v3390_v4 = vld [vmem:[#allocation5 + $0x30] sm:$0xff]  ;;  %v3395_v6 = vld [vmem:[#allocation5 + $0x8] sm:$0xff]  ;;  %s3355_s1 = smov [#allocation7]   ;;  %s2888_s25 = sshll.u32 %s4298_s2, 4  ;;  %s2889_s25 = int_to_ptr.hbm [resolvable:$true] %s2888_s25 }
   0xe   :  { %v3384_v2 = vld [vmem:[#allocation5 + $0x78] sm:$0xff]  ;;  %93 = vmatpush.msra.mxu1 %v3382_v1  ;;  %v3392_v5 = vld [vmem:[#allocation5 + $0x70] sm:$0xff]  ;;  %v3397_v7 = vld [vmem:[#allocation5 + $0x28] sm:$0xff]  ;;  %s2886_s22 = sshll.u32 %s3355_s1, 4  ;;  %s2887_s22 = int_to_ptr.vmem [resolvable:$true] %s2886_s22 }
   0xf   :  { %149 = vmatpush.msra.mxu3 %v3384_v2  ;;  %66 = vmatpush.msra.mxu0 %v3388_v3  ;;  %v3401_v8 = vld [vmem:[#allocation5 + $0x68] sm:$0xff]  ;;  %v3404_v9 = vld [vmem:[#allocation5] sm:$0xff]  ;;  %v3415_v12 = vld [vmem:[#allocation5 + $0x98] sm:$0xff] }
  0x10   :  { %94 = vmatpush.msra.mxu1 %v3390_v4  ;;  %v3406_v10 = vld [vmem:[#allocation5 + $0x20] sm:$0xff]  ;;  %v3417_v13 = vld [vmem:[#allocation5 + $0xb8] sm:$0xff]  ;;  %v3424_v17 = vld [vmem:[#allocation5 + $0x90] sm:$0xff] }
  0x11   :  { %150 = vmatpush.msra.mxu3 %v3392_v5  ;;  %67 = vmatpush.msra.mxu0 %v3395_v6  ;;  %v3410_v11 = vld [vmem:[#allocation5 + $0x60] sm:$0xff]  ;;  %v3420_v15 = vld [vmem:[#allocation5 + $0xf8] sm:$0xff]  ;;  %v3426_v18 = vld [vmem:[#allocation5 + $0xb0] sm:$0xff] }
  0x12   :  { %95 = vmatpush.msra.mxu1 %v3397_v7  ;;  %v3422_v16 = vld [vmem:[#allocation5 + $0x58] sm:$0xff]  ;;  %v3430_v19 = vld [vmem:[#allocation5 + $0xf0] sm:$0xff]  ;;  %v3435_v21 = vld [vmem:[#allocation5 + $0x88] sm:$0xff] }
  0x13   :  { %151 = vmatpush.msra.mxu3 %v3401_v8  ;;  %68 = vmatpush.msra.mxu0 %v3404_v9  ;;  %v3432_v20 = vld [vmem:[#allocation5 + $0x50] sm:$0xff]  ;;  %v3437_v22 = vld [vmem:[#allocation5 + $0xa8] sm:$0xff]  ;;  %v3447_v25 = vld [vmem:[#allocation5 + $0x80] sm:$0xff] }
  0x14   :  { %96 = vmatpush.msra.mxu1 %v3406_v10  ;;  %69 = vmatmul.f32.vlgmr.msra.gmra.mxu0 %v3354_v14  ;;  %v3442_v23 = vld [vmem:[#allocation5 + $0xe8] sm:$0xff]  ;;  %v3449_v26 = vld [vmem:[#allocation5 + $0xa0] sm:$0xff]  ;;  %v3463_v29 = vld [vmem:[#allocation5 + $0xd8] sm:$0xff] }
  0x15   :  { %152 = vmatpush.msra.mxu3 %v3410_v11  ;;  %97 = vmatmul.f32.vlgmr.msra.gmra.mxu1 %v3354_v14  ;;  %v3444_v24 = vld [vmem:[#allocation5 + $0x48] sm:$0xff]  ;;  %v3454_v27 = vld [vmem:[#allocation5 + $0xe0] sm:$0xff]  ;;  %v3467_v30 = vld [vmem:[#allocation5 + $0xd0] sm:$0xff] }
  0x16   :  { %153 = vmatmul.f32.vlgmr.msra.gmra.mxu3 %v3354_v14  ;;  %242 = vmatpush.msrb.mxu0 %v3415_v12  ;;  %v3460_v28 = vld [vmem:[#allocation5 + $0x40] sm:$0xff]  ;;  %v3472_v31 = vld [vmem:[#allocation5 + $0xc8] sm:$0xff]  ;;  %v75_v34 = vld [vmem:[#allocation2 + $0x10] sm:$0x3] }
  0x17   :  { %270 = vmatpush.msrb.mxu1 %v3417_v13  ;;  %326 = vmatpush.msrb.mxu3 %v3420_v15  ;;  %v3478_v32 = vld [vmem:[#allocation5 + $0xc0] sm:$0xff]  ;;  %v131_v41 = vld [vmem:[#allocation2 + $0x30] sm:$0x3]  ;;  %v224_v43 = vld [vmem:[#allocation2 + $0x4e] sm:$0x3] }
  0x18   :  { %121 = vmatpush.msra.mxu2 %v3422_v16  ;;  %243 = vmatpush.msrb.mxu0 %v3424_v17  ;;  %v44_v33 = vld [vmem:[#allocation2] sm:$0x3]  ;;  %v252_v45 = vld [vmem:[#allocation2 + $0x5e] sm:$0x3] }
  0x19   :  { %271 = vmatpush.msrb.mxu1 %v3426_v18  ;;  %327 = vmatpush.msrb.mxu3 %v3430_v19  ;;  %v308_v57 = vld [vmem:[#allocation2 + $0x7e] sm:$0x3]  ;;  %v103_v59 = vld [vmem:[#allocation2 + $0x20] sm:$0x3] }
  0x1a   :  { %122 = vmatpush.msra.mxu2 %v3432_v20  ;;  %244 = vmatpush.msrb.mxu0 %v3435_v21 }
  0x1b   :  { %272 = vmatpush.msrb.mxu1 %v3437_v22  ;;  %328 = vmatpush.msrb.mxu3 %v3442_v23 }
  0x1c   :  { %123 = vmatpush.msra.mxu2 %v3444_v24  ;;  %245 = vmatpush.msrb.mxu0 %v3447_v25 }
  0x1d   :  { %273 = vmatpush.msrb.mxu1 %v3449_v26  ;;  %329 = vmatpush.msrb.mxu3 %v3454_v27 }
  0x1e   :  { %246 = vmatmul.f32.vlgmr.msrb.gmra.mxu0 %v3354_v14  ;;  %274 = vmatmul.f32.vlgmr.msrb.gmra.mxu1 %v3354_v14 }
  0x1f   :  { %330 = vmatmul.f32.vlgmr.msrb.gmra.mxu3 %v3354_v14  ;;  %124 = vmatpush.msra.mxu2 %v3460_v28 }
  0x20   :  { %426 = vmatpush.msra.mxu0 %v3380_v0  ;;  %125 = vmatmul.f32.vlgmr.msra.gmra.mxu2 %v3354_v14 }
  0x21   :  { %453 = vmatpush.msra.mxu1 %v3382_v1  ;;  %298 = vmatpush.msrb.mxu2 %v3463_v29 }
  0x22   :  { %507 = vmatpush.msra.mxu3 %v3384_v2  ;;  %427 = vmatpush.msra.mxu0 %v3388_v3 }
  0x23   :  { %454 = vmatpush.msra.mxu1 %v3390_v4  ;;  %299 = vmatpush.msrb.mxu2 %v3467_v30 }
  0x24   :  { %508 = vmatpush.msra.mxu3 %v3392_v5  ;;  %428 = vmatpush.msra.mxu0 %v3395_v6 }
  0x25   :  { %455 = vmatpush.msra.mxu1 %v3397_v7  ;;  %300 = vmatpush.msrb.mxu2 %v3472_v31 }
  0x26   :  { %509 = vmatpush.msra.mxu3 %v3401_v8  ;;  %429 = vmatpush.msra.mxu0 %v3404_v9 }
  0x27   :  { %456 = vmatpush.msra.mxu1 %v3406_v10  ;;  %301 = vmatpush.msrb.mxu2 %v3478_v32 }
  0x28   :  { %510 = vmatpush.msra.mxu3 %v3410_v11  ;;  %302 = vmatmul.f32.vlgmr.msrb.gmra.mxu2 %v3354_v14 }
  0x29   :  { %601 = vmatpush.msrb.mxu0 %v3415_v12  ;;  %480 = vmatpush.msra.mxu2 %v3422_v16 }
  0x2a   :  { %628 = vmatpush.msrb.mxu1 %v3417_v13  ;;  %682 = vmatpush.msrb.mxu3 %v3420_v15 }
  0x2b   :  { %602 = vmatpush.msrb.mxu0 %v3424_v17  ;;  %481 = vmatpush.msra.mxu2 %v3432_v20 }
  0x2c   :  { %629 = vmatpush.msrb.mxu1 %v3426_v18  ;;  %683 = vmatpush.msrb.mxu3 %v3430_v19 }
  0x2d   :  { %603 = vmatpush.msrb.mxu0 %v3435_v21  ;;  %482 = vmatpush.msra.mxu2 %v3444_v24 }
  0x2e   :  { %630 = vmatpush.msrb.mxu1 %v3437_v22  ;;  %684 = vmatpush.msrb.mxu3 %v3442_v23 }
  0x2f   :  { %604 = vmatpush.msrb.mxu0 %v3447_v25  ;;  %483 = vmatpush.msra.mxu2 %v3460_v28 }
  0x30   :  { %631 = vmatpush.msrb.mxu1 %v3449_v26  ;;  %685 = vmatpush.msrb.mxu3 %v3454_v27 }
  0x31   :  { %655 = vmatpush.msrb.mxu2 %v3463_v29 }
  0x33   :  { %656 = vmatpush.msrb.mxu2 %v3467_v30 }
  0x35   :  { %657 = vmatpush.msrb.mxu2 %v3472_v31 }
  0x37   :  { %658 = vmatpush.msrb.mxu2 %v3478_v32 }
  0x91   :  { %v70_v35 = vpop.f32.mrf.mxu0 }
  0x92   :  { %v73_v36 = vadd.f32 %v70_v35, %v44_v33  ;;  %v98_v37 = vpop.f32.mrf.mxu1 }
  0x93   :  { %v101_v38 = vadd.f32 %v98_v37, %v75_v34 }
  0x94   :  { %v2902_v39 = vmul.f32 -1.442695, %v73_v36 }
  0x95   :  { %v2903_v40 = vmul.f32 -1.442695, %v101_v38 }
  0x96   :  { %3014 = vpow2.f32 %v2902_v39 }
  0x97   :  { %3016 = vpow2.f32 %v2903_v40 }
  0x99   :  { %v154_v42 = vpop.f32.mrf.mxu3 }
  0x9a   :  { %v157_v44 = vadd.f32 %v154_v42, %v131_v41 }
  0x9b   :  { %v247_v46 = vpop.f32.mrf.mxu0  ;;  %v275_v49 = vpop.f32.mrf.mxu1 }
  0x9c   :  { %v2904_v47 = vmul.f32 -1.442695, %v157_v44  ;;  %v250_v48 = vadd.f32 %v247_v46, %v224_v43  ;;  %v3015_v50 = vpop.eup %3014  ;;  %v278_v51 = vadd.f32 %v275_v49, %v252_v45 }
  0x9d   :  { %v3017_v52 = vpop.eup %3016  ;;  %v161_v53 = vadd.f32 1.0, %v3015_v50  ;;  %v280_v50 = vld [vmem:[#allocation2 + $0x6e] sm:$0x3] }
  0x9e   :  { %3018 = vpow2.f32 %v2904_v47  ;;  %v2905_v54 = vmul.f32 -1.442695, %v250_v48  ;;  %v180_v55 = vadd.f32 1.0, %v3017_v52  ;;  %v2906_v56 = vmul.f32 -1.442695, %v278_v51 }
  0x9f   :  { %3020 = vrcp.f32 %v161_v53  ;;  %v171_v44 = vand.u32 2147483647, %v161_v53  ;;  %v173_v45 = vand.u32 2147483648, %v161_v53  ;;  %vm167_vm3 = vweird.f32 %v161_v53 }
  0xa0   :  { %3022 = vrcp.f32 %v180_v55  ;;  %v192_v46 = vand.u32 2147483648, %v180_v55  ;;  %v190_v49 = vand.u32 2147483647, %v180_v55  ;;  %vm186_vm2 = vweird.f32 %v180_v55 }
  0xa1   :  { %3024 = vpow2.f32 %v2905_v54  ;;  %vm172_vm5 = vcmp.eq.f32.partialorder %v171_v44, 8.507059e+37 }
  0xa2   :  { %v331_v58 = vpop.f32.mrf.mxu3  ;;  %3026 = vpow2.f32 %v2906_v56  ;;  %vm191_vm7 = vcmp.eq.f32.partialorder %v190_v49, 8.507059e+37 }
  0xa3   :  { %v334_v60 = vadd.f32 %v331_v58, %v308_v57  ;;  %v126_v62 = vpop.f32.mrf.mxu2  ;;  %v174_v58 = vor.u32 1.1754944e-38, %v173_v45 }
  0xa4   :  { %v3019_v61 = vpop.eup %3018  ;;  %v129_v33 = vadd.f32 %v126_v62, %v103_v59 }
  0xa5   :  { %v3508_v63 = vadd.f32 1.0, %v3019_v61  ;;  %v2907_v14 = vmul.f32 -1.442695, %v334_v60  ;;  %v3021_v34 = vpop.eup %3020  ;;  %v193_v61 = vor.u32 1.1754944e-38, %v192_v46 }
  0xa6   :  { %v3023_v35 = vpop.eup %3022  ;;  %v163_v36 = vmul.f32 %v3021_v34, %v161_v53  ;;  %vm168_vm0 = vweird.f32 %v3021_v34 }
  0xa7   :  { %3028 = vrcp.f32 %v3508_v63  ;;  %v3025_v37 = vpop.eup %3024  ;;  %v182_v38 = vmul.f32 %v3023_v35, %v180_v55  ;;  %vm187_vm1 = vweird.f32 %v3023_v35  ;;  %vm169_vm4 = vmor %vm167_vm3, %vm168_vm0  ;;  %vm206_vm8 = vweird.f32 %v3508_v63 }
  0xa8   :  { %3030 = vpow2.f32 %v2907_v14  ;;  %v3027_v39 = vpop.eup %3026  ;;  %v164_v40 = vsub.f32 1.0, %v163_v36  ;;  %v3511_v41 = vadd.f32 1.0, %v3025_v37  ;;  %vm188_vm6 = vmor %vm186_vm2, %vm187_vm1 }
  0xa9   :  { %3032 = vtanh.f32 %v129_v33  ;;  %v183_v42 = vsub.f32 1.0, %v182_v38  ;;  %v3513_v43 = vadd.f32 1.0, %v3027_v39 }
  0xaa   :  { %3034 = vrcp.f32 %v3511_v41  ;;  %v165_v47 = vmul.f32 %v3021_v34, %v164_v40  ;;  %v348_v49 = vand.u32 2147483647, %v3511_v41  ;;  %vm344_vm15 = vweird.f32 %v3511_v41 }
  0xab   :  { %v184_v48 = vmul.f32 %v3023_v35, %v183_v42  ;;  %3036 = vrcp.f32 %v3513_v43  ;;  %v303_v51 = vpop.f32.mrf.mxu2  ;;  %vm363_vm14 = vweird.f32 %v3513_v43 }
  0xac   :  { %v166_v54 = vadd.f32 %v3021_v34, %v165_v47  ;;  %v306_v33 = vadd.f32 %v303_v51, %v280_v50  ;;  %v369_v47 = vand.u32 2147483648, %v3513_v43  ;;  %v350_v51 = vand.u32 2147483648, %v3511_v41 }
  0xad   :  { %v3517_v52 = vpop.eup %3028  ;;  %v185_v59 = vadd.f32 %v3023_v35, %v184_v48  ;;  %vm349_vm1 = vcmp.eq.f32.partialorder %v348_v49, 8.507059e+37 }
  0xae   :  { %v3031_v56 = vpop.eup %3030  ;;  %v202_v57 = vmul.f32 %v3517_v52, %v3508_v63  ;;  %v170_v14 = vsel %vm169_vm4, %v3021_v34, %v166_v54  ;;  %v212_v34 = vand.u32 2147483648, %v3508_v63  ;;  %vm207_vm10 = vweird.f32 %v3517_v52 }
  0xaf   :  { %v3033_v60 = vpop.eup %3032  ;;  %v3521_v62 = vadd.f32 1.0, %v3031_v56  ;;  %v175_v55 = vsel %vm172_vm5, %v174_v58, %v170_v14  ;;  %v189_v37 = vsel %vm188_vm6, %v3023_v35, %v185_v59  ;;  %vm3544_vm13 = vmor %vm206_vm8, %vm207_vm10  ;;  %vm221_vm5 = vcmask 254976  }
  0xb0   :  { %v203_v36 = vsub.f32 1.0, %v202_v57  ;;  %v3035_v53 = vpop.eup %3034  ;;  %v194_v38 = vsel %vm191_vm7, %v193_v61, %v189_v37  ;;  %v217_v45 = vmul.f32 %v3033_v60, %v175_v55  ;;  %v367_v57 = vand.u32 2147483647, %v3513_v43 }
  0xb1   :  { %3038 = vrcp.f32 %v3521_v62  ;;  %v3037_v39 = vpop.eup %3036  ;;  %v340_v42 = vmul.f32 %v3035_v53, %v3511_v41  ;;  %v216_v44 = vmul.f32 0.0, %v194_v38  ;;  %vm345_vm11 = vweird.f32 %v3035_v53 }
  0xb2   :  { %v204_v40 = vmul.f32 %v3517_v52, %v203_v36  ;;  %v359_v46 = vmul.f32 %v3037_v39, %v3513_v43  ;;  %3040 = vtanh.f32 %v306_v33  ;;  %v213_v59 = vor.u32 1.1754944e-38, %v212_v34  ;;  %vm346_vm0 = vmor %vm344_vm15, %vm345_vm11 }
  0xb3   :  { %v341_v35 = vsub.f32 1.0, %v340_v42  ;;  %v3531_v48 = vadd.f32 %v217_v45, %v216_v44  ;;  %vm364_vm12 = vweird.f32 %v3037_v39  ;;  %v210_v61 = vand.u32 2147483647, %v3508_v63 }
  0xb4   :  { %v360_v50 = vsub.f32 1.0, %v359_v46  ;;  %v205_v54 = vadd.f32 %v3517_v52, %v204_v40  ;;  %v351_v37 = vor.u32 1.1754944e-38, %v350_v51  ;;  %v370_v40 = vor.u32 1.1754944e-38, %v369_v47  ;;  %vm365_vm2 = vmor %vm363_vm14, %vm364_vm12 }
  0xb5   :  { %3042 = vtanh.f32 %v3531_v48  ;;  %v342_v56 = vmul.f32 %v3035_v53, %v341_v35  ;;  %vm368_vm3 = vcmp.eq.f32.partialorder %v367_v57, 8.507059e+37  ;;  %vm211_vm4 = vcmp.eq.f32.partialorder %v210_v61, 8.507059e+37 }
  0xb6   :  { %v361_v60 = vmul.f32 %v3037_v39, %v360_v50  ;;  %v209_v63 = vsel %vm3544_vm13, %v3517_v52, %v205_v54  ;;  %vm383_vm7 = vweird.f32 %v3521_v62  ;;  %vm403_vm11 = vcmask 517376  }
  0xb7   :  { %v3539_v58 = vpop.eup %3038  ;;  %v343_v36 = vadd.f32 %v3035_v53, %v342_v56  ;;  %v214_v49 = vsel %vm211_vm4, %v213_v59, %v209_v63 }
  0xb8   :  { %v379_v33 = vmul.f32 %v3539_v58, %v3521_v62  ;;  %v3041_v55 = vpop.eup %3040  ;;  %v362_v38 = vadd.f32 %v3037_v39, %v361_v60  ;;  %vm384_vm6 = vweird.f32 %v3539_v58 }
  0xb9   :  { %v347_v44 = vsel %vm346_vm0, %v3035_v53, %v343_v36  ;;  %v389_v53 = vand.u32 2147483648, %v3521_v62  ;;  %vm385_vm8 = vmor %vm383_vm7, %vm384_vm6 }
  0xba   :  { %v380_v42 = vsub.f32 1.0, %v379_v33  ;;  %v352_v43 = vsel %vm349_vm1, %v351_v37, %v347_v44  ;;  %v366_v45 = vsel %vm365_vm2, %v3037_v39, %v362_v38  ;;  %v387_v39 = vand.u32 2147483647, %v3521_v62 }
  0xbb   :  { %v3043_v41 = vpop.eup %3042  ;;  %v371_v46 = vsel %vm368_vm3, %v370_v40, %v366_v45  ;;  %v394_v35 = vmul.f32 %v3041_v55, %v352_v43 }
  0xbc   :  { %v381_v34 = vmul.f32 %v3539_v58, %v380_v42  ;;  %v393_v50 = vmul.f32 0.0, %v371_v46  ;;  %v220_v51 = vmul.f32 %v3043_v41, %v214_v49  ;;  %vm388_vm10 = vcmp.eq.f32.partialorder %v387_v39, 8.507059e+37 }
  0xbe   :  { %v3557_v56 = vadd.f32 %v394_v35, %v393_v50  ;;  %2908 = vmatmul.msk.f32.vlgmr.msra.gmra.mxu0 %vm49_vm9, %v220_v51  ;;  %2909 = vmatmul.msk.f32.vlgmr.msra.gmra.mxu1 %vm49_vm9, %v220_v51  ;;  %222 = vst.msk [vmem:[#allocation7] sm:$0x3] %vm221_vm5, %v220_v51  ;;  %v382_v52 = vadd.f32 %v3539_v58, %v381_v34 }
  0xbf   :  { %2910 = vmatmul.msk.f32.vlgmr.msra.gmra.mxu2 %vm49_vm9, %v220_v51  ;;  %2911 = vmatmul.msk.f32.vlgmr.msra.gmra.mxu3 %vm49_vm9, %v220_v51 }
  0xc0   :  { %3044 = vtanh.f32 %v3557_v56  ;;  %781 = vmatpush.msra.mxu0 %v3380_v0  ;;  %808 = vmatpush.msra.mxu1 %v3382_v1  ;;  %v386_v47 = vsel %vm385_vm8, %v3539_v58, %v382_v52  ;;  %v390_v0 = vor.u32 1.1754944e-38, %v389_v53 }
  0xc1   :  { %835 = vmatpush.msra.mxu2 %v3422_v16  ;;  %862 = vmatpush.msra.mxu3 %v3384_v2 }
  0xc2   :  { %782 = vmatpush.msra.mxu0 %v3388_v3  ;;  %809 = vmatpush.msra.mxu1 %v3390_v4  ;;  %v391_v2 = vsel %vm388_vm10, %v390_v0, %v386_v47  ;;  %v406_v4 = vld [vmem:[#allocation2 + $0x2] sm:$0x3] }
  0xc3   :  { %836 = vmatpush.msra.mxu2 %v3432_v20  ;;  %863 = vmatpush.msra.mxu3 %v3392_v5  ;;  %v436_v5 = vld [vmem:[#allocation2 + $0x12] sm:$0x3] }
  0xc4   :  { %783 = vmatpush.msra.mxu0 %v3395_v6  ;;  %810 = vmatpush.msra.mxu1 %v3397_v7 }
  0xc5   :  { %837 = vmatpush.msra.mxu2 %v3444_v24  ;;  %864 = vmatpush.msra.mxu3 %v3401_v8 }
  0xc6   :  { %v3045_v1 = vpop.eup %3044  ;;  %784 = vmatpush.msra.mxu0 %v3404_v9  ;;  %811 = vmatpush.msra.mxu1 %v3406_v10 }
  0xc7   :  { %v397_v3 = vmul.f32 %v3045_v1, %v391_v2  ;;  %838 = vmatpush.msra.mxu2 %v3460_v28  ;;  %865 = vmatpush.msra.mxu3 %v3410_v11  ;;  %v463_v28 = vld [vmem:[#allocation2 + $0x22] sm:$0x3] }
  0xc9   :  { %399 = vrot.lane.b32.xlu0 %v397_v3, %s3349_s17  ;;  %2915 = vmatmul.msk.f32.vlgmr.msrb.gmra.mxu0 %vm49_vm9, %v397_v3 }
  0xca   :  { %2916 = vmatmul.msk.f32.vlgmr.msrb.gmra.mxu1 %vm49_vm9, %v397_v3  ;;  %2917 = vmatmul.msk.f32.vlgmr.msrb.gmra.mxu2 %vm49_vm9, %v397_v3 }
  0xcb   :  { %2918 = vmatmul.msk.f32.vlgmr.msrb.gmra.mxu3 %vm49_vm9, %v397_v3  ;;  %956 = vmatpush.msrb.mxu0 %v3415_v12  ;;  %v638_v3 = vld [vmem:[#allocation2 + $0x6c] sm:$0x3] }
  0xcc   :  { %983 = vmatpush.msrb.mxu1 %v3417_v13  ;;  %1010 = vmatpush.msrb.mxu2 %v3463_v29  ;;  %v490_v13 = vld [vmem:[#allocation2 + $0x32] sm:$0x3] }
  0xcd   :  { %1037 = vmatpush.msrb.mxu3 %v3420_v15  ;;  %957 = vmatpush.msrb.mxu0 %v3424_v17  ;;  %v582_v17 = vld [vmem:[#allocation2 + $0x4c] sm:$0x3] }
  0xce   :  { %984 = vmatpush.msrb.mxu1 %v3426_v18  ;;  %1011 = vmatpush.msrb.mxu2 %v3467_v30 }
  0xcf   :  { %1038 = vmatpush.msrb.mxu3 %v3430_v19  ;;  %958 = vmatpush.msrb.mxu0 %v3435_v21  ;;  %v611_v19 = vld [vmem:[#allocation2 + $0x5c] sm:$0x3] }
  0xd0   :  { %985 = vmatpush.msrb.mxu1 %v3437_v22  ;;  %1012 = vmatpush.msrb.mxu2 %v3472_v31 }
  0xd1   :  { %1039 = vmatpush.msrb.mxu3 %v3442_v23  ;;  %959 = vmatpush.msrb.mxu0 %v3447_v25 }
  0xd2   :  { %986 = vmatpush.msrb.mxu1 %v3449_v26  ;;  %1013 = vmatpush.msrb.mxu2 %v3478_v32  ;;  %v665_v32 = vld [vmem:[#allocation2 + $0x7c] sm:$0x3] }
  0xd3   :  { %1040 = vmatpush.msrb.mxu3 %v3454_v27 }
 0x13b   :  { %v400_v6 = vpop.permute.xlu0 %399  ;;  %v431_v7 = vpop.f32.mrf.mxu0 }
 0x13c   :  { %404 = vst.msk [vmem:[#allocation7 + $0xe] sm:$0x3] %vm403_vm11, %v400_v6  ;;  %v434_v8 = vadd.f32 %v431_v7, %v406_v4  ;;  %v458_v9 = vpop.f32.mrf.mxu1 }
 0x13d   :  { %v461_v10 = vadd.f32 %v458_v9, %v436_v5 }
 0x13e   :  { %v2912_v11 = vmul.f32 -1.442695, %v434_v8 }
 0x13f   :  { %v2913_v12 = vmul.f32 -1.442695, %v461_v10 }
 0x140   :  { %3046 = vpow2.f32 %v2912_v11 }
 0x141   :  { %3048 = vpow2.f32 %v2913_v12 }
 0x142   :  { %v512_v15 = vpop.f32.mrf.mxu3  ;;  %v485_v29 = vpop.f32.mrf.mxu2 }
 0x143   :  { %v515_v16 = vadd.f32 %v512_v15, %v490_v13  ;;  %v488_v54 = vadd.f32 %v485_v29, %v463_v28 }
 0x145   :  { %v2914_v18 = vmul.f32 -1.442695, %v515_v16 }
 0x146   :  { %v3047_v20 = vpop.eup %3046  ;;  %v606_v21 = vpop.f32.mrf.mxu0 }
 0x147   :  { %v3049_v22 = vpop.eup %3048  ;;  %v519_v23 = vadd.f32 1.0, %v3047_v20  ;;  %3050 = vpow2.f32 %v2914_v18  ;;  %v609_v24 = vadd.f32 %v606_v21, %v582_v17  ;;  %v633_v25 = vpop.f32.mrf.mxu1 }
 0x148   :  { %v538_v26 = vadd.f32 1.0, %v3049_v22  ;;  %v636_v27 = vadd.f32 %v633_v25, %v611_v19 }
 0x149   :  { %3052 = vrcp.f32 %v519_v23  ;;  %v2919_v30 = vmul.f32 -1.442695, %v609_v24  ;;  %v529_v40 = vand.u32 2147483647, %v519_v23  ;;  %v531_v42 = vand.u32 2147483648, %v519_v23  ;;  %v3687_v24 = vld [vmem:[#allocation5 + $0x10] sm:$0xff] }
 0x14a   :  { %3054 = vrcp.f32 %v538_v26  ;;  %v2920_v31 = vmul.f32 -1.442695, %v636_v27  ;;  %v550_v63 = vand.u32 2147483648, %v538_v26  ;;  %v548_v34 = vand.u32 2147483647, %v538_v26 }
 0x14b   :  { %3056 = vpow2.f32 %v2919_v30  ;;  %vm544_vm14 = vweird.f32 %v538_v26  ;;  %vm525_vm15 = vweird.f32 %v519_v23  ;;  %v532_v50 = vor.u32 1.1754944e-38, %v531_v42 }
 0x14c   :  { %3058 = vpow2.f32 %v2920_v31  ;;  %v551_v39 = vor.u32 1.1754944e-38, %v550_v63  ;;  %vm530_vm2 = vcmp.eq.f32.partialorder %v529_v40, 8.507059e+37  ;;  %vm549_vm3 = vcmp.eq.f32.partialorder %v548_v34, 8.507059e+37 }
 0x14d   :  { %v3051_v62 = vpop.eup %3050  ;;  %v660_v4 = vpop.f32.mrf.mxu2 }
 0x14e   :  { %v3609_v57 = vadd.f32 1.0, %v3051_v62  ;;  %v687_v58 = vpop.f32.mrf.mxu3  ;;  %v663_v12 = vadd.f32 %v660_v4, %v638_v3  ;;  %v845_v3 = vld [vmem:[#allocation2 + $0x34] sm:$0x3] }
 0x14f   :  { %v3053_v59 = vpop.eup %3052  ;;  %v690_v60 = vadd.f32 %v687_v58, %v665_v32 }
 0x150   :  { %v3055_v61 = vpop.eup %3054  ;;  %v521_v14 = vmul.f32 %v3053_v59, %v519_v23  ;;  %3060 = vrcp.f32 %v3609_v57  ;;  %vm526_vm12 = vweird.f32 %v3053_v59  ;;  %vm564_vm4 = vweird.f32 %v3609_v57 }
 0x151   :  { %v540_v33 = vmul.f32 %v3055_v61, %v538_v26  ;;  %3062 = vtanh.f32 %v488_v54  ;;  %v2921_v55 = vmul.f32 -1.442695, %v690_v60  ;;  %v3057_v37 = vpop.eup %3056  ;;  %vm545_vm13 = vweird.f32 %v3055_v61  ;;  %vm527_vm0 = vmor %vm525_vm15, %vm526_vm12 }
 0x152   :  { %v522_v36 = vsub.f32 1.0, %v521_v14  ;;  %v3059_v44 = vpop.eup %3058  ;;  %v3612_v45 = vadd.f32 1.0, %v3057_v37  ;;  %vm546_vm1 = vmor %vm544_vm14, %vm545_vm13  ;;  %v570_v17 = vand.u32 2147483648, %v3609_v57  ;;  %v568_v20 = vand.u32 2147483647, %v3609_v57 }
 0x153   :  { %v541_v38 = vsub.f32 1.0, %v540_v33  ;;  %3064 = vpow2.f32 %v2921_v55  ;;  %v3614_v46 = vadd.f32 1.0, %v3059_v44 }
 0x154   :  { %v523_v43 = vmul.f32 %v3053_v59, %v522_v36  ;;  %3066 = vrcp.f32 %v3612_v45  ;;  %v704_v22 = vand.u32 2147483647, %v3612_v45  ;;  %v706_v23 = vand.u32 2147483648, %v3612_v45 }
 0x155   :  { %v542_v41 = vmul.f32 %v3055_v61, %v541_v38  ;;  %3068 = vrcp.f32 %v3614_v46  ;;  %v725_v25 = vand.u32 2147483648, %v3614_v46  ;;  %v723_v27 = vand.u32 2147483647, %v3614_v46 }
 0x156   :  { %v3616_v35 = vpop.eup %3060  ;;  %v524_v49 = vadd.f32 %v3053_v59, %v523_v43  ;;  %v571_v28 = vor.u32 1.1754944e-38, %v570_v17  ;;  %vm719_vm12 = vweird.f32 %v3614_v46  ;;  %vm700_vm13 = vweird.f32 %v3612_v45  ;;  %v3675_v17 = vld [vmem:[#allocation5 + $0x18] sm:$0xff] }
 0x157   :  { %v543_v51 = vadd.f32 %v3055_v61, %v542_v41  ;;  %v560_v52 = vmul.f32 %v3616_v35, %v3609_v57  ;;  %v3063_v53 = vpop.eup %3062  ;;  %vm565_vm6 = vweird.f32 %v3616_v35  ;;  %vm569_vm14 = vcmp.eq.f32.partialorder %v568_v20, 8.507059e+37 }
 0x158   :  { %v528_v47 = vsel %vm527_vm0, %v3053_v59, %v524_v49  ;;  %vm3639_vm7 = vmor %vm564_vm4, %vm565_vm6  ;;  %vm705_vm0 = vcmp.eq.f32.partialorder %v704_v22, 8.507059e+37  ;;  %v707_v62 = vor.u32 1.1754944e-38, %v706_v23  ;;  %v726_v59 = vor.u32 1.1754944e-38, %v725_v25  ;;  %v3683_v22 = vld [vmem:[#allocation5 + $0x78] sm:$0xff]  ;;  %v3689_v25 = vld [vmem:[#allocation5 + $0x30] sm:$0xff] }
 0x159   :  { %v533_v0 = vsel %vm530_vm2, %v532_v50, %v528_v47  ;;  %v547_v1 = vsel %vm546_vm1, %v3055_v61, %v543_v51  ;;  %v561_v2 = vsub.f32 1.0, %v560_v52  ;;  %v3065_v5 = vpop.eup %3064  ;;  %vm724_vm2 = vcmp.eq.f32.partialorder %v723_v27, 8.507059e+37  ;;  %v761_v50 = vld [vmem:[#allocation2 + $0x4] sm:$0x3]  ;;  %v791_v51 = vld [vmem:[#allocation2 + $0x14] sm:$0x3] }
 0x15a   :  { %v552_v6 = vsel %vm549_vm3, %v551_v39, %v547_v1  ;;  %v575_v7 = vmul.f32 %v3063_v53, %v533_v0  ;;  %v3624_v10 = vadd.f32 1.0, %v3065_v5  ;;  %v3067_v11 = vpop.eup %3066 }
 0x15b   :  { %v574_v8 = vmul.f32 %v552_v6, %v3531_v48  ;;  %v562_v9 = vmul.f32 %v3616_v35, %v561_v2  ;;  %v3069_v13 = vpop.eup %3068  ;;  %v696_v16 = vmul.f32 %v3067_v11, %v3612_v45  ;;  %vm701_vm8 = vweird.f32 %v3067_v11 }
 0x15c   :  { %3070 = vrcp.f32 %v3624_v10  ;;  %v715_v48 = vmul.f32 %v3069_v13, %v3614_v46  ;;  %vm720_vm10 = vweird.f32 %v3069_v13  ;;  %vm702_vm15 = vmor %vm700_vm13, %vm701_vm8  ;;  %v745_v45 = vand.u32 2147483648, %v3624_v10 }
 0x15d   :  { %v3626_v15 = vadd.f32 %v575_v7, %v574_v8  ;;  %v697_v18 = vsub.f32 1.0, %v696_v16  ;;  %v563_v19 = vadd.f32 %v3616_v35, %v562_v9  ;;  %vm721_vm1 = vmor %vm719_vm12, %vm720_vm10  ;;  %vm739_vm4 = vweird.f32 %v3624_v10 }
 0x15e   :  { %v716_v21 = vsub.f32 1.0, %v715_v48  ;;  %v746_v34 = vor.u32 1.1754944e-38, %v745_v45  ;;  %v3677_v48 = vld [vmem:[#allocation5 + $0x38] sm:$0xff] }
 0x15f   :  { %3072 = vtanh.f32 %v3626_v15  ;;  %v698_v26 = vmul.f32 %v3067_v11, %v697_v18  ;;  %v567_v30 = vsel %vm3639_vm7, %v3616_v35, %v563_v19  ;;  %v3679_v18 = vld [vmem:[#allocation5 + $0x58] sm:$0xff]  ;;  %v818_v19 = vld [vmem:[#allocation2 + $0x24] sm:$0x3] }
 0x160   :  { %3074 = vtanh.f32 %v663_v12  ;;  %v717_v29 = vmul.f32 %v3069_v13, %v716_v21  ;;  %v572_v61 = vsel %vm569_vm14, %v571_v28, %v567_v30  ;;  %v1020_v30 = vld [vmem:[#allocation2 + $0x7a] sm:$0x3] }
 0x161   :  { %v699_v32 = vadd.f32 %v3067_v11, %v698_v26  ;;  %v3691_v26 = vld [vmem:[#allocation5 + $0x50] sm:$0xff] }
 0x162   :  { %v3071_v31 = vpop.eup %3070  ;;  %v718_v54 = vadd.f32 %v3069_v13, %v717_v29 }
 0x163   :  { %v735_v57 = vmul.f32 %v3071_v31, %v3624_v10  ;;  %v703_v60 = vsel %vm702_vm15, %v3067_v11, %v699_v32  ;;  %vm740_vm3 = vweird.f32 %v3071_v31  ;;  %v937_v11 = vld [vmem:[#allocation2 + $0x4a] sm:$0x3] }
 0x164   :  { %v708_v33 = vsel %vm705_vm0, %v707_v62, %v703_v60  ;;  %v722_v36 = vsel %vm721_vm1, %v3069_v13, %v718_v54  ;;  %vm741_vm6 = vmor %vm739_vm4, %vm740_vm3  ;;  %v966_v13 = vld [vmem:[#allocation2 + $0x5a] sm:$0x3]  ;;  %v3701_v62 = vld [vmem:[#allocation5 + $0x8] sm:$0xff] }
 0x165   :  { %v3073_v58 = vpop.eup %3072  ;;  %v736_v55 = vsub.f32 1.0, %v735_v57  ;;  %v727_v38 = vsel %vm724_vm2, %v726_v59, %v722_v36  ;;  %v3703_v54 = vld [vmem:[#allocation5 + $0x28] sm:$0xff] }
 0x166   :  { %v3075_v14 = vpop.eup %3074  ;;  %v578_v37 = vmul.f32 %v3073_v58, %v572_v61  ;;  %v749_v40 = vmul.f32 %v727_v38, %v3557_v56  ;;  %v743_v56 = vand.u32 2147483647, %v3624_v10  ;;  %v3705_v57 = vld [vmem:[#allocation5 + $0x48] sm:$0xff]  ;;  %v3713_v61 = vld [vmem:[#allocation5] sm:$0xff] }
 0x167   :  { %v750_v63 = vmul.f32 %v3075_v14, %v708_v33  ;;  %v737_v42 = vmul.f32 %v3071_v31, %v736_v55  ;;  %v3711_v60 = vld [vmem:[#allocation5 + $0x68] sm:$0xff]  ;;  %v3715_v14 = vld [vmem:[#allocation5 + $0x20] sm:$0xff] }
 0x168   :  { %2922 = vmatmul.msk.f32.vlgmr.msra.gmra.mxu0 %vm49_vm9, %v578_v37  ;;  %2923 = vmatmul.msk.f32.vlgmr.msra.gmra.mxu1 %vm49_vm9, %v578_v37  ;;  %580 = vst.msk [vmem:[#allocation7 + $0x2] sm:$0x3] %vm221_vm5, %v578_v37  ;;  %vm744_vm7 = vcmp.eq.f32.partialorder %v743_v56, 8.507059e+37  ;;  %v3726_v38 = vld [vmem:[#allocation5 + $0x60] sm:$0xff] }
 0x169   :  { %2924 = vmatmul.msk.f32.vlgmr.msra.gmra.mxu2 %vm49_vm9, %v578_v37  ;;  %2925 = vmatmul.msk.f32.vlgmr.msra.gmra.mxu3 %vm49_vm9, %v578_v37  ;;  %v3657_v44 = vadd.f32 %v750_v63, %v749_v40  ;;  %v738_v43 = vadd.f32 %v3071_v31, %v737_v42  ;;  %v3724_v37 = vld [vmem:[#allocation5 + $0x40] sm:$0xff]  ;;  %v3728_v63 = vld [vmem:[#allocation5 + $0x98] sm:$0xff] }
 0x16a   :  { %1136 = vmatpush.msra.mxu0 %v3675_v17  ;;  %1163 = vmatpush.msra.mxu1 %v3677_v48  ;;  %v3734_v42 = vld [vmem:[#allocation5 + $0xb8] sm:$0xff] }
 0x16b   :  { %3076 = vtanh.f32 %v3657_v44  ;;  %v742_v41 = vsel %vm741_vm6, %v3071_v31, %v738_v43  ;;  %1190 = vmatpush.msra.mxu2 %v3679_v18  ;;  %1217 = vmatpush.msra.mxu3 %v3683_v22  ;;  %v3695_v31 = vld [vmem:[#allocation5 + $0x70] sm:$0xff]  ;;  %v3736_v43 = vld [vmem:[#allocation5 + $0xd8] sm:$0xff] }
 0x16c   :  { %v747_v35 = vsel %vm744_vm7, %v746_v34, %v742_v41  ;;  %1137 = vmatpush.msra.mxu0 %v3687_v24  ;;  %1164 = vmatpush.msra.mxu1 %v3689_v25  ;;  %v3741_v34 = vld [vmem:[#allocation5 + $0xf8] sm:$0xff] }
 0x16d   :  { %1191 = vmatpush.msra.mxu2 %v3691_v26  ;;  %1218 = vmatpush.msra.mxu3 %v3695_v31 }
 0x16e   :  { %1138 = vmatpush.msra.mxu0 %v3701_v62  ;;  %1165 = vmatpush.msra.mxu1 %v3703_v54 }
 0x16f   :  { %1192 = vmatpush.msra.mxu2 %v3705_v57  ;;  %1219 = vmatpush.msra.mxu3 %v3711_v60 }
 0x170   :  { %1139 = vmatpush.msra.mxu0 %v3713_v61  ;;  %1166 = vmatpush.msra.mxu1 %v3715_v14 }
 0x171   :  { %v3077_v46 = vpop.eup %3076  ;;  %1193 = vmatpush.msra.mxu2 %v3724_v37  ;;  %1220 = vmatpush.msra.mxu3 %v3726_v38 }
 0x172   :  { %v753_v49 = vmul.f32 %v3077_v46, %v747_v35  ;;  %v3743_v46 = vld [vmem:[#allocation5 + $0x90] sm:$0xff] }
 0x174   :  { %755 = vrot.lane.b32.xlu0 %v753_v49, %s3349_s17  ;;  %2929 = vmatmul.msk.f32.vlgmr.msrb.gmra.mxu0 %vm49_vm9, %v753_v49 }
 0x175   :  { %2930 = vmatmul.msk.f32.vlgmr.msrb.gmra.mxu1 %vm49_vm9, %v753_v49  ;;  %2931 = vmatmul.msk.f32.vlgmr.msrb.gmra.mxu2 %vm49_vm9, %v753_v49 }
 0x176   :  { %2932 = vmatmul.msk.f32.vlgmr.msrb.gmra.mxu3 %vm49_vm9, %v753_v49  ;;  %1311 = vmatpush.msrb.mxu0 %v3728_v63 }
 0x177   :  { %1338 = vmatpush.msrb.mxu1 %v3734_v42  ;;  %1365 = vmatpush.msrb.mxu2 %v3736_v43 }
 0x178   :  { %1392 = vmatpush.msrb.mxu3 %v3741_v34  ;;  %1312 = vmatpush.msrb.mxu0 %v3743_v46 }
 0x1e5   :  { %v786_v52 = vpop.f32.mrf.mxu0  ;;  %v813_v53 = vpop.f32.mrf.mxu1 }
 0x1e6   :  { %v789_v39 = vadd.f32 %v786_v52, %v761_v50  ;;  %v816_v47 = vadd.f32 %v813_v53, %v791_v51  ;;  %v756_v0 = vpop.permute.xlu0 %755  ;;  %v3748_v50 = vld [vmem:[#allocation5 + $0xb0] sm:$0xff] }
 0x1e7   :  { %759 = vst.msk [vmem:[#allocation7 + $0xc] sm:$0x3] %vm403_vm11, %v756_v0  ;;  %v3750_v51 = vld [vmem:[#allocation5 + $0xd0] sm:$0xff]  ;;  %v3759_v0 = vld [vmem:[#allocation5 + $0x88] sm:$0xff]  ;;  %1339 = vmatpush.msrb.mxu1 %v3748_v50 }
 0x1e8   :  { %v2926_v1 = vmul.f32 -1.442695, %v789_v39  ;;  %v2927_v2 = vmul.f32 -1.442695, %v816_v47  ;;  %v3752_v52 = vld [vmem:[#allocation5 + $0xf0] sm:$0xff]  ;;  %1366 = vmatpush.msrb.mxu2 %v3750_v51  ;;  %1313 = vmatpush.msrb.mxu0 %v3759_v0 }
 0x1e9   :  { %1393 = vmatpush.msrb.mxu3 %v3752_v52 }
 0x1ea   :  { %3078 = vpow2.f32 %v2926_v1  ;;  %v3761_v1 = vld [vmem:[#allocation5 + $0xa8] sm:$0xff] }
 0x1eb   :  { %3080 = vpow2.f32 %v2927_v2  ;;  %1340 = vmatpush.msrb.mxu1 %v3761_v1 }
 0x1ec   :  { %v867_v4 = vpop.f32.mrf.mxu3  ;;  %v840_v23 = vpop.f32.mrf.mxu2 }
 0x1ed   :  { %v870_v5 = vadd.f32 %v867_v4, %v845_v3  ;;  %v843_v59 = vadd.f32 %v840_v23, %v818_v19 }
 0x1ef   :  { %v2928_v6 = vmul.f32 -1.442695, %v870_v5  ;;  %v3769_v5 = vld [vmem:[#allocation5 + $0xc8] sm:$0xff] }
 0x1f0   :  { %v3079_v7 = vpop.eup %3078  ;;  %1367 = vmatpush.msrb.mxu2 %v3769_v5 }
 0x1f1   :  { %v3081_v8 = vpop.eup %3080  ;;  %v3669_v9 = vadd.f32 1.0, %v3079_v7  ;;  %3082 = vpow2.f32 %v2928_v6  ;;  %v961_v12 = vpop.f32.mrf.mxu0  ;;  %v3771_v6 = vld [vmem:[#allocation5 + $0xe8] sm:$0xff] }
 0x1f2   :  { %v3671_v10 = vadd.f32 1.0, %v3081_v8  ;;  %v988_v16 = vpop.f32.mrf.mxu1  ;;  %v964_v20 = vadd.f32 %v961_v12, %v937_v11  ;;  %v3781_v12 = vld [vmem:[#allocation5 + $0x80] sm:$0xff]  ;;  %1394 = vmatpush.msrb.mxu3 %v3771_v6 }
 0x1f3   :  { %3084 = vrcp.f32 %v3669_v9  ;;  %v991_v21 = vadd.f32 %v988_v16, %v966_v13  ;;  %v884_v56 = vand.u32 2147483647, %v3669_v9  ;;  %v886_v49 = vand.u32 2147483648, %v3669_v9  ;;  %v3783_v13 = vld [vmem:[#allocation5 + $0xa0] sm:$0xff]  ;;  %1314 = vmatpush.msrb.mxu0 %v3781_v12 }
 0x1f4   :  { %3086 = vrcp.f32 %v3671_v10  ;;  %v2933_v28 = vmul.f32 -1.442695, %v964_v20  ;;  %v905_v53 = vand.u32 2147483648, %v3671_v10  ;;  %vm880_vm12 = vweird.f32 %v3669_v9  ;;  %1341 = vmatpush.msrb.mxu1 %v3783_v13 }
 0x1f5   :  { %v2934_v29 = vmul.f32 -1.442695, %v991_v21  ;;  %v903_v4 = vand.u32 2147483647, %v3671_v10  ;;  %vm899_vm13 = vweird.f32 %v3671_v10  ;;  %vm3793_vm15 = vcmp.eq.f32.partialorder %v884_v56, 8.507059e+37 }
 0x1f6   :  { %3088 = vpow2.f32 %v2933_v28  ;;  %v887_v21 = vor.u32 1.1754944e-38, %v886_v49  ;;  %v3802_v28 = vld [vmem:[#allocation5 + $0xc0] sm:$0xff] }
 0x1f7   :  { %v3083_v27 = vpop.eup %3082  ;;  %vm904_vm1 = vcmp.eq.f32.partialorder %v903_v4, 8.507059e+37  ;;  %1368 = vmatpush.msrb.mxu2 %v3802_v28 }
 0x1f8   :  { %v3697_v32 = vadd.f32 1.0, %v3083_v27 }
 0x1f9   :  { %v3707_v58 = vpop.eup %3084  ;;  %v1042_v55 = vpop.f32.mrf.mxu3 }
 0x1fa   :  { %v3717_v33 = vpop.eup %3086  ;;  %v876_v36 = vmul.f32 %v3707_v58, %v3669_v9  ;;  %3090 = vrcp.f32 %v3697_v32  ;;  %v1045_v41 = vadd.f32 %v1042_v55, %v1020_v30  ;;  %vm881_vm8 = vweird.f32 %v3707_v58  ;;  %v3804_v9 = vld [vmem:[#allocation5 + $0xe0] sm:$0xff] }
 0x1fb   :  { %v895_v40 = vmul.f32 %v3717_v33, %v3671_v10  ;;  %3092 = vpow2.f32 %v2934_v29  ;;  %vm900_vm10 = vweird.f32 %v3717_v33  ;;  %vm3789_vm14 = vmor %vm880_vm12, %vm881_vm8  ;;  %v906_v29 = vor.u32 1.1754944e-38, %v905_v53  ;;  %1395 = vmatpush.msrb.mxu3 %v3804_v9 }
 0x1fc   :  { %v877_v45 = vsub.f32 1.0, %v876_v36  ;;  %3094 = vtanh.f32 %v843_v59  ;;  %v2935_v47 = vmul.f32 -1.442695, %v1045_v41  ;;  %v3089_v2 = vpop.eup %3088  ;;  %vm901_vm0 = vmor %vm899_vm13, %vm900_vm10  ;;  %vm919_vm3 = vweird.f32 %v3697_v32 }
 0x1fd   :  { %v896_v35 = vsub.f32 1.0, %v895_v40  ;;  %v3777_v11 = vadd.f32 1.0, %v3089_v2  ;;  %v925_v2 = vand.u32 2147483648, %v3697_v32 }
 0x1fe   :  { %v878_v39 = vmul.f32 %v3707_v58, %v877_v45  ;;  %3096 = vpow2.f32 %v2935_v47 }
 0x1ff   :  { %v897_v3 = vmul.f32 %v3717_v33, %v896_v35  ;;  %3098 = vrcp.f32 %v3777_v11  ;;  %v993_v35 = vld [vmem:[#allocation2 + $0x6a] sm:$0x3]  ;;  %vm1055_vm7 = vweird.f32 %v3777_v11 }
 0x200   :  { %v3773_v7 = vpop.eup %3090  ;;  %v879_v8 = vadd.f32 %v3707_v58, %v878_v39 }
 0x201   :  { %v3093_v16 = vpop.eup %3092  ;;  %v898_v23 = vadd.f32 %v3717_v33, %v897_v3  ;;  %v915_v27 = vmul.f32 %v3773_v7, %v3697_v32  ;;  %vm920_vm2 = vweird.f32 %v3773_v7 }
 0x202   :  { %v883_v30 = vsel %vm3789_vm14, %v3707_v58, %v879_v8  ;;  %v3814_v59 = vadd.f32 1.0, %v3093_v16  ;;  %v3095_v36 = vpop.eup %3094  ;;  %v923_v16 = vand.u32 2147483647, %v3697_v32  ;;  %vm3840_vm4 = vmor %vm919_vm3, %vm920_vm2  ;;  %v1059_v32 = vand.u32 2147483647, %v3777_v11 }
 0x203   :  { %v888_v55 = vsel %vm3793_vm15, %v887_v21, %v883_v30  ;;  %v902_v10 = vsel %vm901_vm0, %v3717_v33, %v898_v23  ;;  %v916_v40 = vsub.f32 1.0, %v915_v27  ;;  %v1015_v33 = vpop.f32.mrf.mxu2  ;;  %v926_v23 = vor.u32 1.1754944e-38, %v925_v2 }
 0x204   :  { %v907_v58 = vsel %vm904_vm1, %v906_v29, %v902_v10  ;;  %v930_v45 = vmul.f32 %v3095_v36, %v888_v55  ;;  %3100 = vrcp.f32 %v3814_v59  ;;  %v3097_v49 = vpop.eup %3096  ;;  %v1018_v3 = vadd.f32 %v1015_v33, %v993_v35 }
 0x205   :  { %v929_v56 = vmul.f32 %v907_v58, %v3626_v15  ;;  %v917_v41 = vmul.f32 %v3773_v7, %v916_v40  ;;  %v3830_v39 = vadd.f32 1.0, %v3097_v49  ;;  %v3099_v47 = vpop.eup %3098  ;;  %v1061_v27 = vand.u32 2147483648, %v3777_v11 }
 0x206   :  { %v1051_v15 = vmul.f32 %v3099_v47, %v3777_v11  ;;  %vm1056_vm6 = vweird.f32 %v3099_v47  ;;  %v1080_v55 = vand.u32 2147483648, %v3814_v59  ;;  %v1078_v10 = vand.u32 2147483647, %v3814_v59 }
 0x207   :  { %v3828_v53 = vadd.f32 %v930_v45, %v929_v56  ;;  %v918_v4 = vadd.f32 %v3773_v7, %v917_v41  ;;  %vm924_vm8 = vcmp.eq.f32.partialorder %v923_v16, 8.507059e+37  ;;  %vm1074_vm12 = vweird.f32 %v3814_v59  ;;  %vm1057_vm13 = vmor %vm1055_vm7, %vm1056_vm6 }
 0x208   :  { %v1052_v20 = vsub.f32 1.0, %v1051_v15  ;;  %vm1060_vm14 = vcmp.eq.f32.partialorder %v1059_v32, 8.507059e+37  ;;  %vm1079_vm0 = vcmp.eq.f32.partialorder %v1078_v10, 8.507059e+37  ;;  %vm1094_vm2 = vweird.f32 %v3830_v39 }
 0x209   :  { %3102 = vtanh.f32 %v3828_v53  ;;  %v922_v29 = vsel %vm3840_vm4, %v3773_v7, %v918_v4  ;;  %v1062_v7 = vor.u32 1.1754944e-38, %v1061_v27 }
 0x20a   :  { %v3101_v8 = vpop.eup %3100  ;;  %3104 = vrcp.f32 %v3830_v39  ;;  %v1053_v36 = vmul.f32 %v3099_v47, %v1052_v20  ;;  %v927_v56 = vsel %vm924_vm8, %v926_v23, %v922_v29  ;;  %v1098_v23 = vand.u32 2147483647, %v3830_v39 }
 0x20b   :  { %v1070_v21 = vmul.f32 %v3101_v8, %v3814_v59  ;;  %3106 = vtanh.f32 %v1018_v3  ;;  %vm1075_vm10 = vweird.f32 %v3101_v8  ;;  %v1081_v3 = vor.u32 1.1754944e-38, %v1080_v55  ;;  %v1146_v55 = vld [vmem:[#allocation2 + $0x16] sm:$0x3] }
 0x20c   :  { %v1054_v45 = vadd.f32 %v3099_v47, %v1053_v36  ;;  %vm1076_vm15 = vmor %vm1074_vm12, %vm1075_vm10  ;;  %vm1099_vm4 = vcmp.eq.f32.partialorder %v1098_v23, 8.507059e+37 }
 0x20d   :  { %v1071_v30 = vsub.f32 1.0, %v1070_v21 }
 0x20e   :  { %v1058_v33 = vsel %vm1057_vm13, %v3099_v47, %v1054_v45 }
 0x20f   :  { %v3103_v40 = vpop.eup %3102  ;;  %v1072_v58 = vmul.f32 %v3101_v8, %v1071_v30  ;;  %v1063_v4 = vsel %vm1060_vm14, %v1062_v7, %v1058_v33 }
 0x210   :  { %v3105_v41 = vpop.eup %3104  ;;  %v933_v35 = vmul.f32 %v3103_v40, %v927_v56 }
 0x211   :  { %v1073_v49 = vadd.f32 %v3101_v8, %v1072_v58  ;;  %v1090_v2 = vmul.f32 %v3105_v41, %v3830_v39  ;;  %v3107_v11 = vpop.eup %3106  ;;  %vm1095_vm1 = vweird.f32 %v3105_v41 }
 0x212   :  { %2936 = vmatmul.msk.f32.vlgmr.msra.gmra.mxu0 %vm49_vm9, %v933_v35  ;;  %2937 = vmatmul.msk.f32.vlgmr.msra.gmra.mxu1 %vm49_vm9, %v933_v35  ;;  %935 = vst.msk [vmem:[#allocation7 + $0x4] sm:$0x3] %vm221_vm5, %v933_v35  ;;  %v1105_v59 = vmul.f32 %v3107_v11, %v1063_v4  ;;  %vm1096_vm3 = vmor %vm1094_vm2, %vm1095_vm1 }
 0x213   :  { %v1077_v15 = vsel %vm1076_vm15, %v3101_v8, %v1073_v49  ;;  %v1091_v16 = vsub.f32 1.0, %v1090_v2  ;;  %2938 = vmatmul.msk.f32.vlgmr.msra.gmra.mxu2 %vm49_vm9, %v933_v35  ;;  %2939 = vmatmul.msk.f32.vlgmr.msra.gmra.mxu3 %vm49_vm9, %v933_v35  ;;  %v1200_v35 = vld [vmem:[#allocation2 + $0x36] sm:$0x3] }
 0x214   :  { %v1082_v47 = vsel %vm1079_vm0, %v1081_v3, %v1077_v15  ;;  %1491 = vmatpush.msra.mxu0 %v3675_v17  ;;  %1518 = vmatpush.msra.mxu1 %v3677_v48 }
 0x215   :  { %v1104_v19 = vmul.f32 %v1082_v47, %v3657_v44  ;;  %v1092_v20 = vmul.f32 %v3105_v41, %v1091_v16  ;;  %1545 = vmatpush.msra.mxu2 %v3679_v18  ;;  %1572 = vmatpush.msra.mxu3 %v3683_v22  ;;  %v1100_v44 = vand.u32 2147483648, %v3830_v39  ;;  %v1116_v39 = vld [vmem:[#allocation2 + $0x6] sm:$0x3]  ;;  %v1321_v16 = vld [vmem:[#allocation2 + $0x58] sm:$0x3] }
 0x216   :  { %1492 = vmatpush.msra.mxu0 %v3687_v24  ;;  %1519 = vmatpush.msra.mxu1 %v3689_v25 }
 0x217   :  { %v3867_v8 = vadd.f32 %v1105_v59, %v1104_v19  ;;  %1546 = vmatpush.msra.mxu2 %v3691_v26  ;;  %1573 = vmatpush.msra.mxu3 %v3695_v31  ;;  %v1093_v21 = vadd.f32 %v3105_v41, %v1092_v20  ;;  %v1101_v29 = vor.u32 1.1754944e-38, %v1100_v44  ;;  %v1292_v59 = vld [vmem:[#allocation2 + $0x48] sm:$0x3]  ;;  %v1173_v19 = vld [vmem:[#allocation2 + $0x26] sm:$0x3] }
 0x218   :  { %1493 = vmatpush.msra.mxu0 %v3701_v62  ;;  %1520 = vmatpush.msra.mxu1 %v3703_v54 }
 0x219   :  { %3108 = vtanh.f32 %v3867_v8  ;;  %1547 = vmatpush.msra.mxu2 %v3705_v57  ;;  %1574 = vmatpush.msra.mxu3 %v3711_v60  ;;  %v1097_v27 = vsel %vm1096_vm3, %v3105_v41, %v1093_v21 }
 0x21a   :  { %1494 = vmatpush.msra.mxu0 %v3713_v61  ;;  %1521 = vmatpush.msra.mxu1 %v3715_v14  ;;  %v1102_v36 = vsel %vm1099_vm4, %v1101_v29, %v1097_v27 }
 0x21b   :  { %1548 = vmatpush.msra.mxu2 %v3724_v37  ;;  %1575 = vmatpush.msra.mxu3 %v3726_v38 }
 0x21f   :  { %v3109_v30 = vpop.eup %3108 }
 0x220   :  { %v1108_v32 = vmul.f32 %v3109_v30, %v1102_v36 }
 0x222   :  { %1110 = vrot.lane.b32.xlu1 %v1108_v32, %s3349_s17  ;;  %2943 = vmatmul.msk.f32.vlgmr.msrb.gmra.mxu0 %vm49_vm9, %v1108_v32 }
 0x223   :  { %2944 = vmatmul.msk.f32.vlgmr.msrb.gmra.mxu1 %vm49_vm9, %v1108_v32  ;;  %2945 = vmatmul.msk.f32.vlgmr.msrb.gmra.mxu2 %vm49_vm9, %v1108_v32 }
 0x224   :  { %2946 = vmatmul.msk.f32.vlgmr.msrb.gmra.mxu3 %vm49_vm9, %v1108_v32  ;;  %1665 = vmatpush.msrb.mxu0 %v3728_v63 }
 0x225   :  { %1692 = vmatpush.msrb.mxu1 %v3734_v42  ;;  %1719 = vmatpush.msrb.mxu2 %v3736_v43 }
 0x226   :  { %1746 = vmatpush.msrb.mxu3 %v3741_v34  ;;  %1666 = vmatpush.msrb.mxu0 %v3743_v46 }
 0x227   :  { %1693 = vmatpush.msrb.mxu1 %v3748_v50  ;;  %1720 = vmatpush.msrb.mxu2 %v3750_v51 }
 0x228   :  { %1747 = vmatpush.msrb.mxu3 %v3752_v52  ;;  %1667 = vmatpush.msrb.mxu0 %v3759_v0 }
 0x229   :  { %1694 = vmatpush.msrb.mxu1 %v3761_v1  ;;  %1721 = vmatpush.msrb.mxu2 %v3769_v5 }
 0x22a   :  { %1748 = vmatpush.msrb.mxu3 %v3771_v6  ;;  %1668 = vmatpush.msrb.mxu0 %v3781_v12 }
 0x22b   :  { %1695 = vmatpush.msrb.mxu1 %v3783_v13  ;;  %1722 = vmatpush.msrb.mxu2 %v3802_v28 }
 0x22c   :  { %1749 = vmatpush.msrb.mxu3 %v3804_v9 }
 0x28f   :  { %v1141_v10 = vpop.f32.mrf.mxu0  ;;  %v1168_v40 = vpop.f32.mrf.mxu1 }
 0x290   :  { %v1144_v58 = vadd.f32 %v1141_v10, %v1116_v39  ;;  %v1171_v45 = vadd.f32 %v1168_v40, %v1146_v55 }
 0x292   :  { %v2940_v56 = vmul.f32 -1.442695, %v1144_v58  ;;  %v2941_v41 = vmul.f32 -1.442695, %v1171_v45  ;;  %v1375_v58 = vld [vmem:[#allocation2 + $0x78] sm:$0x3] }
 0x294   :  { %v1111_v7 = vpop.permute.xlu1 %1110  ;;  %3110 = vpow2.f32 %v2940_v56 }
 0x295   :  { %1114 = vst.msk [vmem:[#allocation7 + $0xa] sm:$0x3] %vm403_vm11, %v1111_v7  ;;  %3112 = vpow2.f32 %v2941_v41 }
 0x296   :  { %v1222_v33 = vpop.f32.mrf.mxu3  ;;  %v1195_v20 = vpop.f32.mrf.mxu2 }
 0x297   :  { %v1225_v49 = vadd.f32 %v1222_v33, %v1200_v35  ;;  %v1198_v32 = vadd.f32 %v1195_v20, %v1173_v19 }
 0x299   :  { %v2942_v2 = vmul.f32 -1.442695, %v1225_v49 }
 0x29a   :  { %v3111_v11 = vpop.eup %3110 }
 0x29b   :  { %v3113_v3 = vpop.eup %3112  ;;  %v1229_v4 = vadd.f32 1.0, %v3111_v11  ;;  %3114 = vpow2.f32 %v2942_v2 }
 0x29c   :  { %v1248_v15 = vadd.f32 1.0, %v3113_v3 }
 0x29d   :  { %3116 = vrcp.f32 %v1229_v4  ;;  %v1239_v56 = vand.u32 2147483647, %v1229_v4  ;;  %v1241_v35 = vand.u32 2147483648, %v1229_v4  ;;  %vm1235_vm8 = vweird.f32 %v1229_v4 }
 0x29e   :  { %3118 = vrcp.f32 %v1248_v15  ;;  %v1260_v7 = vand.u32 2147483648, %v1248_v15  ;;  %v1258_v2 = vand.u32 2147483647, %v1248_v15  ;;  %vm1254_vm10 = vweird.f32 %v1248_v15 }
 0x29f   :  { %v1316_v47 = vpop.f32.mrf.mxu0  ;;  %vm1240_vm12 = vcmp.eq.f32.partialorder %v1239_v56, 8.507059e+37 }
 0x2a0   :  { %v1319_v21 = vadd.f32 %v1316_v47, %v1292_v59  ;;  %v1343_v44 = vpop.f32.mrf.mxu1  ;;  %v1261_v20 = vor.u32 1.1754944e-38, %v1260_v7  ;;  %vm1259_vm15 = vcmp.eq.f32.partialorder %v1258_v2, 8.507059e+37  ;;  %v1348_v7 = vld [vmem:[#allocation2 + $0x68] sm:$0x3] }
 0x2a1   :  { %v3115_v23 = vpop.eup %3114  ;;  %v1346_v27 = vadd.f32 %v1343_v44, %v1321_v16 }
 0x2a2   :  { %v3905_v29 = vadd.f32 1.0, %v3115_v23  ;;  %v2947_v30 = vmul.f32 -1.442695, %v1319_v21  ;;  %v1242_v21 = vor.u32 1.1754944e-38, %v1241_v35 }
 0x2a3   :  { %v3117_v36 = vpop.eup %3116  ;;  %v2948_v39 = vmul.f32 -1.442695, %v1346_v27 }
 0x2a4   :  { %v3119_v55 = vpop.eup %3118  ;;  %v1231_v10 = vmul.f32 %v3117_v36, %v1229_v4  ;;  %3120 = vrcp.f32 %v3905_v29  ;;  %vm1236_vm6 = vweird.f32 %v3117_v36  ;;  %vm1274_vm1 = vweird.f32 %v3905_v29 }
 0x2a5   :  { %v1250_v40 = vmul.f32 %v3119_v55, %v1248_v15  ;;  %3122 = vpow2.f32 %v2947_v30  ;;  %vm1255_vm7 = vweird.f32 %v3119_v55  ;;  %vm1237_vm13 = vmor %vm1235_vm8, %vm1236_vm6 }
 0x2a6   :  { %v1232_v45 = vsub.f32 1.0, %v1231_v10  ;;  %3124 = vpow2.f32 %v2948_v39  ;;  %vm1256_vm14 = vmor %vm1254_vm10, %vm1255_vm7  ;;  %v1370_v35 = vpop.f32.mrf.mxu2 }
 0x2a7   :  { %v1251_v41 = vsub.f32 1.0, %v1250_v40  ;;  %3126 = vtanh.f32 %v1198_v32  ;;  %v1397_v33 = vpop.f32.mrf.mxu3 }
 0x2a8   :  { %v1233_v49 = vmul.f32 %v3117_v36, %v1232_v45  ;;  %v1400_v11 = vadd.f32 %v1397_v33, %v1375_v58 }
 0x2a9   :  { %v1252_v3 = vmul.f32 %v3119_v55, %v1251_v41 }
 0x2aa   :  { %v3121_v59 = vpop.eup %3120  ;;  %v1234_v16 = vadd.f32 %v3117_v36, %v1233_v49  ;;  %v2949_v47 = vmul.f32 -1.442695, %v1400_v11  ;;  %v1278_v11 = vand.u32 2147483647, %v3905_v29 }
 0x2ab   :  { %v3123_v19 = vpop.eup %3122  ;;  %v1253_v44 = vadd.f32 %v3119_v55, %v1252_v3  ;;  %v1270_v23 = vmul.f32 %v3121_v59, %v3905_v29  ;;  %vm1275_vm0 = vweird.f32 %v3121_v59 }
 0x2ac   :  { %v3125_v27 = vpop.eup %3124  ;;  %v1238_v30 = vsel %vm1237_vm13, %v3117_v36, %v1234_v16  ;;  %v3909_v32 = vadd.f32 1.0, %v3123_v19  ;;  %3128 = vpow2.f32 %v2949_v47  ;;  %vm3924_vm2 = vmor %vm1274_vm1, %vm1275_vm0  ;;  %vm1279_vm3 = vcmp.eq.f32.partialorder %v1278_v11, 8.507059e+37 }
 0x2ad   :  { %v3127_v4 = vpop.eup %3126  ;;  %v1243_v39 = vsel %vm1240_vm12, %v1242_v21, %v1238_v30  ;;  %v1257_v15 = vsel %vm1256_vm14, %v3119_v55, %v1253_v44  ;;  %v1271_v10 = vsub.f32 1.0, %v1270_v23  ;;  %v3911_v40 = vadd.f32 1.0, %v3125_v27 }
 0x2ae   :  { %v1262_v58 = vsel %vm1259_vm15, %v1261_v20, %v1257_v15  ;;  %v1285_v45 = vmul.f32 %v3127_v4, %v1243_v39  ;;  %3130 = vrcp.f32 %v3909_v32  ;;  %v1280_v55 = vand.u32 2147483648, %v3905_v29 }
 0x2af   :  { %v1284_v56 = vmul.f32 %v1262_v58, %v3828_v53  ;;  %v1272_v41 = vmul.f32 %v3121_v59, %v1271_v10  ;;  %3132 = vrcp.f32 %v3911_v40  ;;  %v1373_v53 = vadd.f32 %v1370_v35, %v1348_v7 }
 0x2b0   :  { %v1281_v44 = vor.u32 1.1754944e-38, %v1280_v55  ;;  %v1435_v29 = vand.u32 2147483648, %v3911_v40  ;;  %v1416_v30 = vand.u32 2147483648, %v3909_v32  ;;  %v1414_v15 = vand.u32 2147483647, %v3909_v32 }
 0x2b1   :  { %v3916_v36 = vadd.f32 %v1285_v45, %v1284_v56  ;;  %v1273_v49 = vadd.f32 %v3121_v59, %v1272_v41  ;;  %v1433_v45 = vand.u32 2147483647, %v3911_v40  ;;  %vm1410_vm7 = vweird.f32 %v3909_v32 }
 0x2b2   :  { %v3129_v33 = vpop.eup %3128  ;;  %vm1429_vm8 = vweird.f32 %v3911_v40  ;;  %v1417_v7 = vor.u32 1.1754944e-38, %v1416_v30  ;;  %vm1415_vm13 = vcmp.eq.f32.partialorder %v1414_v15, 8.507059e+37 }
 0x2b3   :  { %3134 = vtanh.f32 %v3916_v36  ;;  %v3920_v2 = vadd.f32 1.0, %v3129_v33  ;;  %v1277_v21 = vsel %vm3924_vm2, %v3121_v59, %v1273_v49  ;;  %v1436_v49 = vor.u32 1.1754944e-38, %v1435_v29 }
 0x2b4   :  { %v3131_v3 = vpop.eup %3130  ;;  %v1282_v10 = vsel %vm1279_vm3, %v1281_v44, %v1277_v21  ;;  %vm1434_vm14 = vcmp.eq.f32.partialorder %v1433_v45, 8.507059e+37 }
 0x2b5   :  { %v3133_v16 = vpop.eup %3132  ;;  %v1406_v19 = vmul.f32 %v3131_v3, %v3909_v32  ;;  %3136 = vrcp.f32 %v3920_v2  ;;  %vm1411_vm4 = vweird.f32 %v3131_v3  ;;  %vm1449_vm0 = vweird.f32 %v3920_v2 }
 0x2b6   :  { %v1425_v20 = vmul.f32 %v3133_v16, %v3911_v40  ;;  %3138 = vtanh.f32 %v1373_v53  ;;  %vm1430_vm6 = vweird.f32 %v3133_v16  ;;  %vm1412_vm10 = vmor %vm1410_vm7, %vm1411_vm4 }
 0x2b7   :  { %v1407_v23 = vsub.f32 1.0, %v1406_v19  ;;  %vm1431_vm12 = vmor %vm1429_vm8, %vm1430_vm6 }
 0x2b8   :  { %v1426_v27 = vsub.f32 1.0, %v1425_v20 }
 0x2b9   :  { %v3135_v4 = vpop.eup %3134  ;;  %v1408_v39 = vmul.f32 %v3131_v3, %v1407_v23 }
 0x2ba   :  { %v1427_v58 = vmul.f32 %v3133_v16, %v1426_v27  ;;  %v1288_v59 = vmul.f32 %v3135_v4, %v1282_v10 }
 0x2bb   :  { %v3137_v56 = vpop.eup %3136  ;;  %v1409_v41 = vadd.f32 %v3131_v3, %v1408_v39  ;;  %v1729_v39 = vld [vmem:[#allocation2 + $0x76] sm:$0x3] }
 0x2bc   :  { %v1428_v35 = vadd.f32 %v3133_v16, %v1427_v58  ;;  %v1445_v33 = vmul.f32 %v3137_v56, %v3920_v2  ;;  %2950 = vmatmul.msk.f32.vlgmr.msra.gmra.mxu0 %vm49_vm9, %v1288_v59  ;;  %2951 = vmatmul.msk.f32.vlgmr.msra.gmra.mxu1 %vm49_vm9, %v1288_v59  ;;  %1290 = vst.msk [vmem:[#allocation7 + $0x6] sm:$0x3] %vm221_vm5, %v1288_v59  ;;  %v3139_v32 = vpop.eup %3138  ;;  %vm1450_vm15 = vweird.f32 %v3137_v56 }
 0x2bd   :  { %v1413_v55 = vsel %vm1412_vm10, %v3131_v3, %v1409_v41  ;;  %2952 = vmatmul.msk.f32.vlgmr.msra.gmra.mxu2 %vm49_vm9, %v1288_v59  ;;  %2953 = vmatmul.msk.f32.vlgmr.msra.gmra.mxu3 %vm49_vm9, %v1288_v59  ;;  %vm1451_vm1 = vmor %vm1449_vm0, %vm1450_vm15 }
 0x2be   :  { %v1418_v40 = vsel %vm1415_vm13, %v1417_v7, %v1413_v55  ;;  %v1432_v11 = vsel %vm1431_vm12, %v3133_v16, %v1428_v35  ;;  %v1446_v53 = vsub.f32 1.0, %v1445_v33  ;;  %1844 = vmatpush.msra.mxu0 %v3675_v17  ;;  %1871 = vmatpush.msra.mxu1 %v3677_v48 }
 0x2bf   :  { %v1437_v47 = vsel %vm1434_vm14, %v1436_v49, %v1432_v11  ;;  %v1460_v19 = vmul.f32 %v3139_v32, %v1418_v40  ;;  %1898 = vmatpush.msra.mxu2 %v3679_v18  ;;  %1925 = vmatpush.msra.mxu3 %v3683_v22  ;;  %v1455_v18 = vand.u32 2147483648, %v3920_v2  ;;  %v1453_v22 = vand.u32 2147483647, %v3920_v2 }
 0x2c0   :  { %v1459_v3 = vmul.f32 %v1437_v47, %v3867_v8  ;;  %v1447_v20 = vmul.f32 %v3137_v56, %v1446_v53  ;;  %1845 = vmatpush.msra.mxu0 %v3687_v24  ;;  %1872 = vmatpush.msra.mxu1 %v3689_v25 }
 0x2c1   :  { %1899 = vmatpush.msra.mxu2 %v3691_v26  ;;  %1926 = vmatpush.msra.mxu3 %v3695_v31  ;;  %v1456_v25 = vor.u32 1.1754944e-38, %v1455_v18  ;;  %vm1454_vm2 = vcmp.eq.f32.partialorder %v1453_v22, 8.507059e+37 }
 0x2c2   :  { %v3954_v17 = vadd.f32 %v1460_v19, %v1459_v3  ;;  %1846 = vmatpush.msra.mxu0 %v3701_v62  ;;  %1873 = vmatpush.msra.mxu1 %v3703_v54  ;;  %v1448_v48 = vadd.f32 %v3137_v56, %v1447_v20  ;;  %v1471_v54 = vld [vmem:[#allocation2 + $0x8] sm:$0x3] }
 0x2c3   :  { %1900 = vmatpush.msra.mxu2 %v3705_v57  ;;  %1927 = vmatpush.msra.mxu3 %v3711_v60  ;;  %v1501_v57 = vld [vmem:[#allocation2 + $0x18] sm:$0x3] }
 0x2c4   :  { %3140 = vtanh.f32 %v3954_v17  ;;  %1847 = vmatpush.msra.mxu0 %v3713_v61  ;;  %1874 = vmatpush.msra.mxu1 %v3715_v14  ;;  %v1452_v24 = vsel %vm1451_vm1, %v3137_v56, %v1448_v48 }
 0x2c5   :  { %1901 = vmatpush.msra.mxu2 %v3724_v37  ;;  %1928 = vmatpush.msra.mxu3 %v3726_v38  ;;  %v1457_v31 = vsel %vm1454_vm2, %v1456_v25, %v1452_v24 }
 0x2ca   :  { %v3141_v26 = vpop.eup %3140 }
 0x2cb   :  { %v1463_v62 = vmul.f32 %v3141_v26, %v1457_v31 }
 0x2cd   :  { %1465 = vrot.lane.b32.xlu1 %v1463_v62, %s3349_s17  ;;  %2957 = vmatmul.msk.f32.vlgmr.msrb.gmra.mxu0 %vm49_vm9, %v1463_v62 }
 0x2ce   :  { %2958 = vmatmul.msk.f32.vlgmr.msrb.gmra.mxu1 %vm49_vm9, %v1463_v62  ;;  %2959 = vmatmul.msk.f32.vlgmr.msrb.gmra.mxu2 %vm49_vm9, %v1463_v62 }
 0x2cf   :  { %2960 = vmatmul.msk.f32.vlgmr.msrb.gmra.mxu3 %vm49_vm9, %v1463_v62  ;;  %2018 = vmatpush.msrb.mxu0 %v3728_v63 }
 0x2d0   :  { %2045 = vmatpush.msrb.mxu1 %v3734_v42  ;;  %2072 = vmatpush.msrb.mxu2 %v3736_v43  ;;  %v1555_v42 = vld [vmem:[#allocation2 + $0x38] sm:$0x3] }
 0x2d1   :  { %2099 = vmatpush.msrb.mxu3 %v3741_v34  ;;  %2019 = vmatpush.msrb.mxu0 %v3743_v46 }
 0x2d2   :  { %2046 = vmatpush.msrb.mxu1 %v3748_v50  ;;  %2073 = vmatpush.msrb.mxu2 %v3750_v51 }
 0x2d3   :  { %2100 = vmatpush.msrb.mxu3 %v3752_v52  ;;  %2020 = vmatpush.msrb.mxu0 %v3759_v0 }
 0x2d4   :  { %2047 = vmatpush.msrb.mxu1 %v3761_v1  ;;  %2074 = vmatpush.msrb.mxu2 %v3769_v5  ;;  %v1646_v5 = vld [vmem:[#allocation2 + $0x46] sm:$0x3] }
 0x2d5   :  { %2101 = vmatpush.msrb.mxu3 %v3771_v6  ;;  %2021 = vmatpush.msrb.mxu0 %v3781_v12  ;;  %v1675_v6 = vld [vmem:[#allocation2 + $0x56] sm:$0x3]  ;;  %v1528_v12 = vld [vmem:[#allocation2 + $0x28] sm:$0x3] }
 0x2d6   :  { %2048 = vmatpush.msrb.mxu1 %v3783_v13  ;;  %2075 = vmatpush.msrb.mxu2 %v3802_v28 }
 0x2d7   :  { %2102 = vmatpush.msrb.mxu3 %v3804_v9 }
 0x339   :  { %v1496_v60 = vpop.f32.mrf.mxu0  ;;  %v1523_v61 = vpop.f32.mrf.mxu1 }
 0x33a   :  { %v1499_v14 = vadd.f32 %v1496_v60, %v1471_v54  ;;  %v1526_v37 = vadd.f32 %v1523_v61, %v1501_v57 }
 0x33c   :  { %v2954_v38 = vmul.f32 -1.442695, %v1499_v14  ;;  %v2955_v63 = vmul.f32 -1.442695, %v1526_v37  ;;  %v1702_v14 = vld [vmem:[#allocation2 + $0x66] sm:$0x3] }
 0x33e   :  { %3142 = vpow2.f32 %v2954_v38 }
 0x33f   :  { %v1466_v43 = vpop.permute.xlu1 %1465  ;;  %3144 = vpow2.f32 %v2955_v63 }
 0x340   :  { %1469 = vst.msk [vmem:[#allocation7 + $0x8] sm:$0x3] %vm403_vm11, %v1466_v43  ;;  %v1577_v34 = vpop.f32.mrf.mxu3  ;;  %v1550_v13 = vpop.f32.mrf.mxu2 }
 0x341   :  { %v1580_v46 = vadd.f32 %v1577_v34, %v1555_v42  ;;  %v1553_v23 = vadd.f32 %v1550_v13, %v1528_v12 }
 0x343   :  { %v2956_v50 = vmul.f32 -1.442695, %v1580_v46 }
 0x344   :  { %v3143_v51 = vpop.eup %3142 }
 0x345   :  { %v3145_v52 = vpop.eup %3144  ;;  %v1584_v0 = vadd.f32 1.0, %v3143_v51  ;;  %3146 = vpow2.f32 %v2956_v50 }
 0x346   :  { %v1603_v1 = vadd.f32 1.0, %v3145_v52 }
 0x347   :  { %3148 = vrcp.f32 %v1584_v0  ;;  %v1594_v10 = vand.u32 2147483647, %v1584_v0  ;;  %v1596_v56 = vand.u32 2147483648, %v1584_v0  ;;  %vm1590_vm7 = vweird.f32 %v1584_v0 }
 0x348   :  { %3150 = vrcp.f32 %v1603_v1  ;;  %v1615_v59 = vand.u32 2147483648, %v1603_v1  ;;  %v1613_v7 = vand.u32 2147483647, %v1603_v1  ;;  %vm1609_vm6 = vweird.f32 %v1603_v1 }
 0x349   :  { %vm1595_vm8 = vcmp.eq.f32.partialorder %v1594_v10, 8.507059e+37  ;;  %v1597_v11 = vor.u32 1.1754944e-38, %v1596_v56 }
 0x34a   :  { %v1670_v28 = vpop.f32.mrf.mxu0  ;;  %v1616_v3 = vor.u32 1.1754944e-38, %v1615_v59  ;;  %vm1614_vm13 = vcmp.eq.f32.partialorder %v1613_v7, 8.507059e+37 }
 0x34b   :  { %v3147_v9 = vpop.eup %3146  ;;  %v1673_v8 = vadd.f32 %v1670_v28, %v1646_v5  ;;  %v1697_v2 = vpop.f32.mrf.mxu1 }
 0x34c   :  { %v3990_v16 = vadd.f32 1.0, %v3147_v9  ;;  %v1700_v21 = vadd.f32 %v1697_v2, %v1675_v6 }
 0x34d   :  { %v3149_v44 = vpop.eup %3148  ;;  %v2961_v27 = vmul.f32 -1.442695, %v1673_v8 }
 0x34e   :  { %v3151_v29 = vpop.eup %3150  ;;  %v1586_v30 = vmul.f32 %v3149_v44, %v1584_v0  ;;  %3152 = vrcp.f32 %v3990_v16  ;;  %v2962_v58 = vmul.f32 -1.442695, %v1700_v21  ;;  %vm1591_vm3 = vweird.f32 %v3149_v44 }
 0x34f   :  { %v1605_v4 = vmul.f32 %v3151_v29, %v1603_v1  ;;  %3154 = vpow2.f32 %v2961_v27  ;;  %vm1610_vm4 = vweird.f32 %v3151_v29  ;;  %vm1592_vm10 = vmor %vm1590_vm7, %vm1591_vm3  ;;  %v1635_v42 = vand.u32 2147483648, %v3990_v16 }
 0x350   :  { %v1587_v15 = vsub.f32 1.0, %v1586_v30  ;;  %3156 = vtanh.f32 %v1553_v23  ;;  %vm1611_vm12 = vmor %vm1609_vm6, %vm1610_vm4  ;;  %vm1629_vm15 = vweird.f32 %v3990_v16 }
 0x351   :  { %v1606_v45 = vsub.f32 1.0, %v1605_v4  ;;  %3158 = vpow2.f32 %v2962_v58  ;;  %v1724_v37 = vpop.f32.mrf.mxu2  ;;  %v1636_v1 = vor.u32 1.1754944e-38, %v1635_v42  ;;  %v1881_v42 = vld [vmem:[#allocation2 + $0x2a] sm:$0x3] }
 0x352   :  { %v1588_v41 = vmul.f32 %v3149_v44, %v1587_v15  ;;  %v1751_v35 = vpop.f32.mrf.mxu3  ;;  %v1727_v34 = vadd.f32 %v1724_v37, %v1702_v14 }
 0x353   :  { %v1607_v33 = vmul.f32 %v3151_v29, %v1606_v45  ;;  %v1754_v49 = vadd.f32 %v1751_v35, %v1729_v39 }
 0x354   :  { %v3153_v55 = vpop.eup %3152  ;;  %v1589_v32 = vadd.f32 %v3149_v44, %v1588_v41 }
 0x355   :  { %v3155_v40 = vpop.eup %3154  ;;  %v1608_v53 = vadd.f32 %v3151_v29, %v1607_v33  ;;  %v1625_v47 = vmul.f32 %v3153_v55, %v3990_v16  ;;  %v2963_v19 = vmul.f32 -1.442695, %v1754_v49  ;;  %vm1630_vm14 = vweird.f32 %v3153_v55 }
 0x356   :  { %v1593_v20 = vsel %vm1592_vm10, %v3149_v44, %v1589_v32  ;;  %v1758_v48 = vadd.f32 1.0, %v3155_v40  ;;  %v3157_v18 = vpop.eup %3156  ;;  %vm4001_vm0 = vmor %vm1629_vm15, %vm1630_vm14 }
 0x357   :  { %v1598_v22 = vsel %vm1595_vm8, %v1597_v11, %v1593_v20  ;;  %v1612_v24 = vsel %vm1611_vm12, %v3151_v29, %v1608_v53  ;;  %v1626_v25 = vsub.f32 1.0, %v1625_v47  ;;  %3160 = vpow2.f32 %v2963_v19  ;;  %v3159_v26 = vpop.eup %3158  ;;  %v1824_v20 = vld [vmem:[#allocation2 + $0xa] sm:$0x3] }
 0x358   :  { %v1617_v31 = vsel %vm1614_vm13, %v1616_v3, %v1612_v24  ;;  %v1640_v62 = vmul.f32 %v3157_v18, %v1598_v22  ;;  %3162 = vrcp.f32 %v1758_v48  ;;  %v1777_v60 = vadd.f32 1.0, %v3159_v26 }
 0x359   :  { %v1639_v54 = vmul.f32 %v1617_v31, %v3916_v36  ;;  %v1627_v57 = vmul.f32 %v3153_v55, %v1626_v25  ;;  %v1633_v36 = vand.u32 2147483647, %v3990_v16  ;;  %v1770_v12 = vand.u32 2147483648, %v1758_v48 }
 0x35a   :  { %3164 = vrcp.f32 %v1777_v60  ;;  %v1768_v9 = vand.u32 2147483647, %v1758_v48  ;;  %v1789_v21 = vand.u32 2147483648, %v1777_v60  ;;  %vm1764_vm3 = vweird.f32 %v1758_v48 }
 0x35b   :  { %v3995_v61 = vadd.f32 %v1640_v62, %v1639_v54  ;;  %v1628_v38 = vadd.f32 %v3153_v55, %v1627_v57  ;;  %vm1634_vm1 = vcmp.eq.f32.partialorder %v1633_v36, 8.507059e+37  ;;  %v1771_v29 = vor.u32 1.1754944e-38, %v1770_v12  ;;  %v1908_v62 = vld [vmem:[#allocation2 + $0x3a] sm:$0x3]  ;;  %v2028_v12 = vld [vmem:[#allocation2 + $0x54] sm:$0x3] }
 0x35c   :  { %v1787_v30 = vand.u32 2147483647, %v1777_v60  ;;  %vm1769_vm7 = vcmp.eq.f32.partialorder %v1768_v9, 8.507059e+37  ;;  %vm1783_vm8 = vweird.f32 %v1777_v60  ;;  %v1790_v45 = vor.u32 1.1754944e-38, %v1789_v21  ;;  %v4055_v21 = vld [vmem:[#allocation5 + $0x50] sm:$0xff] }
 0x35d   :  { %v3161_v63 = vpop.eup %3160  ;;  %3166 = vtanh.f32 %v3995_v61  ;;  %v1632_v52 = vsel %vm4001_vm0, %v3153_v55, %v1628_v38 }
 0x35e   :  { %v3163_v43 = vpop.eup %3162  ;;  %v1797_v46 = vadd.f32 1.0, %v3161_v63  ;;  %v1637_v8 = vsel %vm1634_vm1, %v1636_v1, %v1632_v52  ;;  %vm1788_vm12 = vcmp.eq.f32.partialorder %v1787_v30, 8.507059e+37  ;;  %v4031_v52 = vld [vmem:[#allocation5 + $0x18] sm:$0xff] }
 0x35f   :  { %v1760_v51 = vmul.f32 %v3163_v43, %v1758_v48  ;;  %vm1765_vm2 = vweird.f32 %v3163_v43  ;;  %v1854_v48 = vld [vmem:[#allocation2 + $0x1a] sm:$0x3] }
 0x360   :  { %3168 = vrcp.f32 %v1797_v46  ;;  %v3165_v0 = vpop.eup %3164  ;;  %vm1766_vm6 = vmor %vm1764_vm3, %vm1765_vm2  ;;  %v1809_v32 = vand.u32 2147483648, %v1797_v46  ;;  %vm1803_vm14 = vweird.f32 %v1797_v46  ;;  %v1807_v40 = vand.u32 2147483647, %v1797_v46  ;;  %v4035_v1 = vld [vmem:[#allocation5 + $0x58] sm:$0xff] }
 0x361   :  { %v1761_v5 = vsub.f32 1.0, %v1760_v51  ;;  %v1779_v6 = vmul.f32 %v3165_v0, %v1777_v60  ;;  %3170 = vtanh.f32 %v1727_v34  ;;  %vm1784_vm4 = vweird.f32 %v3165_v0  ;;  %v1999_v34 = vld [vmem:[#allocation2 + $0x44] sm:$0x3] }
 0x362   :  { %vm1785_vm10 = vmor %vm1783_vm8, %vm1784_vm4  ;;  %v1810_v53 = vor.u32 1.1754944e-38, %v1809_v32  ;;  %vm1808_vm0 = vcmp.eq.f32.partialorder %v1807_v40, 8.507059e+37  ;;  %v4089_v32 = vld [vmem:[#allocation5] sm:$0xff] }
 0x363   :  { %v3167_v13 = vpop.eup %3166  ;;  %v1762_v28 = vmul.f32 %v3163_v43, %v1761_v5  ;;  %v1780_v2 = vsub.f32 1.0, %v1779_v6  ;;  %v4091_v40 = vld [vmem:[#allocation5 + $0x20] sm:$0xff] }
 0x364   :  { %v1643_v16 = vmul.f32 %v3167_v13, %v1637_v8 }
 0x365   :  { %v1763_v44 = vadd.f32 %v3163_v43, %v1762_v28  ;;  %v1781_v27 = vmul.f32 %v3165_v0, %v1780_v2  ;;  %v4041_v28 = vld [vmem:[#allocation5 + $0x78] sm:$0xff]  ;;  %v4051_v2 = vld [vmem:[#allocation5 + $0x10] sm:$0xff] }
 0x366   :  { %v3169_v23 = vpop.eup %3168  ;;  %2964 = vmatmul.msk.f32.vlgmr.msra.gmra.mxu0 %vm49_vm9, %v1643_v16  ;;  %2965 = vmatmul.msk.f32.vlgmr.msra.gmra.mxu1 %vm49_vm9, %v1643_v16  ;;  %1644 = vst.msk [vmem:[#allocation7 + $0x8] sm:$0x3] %vm221_vm5, %v1643_v16 }
 0x367   :  { %v1767_v4 = vsel %vm1766_vm6, %v3163_v43, %v1763_v44  ;;  %v1799_v39 = vmul.f32 %v3169_v23, %v1797_v46  ;;  %2966 = vmatmul.msk.f32.vlgmr.msra.gmra.mxu2 %vm49_vm9, %v1643_v16  ;;  %2967 = vmatmul.msk.f32.vlgmr.msra.gmra.mxu3 %vm49_vm9, %v1643_v16  ;;  %v3171_v15 = vpop.eup %3170  ;;  %v1782_v58 = vadd.f32 %v3165_v0, %v1781_v27  ;;  %vm1804_vm13 = vweird.f32 %v3169_v23  ;;  %v4053_v16 = vld [vmem:[#allocation5 + $0x30] sm:$0xff] }
 0x368   :  { %v1772_v10 = vsel %vm1769_vm7, %v1771_v29, %v1767_v4  ;;  %vm1805_vm15 = vmor %vm1803_vm14, %vm1804_vm13  ;;  %2197 = vmatpush.msra.mxu0 %v4031_v52  ;;  %2251 = vmatpush.msra.mxu2 %v4035_v1  ;;  %v4061_v27 = vld [vmem:[#allocation5 + $0x70] sm:$0xff] }
 0x369   :  { %v1800_v59 = vsub.f32 1.0, %v1799_v39  ;;  %v1786_v56 = vsel %vm1785_vm10, %v3165_v0, %v1782_v58  ;;  %v1814_v41 = vmul.f32 %v3171_v15, %v1772_v10  ;;  %v4033_v0 = vld [vmem:[#allocation5 + $0x38] sm:$0xff]  ;;  %2278 = vmatpush.msra.mxu3 %v4041_v28  ;;  %v2082_v39 = vld [vmem:[#allocation2 + $0x74] sm:$0x3]  ;;  %v4067_v15 = vld [vmem:[#allocation5 + $0x8] sm:$0xff] }
 0x36a   :  { %v1791_v7 = vsel %vm1788_vm12, %v1790_v45, %v1786_v56  ;;  %2224 = vmatpush.msra.mxu1 %v4033_v0  ;;  %2198 = vmatpush.msra.mxu0 %v4051_v2  ;;  %v4069_v10 = vld [vmem:[#allocation5 + $0x28] sm:$0xff] }
 0x36b   :  { %v1801_v35 = vmul.f32 %v3169_v23, %v1800_v59  ;;  %v1813_v33 = vmul.f32 %v1791_v7, %v3954_v17  ;;  %2252 = vmatpush.msra.mxu2 %v4055_v21  ;;  %2279 = vmatpush.msra.mxu3 %v4061_v27  ;;  %v4083_v7 = vld [vmem:[#allocation5 + $0x68] sm:$0xff] }
 0x36c   :  { %2225 = vmatpush.msra.mxu1 %v4053_v16  ;;  %2199 = vmatpush.msra.mxu0 %v4067_v15 }
 0x36d   :  { %v4014_v49 = vadd.f32 %v1814_v41, %v1813_v33  ;;  %v1802_v55 = vadd.f32 %v3169_v23, %v1801_v35  ;;  %v4081_v41 = vld [vmem:[#allocation5 + $0x48] sm:$0xff]  ;;  %2280 = vmatpush.msra.mxu3 %v4083_v7 }
 0x36e   :  { %2226 = vmatpush.msra.mxu1 %v4069_v10  ;;  %2253 = vmatpush.msra.mxu2 %v4081_v41 }
 0x36f   :  { %3172 = vtanh.f32 %v4014_v49  ;;  %v1806_v11 = vsel %vm1805_vm15, %v3169_v23, %v1802_v55  ;;  %2200 = vmatpush.msra.mxu0 %v4089_v32 }
 0x370   :  { %v1811_v19 = vsel %vm1808_vm0, %v1810_v53, %v1806_v11  ;;  %v4093_v11 = vld [vmem:[#allocation5 + $0x40] sm:$0xff]  ;;  %2227 = vmatpush.msra.mxu1 %v4091_v40 }
 0x371   :  { %2254 = vmatpush.msra.mxu2 %v4093_v11 }
 0x375   :  { %v3173_v47 = vpop.eup %3172 }
 0x376   :  { %v1817_v3 = vmul.f32 %v3173_v47, %v1811_v19  ;;  %v4099_v47 = vld [vmem:[#allocation5 + $0x60] sm:$0xff]  ;;  %v4101_v19 = vld [vmem:[#allocation5 + $0x98] sm:$0xff] }
 0x377   :  { %2281 = vmatpush.msra.mxu3 %v4099_v47 }
 0x378   :  { %1819 = vrot.lane.b32.xlu2 %v1817_v3, %s3349_s17  ;;  %2971 = vmatmul.msk.f32.vlgmr.msrb.gmra.mxu0 %vm49_vm9, %v1817_v3 }
 0x379   :  { %2972 = vmatmul.msk.f32.vlgmr.msrb.gmra.mxu1 %vm49_vm9, %v1817_v3  ;;  %2973 = vmatmul.msk.f32.vlgmr.msrb.gmra.mxu2 %vm49_vm9, %v1817_v3 }
 0x37a   :  { %2974 = vmatmul.msk.f32.vlgmr.msrb.gmra.mxu3 %vm49_vm9, %v1817_v3  ;;  %v4103_v3 = vld [vmem:[#allocation5 + $0xb8] sm:$0xff]  ;;  %2371 = vmatpush.msrb.mxu0 %v4101_v19 }
 0x37b   :  { %2398 = vmatpush.msrb.mxu1 %v4103_v3 }
 0x3d2   :  { %v1820_v17 = vpop.permute.xlu2 %1819 }
 0x3d3   :  { %1822 = vst.msk [vmem:[#allocation7 + $0x6] sm:$0x3] %vm403_vm11, %v1820_v17 }
 0x3e3   :  { %v1849_v18 = vpop.f32.mrf.mxu0  ;;  %v1876_v22 = vpop.f32.mrf.mxu1 }
 0x3e4   :  { %v1852_v24 = vadd.f32 %v1849_v18, %v1824_v20  ;;  %v1879_v25 = vadd.f32 %v1876_v22, %v1854_v48  ;;  %v4111_v18 = vld [vmem:[#allocation5 + $0xd8] sm:$0xff] }
 0x3e5   :  { %v4113_v22 = vld [vmem:[#allocation5 + $0xf8] sm:$0xff]  ;;  %2425 = vmatpush.msrb.mxu2 %v4111_v18 }
 0x3e6   :  { %v2968_v26 = vmul.f32 -1.442695, %v1852_v24  ;;  %v2969_v31 = vmul.f32 -1.442695, %v1879_v25  ;;  %v4115_v24 = vld [vmem:[#allocation5 + $0x90] sm:$0xff]  ;;  %2452 = vmatpush.msrb.mxu3 %v4113_v22 }
 0x3e7   :  { %2372 = vmatpush.msrb.mxu0 %v4115_v24 }
 0x3e8   :  { %3174 = vpow2.f32 %v2968_v26 }
 0x3e9   :  { %3176 = vpow2.f32 %v2969_v31 }
 0x3ea   :  { %v1930_v54 = vpop.f32.mrf.mxu3  ;;  %v1903_v43 = vpop.f32.mrf.mxu2 }
 0x3eb   :  { %v1933_v57 = vadd.f32 %v1930_v54, %v1908_v62  ;;  %v1906_v36 = vadd.f32 %v1903_v43, %v1881_v42  ;;  %v4141_v43 = vld [vmem:[#allocation5 + $0x88] sm:$0xff] }
 0x3ec   :  { %2373 = vmatpush.msrb.mxu0 %v4141_v43 }
 0x3ed   :  { %v2970_v60 = vmul.f32 -1.442695, %v1933_v57  ;;  %v4122_v57 = vld [vmem:[#allocation5 + $0xb0] sm:$0xff] }
 0x3ee   :  { %v3175_v14 = vpop.eup %3174  ;;  %2399 = vmatpush.msrb.mxu1 %v4122_v57 }
 0x3ef   :  { %v3177_v37 = vpop.eup %3176  ;;  %v4023_v38 = vadd.f32 1.0, %v3175_v14  ;;  %3178 = vpow2.f32 %v2970_v60  ;;  %v4124_v60 = vld [vmem:[#allocation5 + $0xd0] sm:$0xff] }
 0x3f0   :  { %v4025_v63 = vadd.f32 1.0, %v3177_v37  ;;  %v4126_v14 = vld [vmem:[#allocation5 + $0xf0] sm:$0xff]  ;;  %2426 = vmatpush.msrb.mxu2 %v4124_v60 }
 0x3f1   :  { %3180 = vrcp.f32 %v4023_v38  ;;  %vm1943_vm2 = vweird.f32 %v4023_v38  ;;  %v1947_v30 = vand.u32 2147483647, %v4023_v38  ;;  %v1949_v59 = vand.u32 2147483648, %v4023_v38  ;;  %2453 = vmatpush.msrb.mxu3 %v4126_v14 }
 0x3f2   :  { %3182 = vrcp.f32 %v4025_v63  ;;  %v1966_v56 = vand.u32 2147483647, %v4025_v63  ;;  %v1968_v35 = vand.u32 2147483648, %v4025_v63  ;;  %vm1962_vm6 = vweird.f32 %v4025_v63 }
 0x3f3   :  { %v1950_v26 = vor.u32 1.1754944e-38, %v1949_v59  ;;  %vm1948_vm8 = vcmp.eq.f32.partialorder %v1947_v30, 8.507059e+37 }
 0x3f4   :  { %vm1967_vm10 = vcmp.eq.f32.partialorder %v1966_v56, 8.507059e+37 }
 0x3f5   :  { %v3179_v46 = vpop.eup %3178  ;;  %v2023_v51 = vpop.f32.mrf.mxu0 }
 0x3f6   :  { %v4029_v50 = vadd.f32 1.0, %v3179_v46  ;;  %v2026_v6 = vadd.f32 %v2023_v51, %v1999_v34  ;;  %v2050_v13 = vpop.f32.mrf.mxu1  ;;  %v4143_v34 = vld [vmem:[#allocation5 + $0xa8] sm:$0xff] }
 0x3f7   :  { %v4037_v5 = vpop.eup %3180  ;;  %v2053_v4 = vadd.f32 %v2050_v13, %v2028_v12  ;;  %v4152_v12 = vld [vmem:[#allocation5 + $0xe8] sm:$0xff]  ;;  %2400 = vmatpush.msrb.mxu1 %v4143_v34 }
 0x3f8   :  { %v4043_v9 = vpop.eup %3182  ;;  %v1939_v8 = vmul.f32 %v4037_v5, %v4023_v38  ;;  %vm1944_vm1 = vweird.f32 %v4037_v5  ;;  %3184 = vrcp.f32 %v4029_v50  ;;  %v2975_v23 = vmul.f32 -1.442695, %v2026_v6  ;;  %2454 = vmatpush.msrb.mxu3 %v4152_v12 }
 0x3f9   :  { %v1958_v44 = vmul.f32 %v4043_v9, %v4025_v63  ;;  %3186 = vtanh.f32 %v1906_v36  ;;  %vm4073_vm3 = vmor %vm1943_vm2, %vm1944_vm1  ;;  %v2976_v55 = vmul.f32 -1.442695, %v2053_v4  ;;  %vm1963_vm4 = vweird.f32 %v4043_v9  ;;  %v4166_v4 = vld [vmem:[#allocation5 + $0xc0] sm:$0xff] }
 0x3fa   :  { %v1940_v29 = vsub.f32 1.0, %v1939_v8  ;;  %3188 = vpow2.f32 %v2975_v23  ;;  %vm4132_vm7 = vmor %vm1962_vm6, %vm1963_vm4  ;;  %v1969_v38 = vor.u32 1.1754944e-38, %v1968_v35  ;;  %v4158_v23 = vld [vmem:[#allocation5 + $0x80] sm:$0xff]  ;;  %v1988_v56 = vand.u32 2147483648, %v4029_v50 }
 0x3fb   :  { %v1959_v58 = vsub.f32 1.0, %v1958_v44  ;;  %3190 = vpow2.f32 %v2976_v55  ;;  %2374 = vmatpush.msrb.mxu0 %v4158_v23  ;;  %vm1982_vm13 = vweird.f32 %v4029_v50  ;;  %v1986_v35 = vand.u32 2147483647, %v4029_v50  ;;  %v2055_v55 = vld [vmem:[#allocation2 + $0x64] sm:$0x3] }
 0x3fc   :  { %v1941_v33 = vmul.f32 %v4037_v5, %v1940_v29 }
 0x3fd   :  { %v1960_v53 = vmul.f32 %v4043_v9, %v1959_v58  ;;  %v2104_v48 = vpop.f32.mrf.mxu3  ;;  %vm1987_vm15 = vcmp.eq.f32.partialorder %v1986_v35, 8.507059e+37 }
 0x3fe   :  { %v4105_v17 = vpop.eup %3184  ;;  %v1942_v20 = vadd.f32 %v4037_v5, %v1941_v33  ;;  %v2107_v54 = vadd.f32 %v2104_v48, %v2082_v39  ;;  %v4168_v39 = vld [vmem:[#allocation5 + $0xe0] sm:$0xff] }
 0x3ff   :  { %v3187_v25 = vpop.eup %3186  ;;  %v1961_v31 = vadd.f32 %v4043_v9, %v1960_v53  ;;  %v1978_v62 = vmul.f32 %v4105_v17, %v4029_v50  ;;  %vm1983_vm12 = vweird.f32 %v4105_v17  ;;  %2455 = vmatpush.msrb.mxu3 %v4168_v39  ;;  %v2077_v53 = vpop.f32.mrf.mxu2 }
 0x400   :  { %v1946_v42 = vsel %vm4073_vm3, %v4037_v5, %v1942_v20  ;;  %v3189_v63 = vpop.eup %3188  ;;  %v2977_v6 = vmul.f32 -1.442695, %v2107_v54  ;;  %v4150_v5 = vld [vmem:[#allocation5 + $0xc8] sm:$0xff]  ;;  %vm1984_vm14 = vmor %vm1982_vm13, %vm1983_vm12 }
 0x401   :  { %v1951_v46 = vsel %vm1948_vm8, %v1950_v26, %v1946_v42  ;;  %v1965_v36 = vsel %vm4132_vm7, %v4043_v9, %v1961_v31  ;;  %v1979_v51 = vsub.f32 1.0, %v1978_v62  ;;  %v4154_v44 = vadd.f32 1.0, %v3189_v63  ;;  %v4160_v9 = vld [vmem:[#allocation5 + $0xa0] sm:$0xff]  ;;  %v3191_v58 = vpop.eup %3190  ;;  %2427 = vmatpush.msrb.mxu2 %v4150_v5 }
 0x402   :  { %v1970_v13 = vsel %vm1967_vm10, %v1969_v38, %v1965_v36  ;;  %v1993_v8 = vmul.f32 %v3187_v25, %v1951_v46  ;;  %3192 = vpow2.f32 %v2977_v6  ;;  %2401 = vmatpush.msrb.mxu1 %v4160_v9  ;;  %v1989_v26 = vor.u32 1.1754944e-38, %v1988_v56 }
 0x403   :  { %v1992_v29 = vmul.f32 %v1970_v13, %v3995_v61  ;;  %v1980_v30 = vmul.f32 %v4105_v17, %v1979_v51  ;;  %3194 = vrcp.f32 %v4154_v44  ;;  %v4175_v61 = vadd.f32 1.0, %v3191_v58  ;;  %2428 = vmatpush.msrb.mxu2 %v4166_v4 }
 0x404   :  { %v2080_v62 = vadd.f32 %v2077_v53, %v2055_v55  ;;  %v2121_v42 = vand.u32 2147483647, %v4154_v44  ;;  %v2123_v63 = vand.u32 2147483648, %v4154_v44  ;;  %vm2117_vm1 = vweird.f32 %v4154_v44 }
 0x405   :  { %v4173_v45 = vadd.f32 %v1993_v8, %v1992_v29  ;;  %v1981_v59 = vadd.f32 %v4105_v17, %v1980_v30  ;;  %v2142_v8 = vand.u32 2147483648, %v4175_v61  ;;  %v2140_v30 = vand.u32 2147483647, %v4175_v61 }
 0x406   :  { %vm2122_vm3 = vcmp.eq.f32.partialorder %v2121_v42, 8.507059e+37  ;;  %v2124_v29 = vor.u32 1.1754944e-38, %v2123_v63  ;;  %vm2136_vm6 = vweird.f32 %v4175_v61 }
 0x407   :  { %3196 = vtanh.f32 %v4173_v45  ;;  %v1985_v25 = vsel %vm1984_vm14, %v4105_v17, %v1981_v59  ;;  %vm2141_vm8 = vcmp.eq.f32.partialorder %v2140_v30, 8.507059e+37 }
 0x408   :  { %3198 = vrcp.f32 %v4175_v61  ;;  %v3193_v33 = vpop.eup %3192  ;;  %v1990_v38 = vsel %vm1987_vm15, %v1989_v26, %v1985_v25  ;;  %v2352_v26 = vld [vmem:[#allocation2 + $0x42] sm:$0x3] }
 0x409   :  { %v3195_v20 = vpop.eup %3194  ;;  %v4188_v48 = vadd.f32 1.0, %v3193_v33  ;;  %v2143_v33 = vor.u32 1.1754944e-38, %v2142_v8 }
 0x40a   :  { %v2113_v31 = vmul.f32 %v3195_v20, %v4154_v44  ;;  %vm2118_vm0 = vweird.f32 %v3195_v20 }
 0x40b   :  { %3200 = vrcp.f32 %v4188_v48  ;;  %vm2119_vm2 = vmor %vm2117_vm1, %vm2118_vm0  ;;  %vm2156_vm12 = vweird.f32 %v4188_v48 }
 0x40c   :  { %v2114_v37 = vsub.f32 1.0, %v2113_v31  ;;  %3202 = vtanh.f32 %v2080_v62 }
 0x40d   :  { %v3197_v54 = vpop.eup %3196 }
 0x40e   :  { %v3199_v50 = vpop.eup %3198  ;;  %v1996_v46 = vmul.f32 %v3197_v54, %v1990_v38  ;;  %v2115_v51 = vmul.f32 %v3195_v20, %v2114_v37  ;;  %v2381_v54 = vld [vmem:[#allocation2 + $0x52] sm:$0x3] }
 0x40f   :  { %v2132_v36 = vmul.f32 %v3199_v50, %v4175_v61  ;;  %vm2137_vm4 = vweird.f32 %v3199_v50  ;;  %v2234_v61 = vld [vmem:[#allocation2 + $0x2c] sm:$0x3] }
 0x410   :  { %1997 = vst.msk [vmem:[#allocation7 + $0xa] sm:$0x3] %vm221_vm5, %v1996_v46  ;;  %2978 = vmatmul.msk.f32.vlgmr.msra.gmra.mxu0 %vm49_vm9, %v1996_v46  ;;  %2979 = vmatmul.msk.f32.vlgmr.msra.gmra.mxu1 %vm49_vm9, %v1996_v46  ;;  %v2116_v6 = vadd.f32 %v3195_v20, %v2115_v51  ;;  %vm2138_vm7 = vmor %vm2136_vm6, %vm2137_vm4 }
 0x411   :  { %v2133_v17 = vsub.f32 1.0, %v2132_v36  ;;  %2980 = vmatmul.msk.f32.vlgmr.msra.gmra.mxu2 %vm49_vm9, %v1996_v46  ;;  %2981 = vmatmul.msk.f32.vlgmr.msra.gmra.mxu3 %vm49_vm9, %v1996_v46  ;;  %v3201_v13 = vpop.eup %3200 }
 0x412   :  { %2550 = vmatpush.msra.mxu0 %v4031_v52  ;;  %2577 = vmatpush.msra.mxu1 %v4033_v0  ;;  %v2120_v59 = vsel %vm2119_vm2, %v3195_v20, %v2116_v6  ;;  %v2152_v44 = vmul.f32 %v3201_v13, %v4188_v48  ;;  %v3203_v0 = vpop.eup %3202  ;;  %vm2157_vm10 = vweird.f32 %v3201_v13 }
 0x413   :  { %v2134_v58 = vmul.f32 %v3199_v50, %v2133_v17  ;;  %2604 = vmatpush.msra.mxu2 %v4035_v1  ;;  %2631 = vmatpush.msra.mxu3 %v4041_v28  ;;  %v2125_v56 = vsel %vm2122_vm3, %v2124_v29, %v2120_v59  ;;  %vm2158_vm13 = vmor %vm2156_vm12, %vm2157_vm10 }
 0x414   :  { %2551 = vmatpush.msra.mxu0 %v4051_v2  ;;  %2578 = vmatpush.msra.mxu1 %v4053_v16  ;;  %v2153_v52 = vsub.f32 1.0, %v2152_v44  ;;  %v2167_v28 = vmul.f32 %v3203_v0, %v2125_v56  ;;  %v2435_v0 = vld [vmem:[#allocation2 + $0x72] sm:$0x3] }
 0x415   :  { %v2135_v35 = vadd.f32 %v3199_v50, %v2134_v58  ;;  %2605 = vmatpush.msra.mxu2 %v4055_v21  ;;  %2632 = vmatpush.msra.mxu3 %v4061_v27 }
 0x416   :  { %2552 = vmatpush.msra.mxu0 %v4067_v15  ;;  %2579 = vmatpush.msra.mxu1 %v4069_v10  ;;  %v2154_v16 = vmul.f32 %v3201_v13, %v2153_v52  ;;  %v2162_v10 = vand.u32 2147483648, %v4188_v48 }
 0x417   :  { %v2139_v1 = vsel %vm2138_vm7, %v3199_v50, %v2135_v35  ;;  %2606 = vmatpush.msra.mxu2 %v4081_v41  ;;  %2633 = vmatpush.msra.mxu3 %v4083_v7  ;;  %v2160_v41 = vand.u32 2147483647, %v4188_v48 }
 0x418   :  { %v2144_v2 = vsel %vm2141_vm8, %v2143_v33, %v2139_v1  ;;  %2553 = vmatpush.msra.mxu0 %v4089_v32  ;;  %2580 = vmatpush.msra.mxu1 %v4091_v40  ;;  %v2155_v15 = vadd.f32 %v3201_v13, %v2154_v16  ;;  %v2163_v32 = vor.u32 1.1754944e-38, %v2162_v10 }
 0x419   :  { %v2166_v21 = vmul.f32 %v2144_v2, %v4014_v49  ;;  %2607 = vmatpush.msra.mxu2 %v4093_v11  ;;  %2634 = vmatpush.msra.mxu3 %v4099_v47  ;;  %vm2161_vm14 = vcmp.eq.f32.partialorder %v2160_v41, 8.507059e+37 }
 0x41a   :  { %v2159_v7 = vsel %vm2158_vm13, %v3201_v13, %v2155_v15 }
 0x41b   :  { %v4223_v27 = vadd.f32 %v2167_v28, %v2166_v21  ;;  %v2164_v40 = vsel %vm2161_vm14, %v2163_v32, %v2159_v7 }
 0x41d   :  { %3204 = vtanh.f32 %v4223_v27 }
 0x423   :  { %v3205_v49 = vpop.eup %3204 }
 0x424   :  { %v2170_v11 = vmul.f32 %v3205_v49, %v2164_v40 }
 0x426   :  { %2172 = vrot.lane.b32.xlu2 %v2170_v11, %s3349_s17  ;;  %2985 = vmatmul.msk.f32.vlgmr.msrb.gmra.mxu0 %vm49_vm9, %v2170_v11 }
 0x427   :  { %2986 = vmatmul.msk.f32.vlgmr.msrb.gmra.mxu1 %vm49_vm9, %v2170_v11  ;;  %2987 = vmatmul.msk.f32.vlgmr.msrb.gmra.mxu2 %vm49_vm9, %v2170_v11 }
 0x428   :  { %2988 = vmatmul.msk.f32.vlgmr.msrb.gmra.mxu3 %vm49_vm9, %v2170_v11  ;;  %2724 = vmatpush.msrb.mxu0 %v4101_v19  ;;  %v2177_v19 = vld [vmem:[#allocation2 + $0xc] sm:$0x3] }
 0x429   :  { %2751 = vmatpush.msrb.mxu1 %v4103_v3  ;;  %2778 = vmatpush.msrb.mxu2 %v4111_v18  ;;  %v2207_v3 = vld [vmem:[#allocation2 + $0x1c] sm:$0x3] }
 0x42a   :  { %2805 = vmatpush.msrb.mxu3 %v4113_v22  ;;  %2725 = vmatpush.msrb.mxu0 %v4115_v24 }
 0x42b   :  { %2752 = vmatpush.msrb.mxu1 %v4122_v57  ;;  %2779 = vmatpush.msrb.mxu2 %v4124_v60 }
 0x42c   :  { %2806 = vmatpush.msrb.mxu3 %v4126_v14  ;;  %2726 = vmatpush.msrb.mxu0 %v4141_v43  ;;  %v2261_v43 = vld [vmem:[#allocation2 + $0x3c] sm:$0x3] }
 0x42d   :  { %2753 = vmatpush.msrb.mxu1 %v4143_v34  ;;  %2780 = vmatpush.msrb.mxu2 %v4150_v5 }
 0x42e   :  { %2807 = vmatpush.msrb.mxu3 %v4152_v12  ;;  %2727 = vmatpush.msrb.mxu0 %v4158_v23 }
 0x42f   :  { %2754 = vmatpush.msrb.mxu1 %v4160_v9  ;;  %2781 = vmatpush.msrb.mxu2 %v4166_v4 }
 0x430   :  { %2808 = vmatpush.msrb.mxu3 %v4168_v39 }
 0x480   :  { %v2173_v47 = vpop.permute.xlu2 %2172 }
 0x481   :  { %2175 = vst.msk [vmem:[#allocation7 + $0x4] sm:$0x3] %vm403_vm11, %v2173_v47 }
 0x48d   :  { %v2202_v18 = vpop.f32.mrf.mxu0  ;;  %v2229_v22 = vpop.f32.mrf.mxu1 }
 0x48e   :  { %v2205_v24 = vadd.f32 %v2202_v18, %v2177_v19  ;;  %v2232_v57 = vadd.f32 %v2229_v22, %v2207_v3 }
 0x490   :  { %v2982_v60 = vmul.f32 -1.442695, %v2205_v24  ;;  %v2983_v14 = vmul.f32 -1.442695, %v2232_v57 }
 0x492   :  { %3206 = vpow2.f32 %v2982_v60 }
 0x493   :  { %3208 = vpow2.f32 %v2983_v14  ;;  %v2408_v14 = vld [vmem:[#allocation2 + $0x62] sm:$0x3] }
 0x494   :  { %v2283_v34 = vpop.f32.mrf.mxu3  ;;  %v2256_v55 = vpop.f32.mrf.mxu2 }
 0x495   :  { %v2286_v5 = vadd.f32 %v2283_v34, %v2261_v43  ;;  %v2259_v20 = vadd.f32 %v2256_v55, %v2234_v61 }
 0x497   :  { %v2984_v12 = vmul.f32 -1.442695, %v2286_v5 }
 0x498   :  { %v3207_v23 = vpop.eup %3206 }
 0x499   :  { %v3209_v9 = vpop.eup %3208  ;;  %v2290_v4 = vadd.f32 1.0, %v3207_v23  ;;  %3210 = vpow2.f32 %v2984_v12 }
 0x49a   :  { %v2309_v39 = vadd.f32 1.0, %v3209_v9 }
 0x49b   :  { %3212 = vrcp.f32 %v2290_v4  ;;  %v2300_v36 = vand.u32 2147483647, %v2290_v4  ;;  %v2302_v51 = vand.u32 2147483648, %v2290_v4  ;;  %vm2296_vm2 = vweird.f32 %v2290_v4 }
 0x49c   :  { %3214 = vrcp.f32 %v2309_v39  ;;  %v2321_v6 = vand.u32 2147483648, %v2309_v39  ;;  %v2319_v30 = vand.u32 2147483647, %v2309_v39  ;;  %vm2315_vm1 = vweird.f32 %v2309_v39 }
 0x49d   :  { %v2303_v56 = vor.u32 1.1754944e-38, %v2302_v51  ;;  %vm2301_vm6 = vcmp.eq.f32.partialorder %v2300_v36, 8.507059e+37 }
 0x49e   :  { %v2322_v1 = vor.u32 1.1754944e-38, %v2321_v6  ;;  %vm2320_vm7 = vcmp.eq.f32.partialorder %v2319_v30, 8.507059e+37 }
 0x49f   :  { %v3211_v53 = vpop.eup %3210 }
 0x4a0   :  { %v4251_v48 = vadd.f32 1.0, %v3211_v53 }
 0x4a1   :  { %v3213_v25 = vpop.eup %3212 }
 0x4a2   :  { %v3215_v31 = vpop.eup %3214  ;;  %v2292_v62 = vmul.f32 %v3213_v25, %v2290_v4  ;;  %3216 = vrcp.f32 %v4251_v48  ;;  %vm2297_vm15 = vweird.f32 %v3213_v25  ;;  %v2341_v24 = vand.u32 2147483648, %v4251_v48 }
 0x4a3   :  { %v2311_v37 = vmul.f32 %v3215_v31, %v2309_v39  ;;  %v2376_v38 = vpop.f32.mrf.mxu0  ;;  %3218 = vtanh.f32 %v2259_v20  ;;  %vm2316_vm0 = vweird.f32 %v3215_v31  ;;  %vm2298_vm3 = vmor %vm2296_vm2, %vm2297_vm15  ;;  %vm2335_vm10 = vweird.f32 %v4251_v48 }
 0x4a4   :  { %v2293_v50 = vsub.f32 1.0, %v2292_v62  ;;  %v2379_v42 = vadd.f32 %v2376_v38, %v2352_v26  ;;  %v2403_v63 = vpop.f32.mrf.mxu1  ;;  %vm2317_vm4 = vmor %vm2315_vm1, %vm2316_vm0  ;;  %v2342_v60 = vor.u32 1.1754944e-38, %v2341_v24 }
 0x4a5   :  { %v2312_v46 = vsub.f32 1.0, %v2311_v37  ;;  %v2406_v17 = vadd.f32 %v2403_v63, %v2381_v54 }
 0x4a6   :  { %v2294_v13 = vmul.f32 %v3213_v25, %v2293_v50  ;;  %v2989_v8 = vmul.f32 -1.442695, %v2379_v42 }
 0x4a7   :  { %v2313_v29 = vmul.f32 %v3215_v31, %v2312_v46  ;;  %v2990_v58 = vmul.f32 -1.442695, %v2406_v17 }
 0x4a8   :  { %v3217_v59 = vpop.eup %3216  ;;  %v2295_v44 = vadd.f32 %v3213_v25, %v2294_v13  ;;  %3220 = vpow2.f32 %v2989_v8 }
 0x4a9   :  { %v2314_v35 = vadd.f32 %v3215_v31, %v2313_v29  ;;  %v2331_v52 = vmul.f32 %v3217_v59, %v4251_v48  ;;  %3222 = vpow2.f32 %v2990_v58  ;;  %v3219_v33 = vpop.eup %3218  ;;  %vm2336_vm8 = vweird.f32 %v3217_v59 }
 0x4aa   :  { %v2299_v28 = vsel %vm2298_vm3, %v3213_v25, %v2295_v44  ;;  %vm2337_vm12 = vmor %vm2335_vm10, %vm2336_vm8  ;;  %v2430_v43 = vpop.f32.mrf.mxu2 }
 0x4ab   :  { %v2304_v2 = vsel %vm2301_vm6, %v2303_v56, %v2299_v28  ;;  %v2318_v16 = vsel %vm2317_vm4, %v3215_v31, %v2314_v35  ;;  %v2332_v21 = vsub.f32 1.0, %v2331_v52  ;;  %v2457_v15 = vpop.f32.mrf.mxu3  ;;  %v2433_v4 = vadd.f32 %v2430_v43, %v2408_v14 }
 0x4ac   :  { %v2323_v10 = vsel %vm2320_vm7, %v2322_v1, %v2318_v16  ;;  %v2346_v41 = vmul.f32 %v3219_v33, %v2304_v2  ;;  %v2460_v7 = vadd.f32 %v2457_v15, %v2435_v0  ;;  %v2560_v16 = vld [vmem:[#allocation2 + $0x1e] sm:$0x3] }
 0x4ad   :  { %v2345_v32 = vmul.f32 %v2323_v10, %v4173_v45  ;;  %v2333_v49 = vmul.f32 %v3217_v59, %v2332_v21  ;;  %v2339_v45 = vand.u32 2147483647, %v4251_v48 }
 0x4ae   :  { %v3221_v40 = vpop.eup %3220  ;;  %v2991_v11 = vmul.f32 -1.442695, %v2460_v7 }
 0x4af   :  { %v3223_v47 = vpop.eup %3222  ;;  %v4257_v19 = vadd.f32 %v2346_v41, %v2345_v32  ;;  %v2464_v3 = vadd.f32 1.0, %v3221_v40  ;;  %v2334_v22 = vadd.f32 %v3217_v59, %v2333_v49  ;;  %vm2340_vm13 = vcmp.eq.f32.partialorder %v2339_v45, 8.507059e+37  ;;  %v2614_v49 = vld [vmem:[#allocation2 + $0x3e] sm:$0x3] }
 0x4b0   :  { %v2483_v18 = vadd.f32 1.0, %v3223_v47  ;;  %3224 = vpow2.f32 %v2991_v11 }
 0x4b1   :  { %3226 = vtanh.f32 %v4257_v19  ;;  %v2338_v57 = vsel %vm2337_vm12, %v3217_v59, %v2334_v22  ;;  %v2476_v25 = vand.u32 2147483648, %v2464_v3  ;;  %v2474_v62 = vand.u32 2147483647, %v2464_v3 }
 0x4b2   :  { %3228 = vrcp.f32 %v2464_v3  ;;  %v2343_v23 = vsel %vm2340_vm13, %v2342_v60, %v2338_v57  ;;  %v2495_v26 = vand.u32 2147483648, %v2483_v18  ;;  %v2493_v37 = vand.u32 2147483647, %v2483_v18  ;;  %v2587_v57 = vld [vmem:[#allocation2 + $0x2e] sm:$0x3] }
 0x4b3   :  { %3230 = vrcp.f32 %v2483_v18  ;;  %vm2470_vm0 = vweird.f32 %v2464_v3  ;;  %vm2489_vm1 = vweird.f32 %v2483_v18  ;;  %v2477_v42 = vor.u32 1.1754944e-38, %v2476_v25 }
 0x4b4   :  { %v2496_v36 = vor.u32 1.1754944e-38, %v2495_v26  ;;  %vm2475_vm4 = vcmp.eq.f32.partialorder %v2474_v62, 8.507059e+37  ;;  %vm2494_vm6 = vcmp.eq.f32.partialorder %v2493_v37, 8.507059e+37 }
 0x4b6   :  { %v3225_v34 = vpop.eup %3224 }
 0x4b7   :  { %v3227_v5 = vpop.eup %3226  ;;  %v2503_v12 = vadd.f32 1.0, %v3225_v34 }
 0x4b8   :  { %v3229_v9 = vpop.eup %3228  ;;  %v2349_v39 = vmul.f32 %v3227_v5, %v2343_v23 }
 0x4b9   :  { %v3231_v61 = vpop.eup %3230  ;;  %v2466_v55 = vmul.f32 %v3229_v9, %v2464_v3  ;;  %3232 = vrcp.f32 %v2503_v12  ;;  %vm2471_vm14 = vweird.f32 %v3229_v9  ;;  %v2515_v35 = vand.u32 2147483648, %v2503_v12 }
 0x4ba   :  { %v2485_v53 = vmul.f32 %v3231_v61, %v2483_v18  ;;  %2350 = vst.msk [vmem:[#allocation7 + $0xc] sm:$0x3] %vm221_vm5, %v2349_v39  ;;  %2992 = vmatmul.msk.f32.vlgmr.msra.gmra.mxu0 %vm49_vm9, %v2349_v39  ;;  %2993 = vmatmul.msk.f32.vlgmr.msra.gmra.mxu1 %vm49_vm9, %v2349_v39  ;;  %3234 = vtanh.f32 %v2433_v4  ;;  %vm2490_vm15 = vweird.f32 %v3231_v61  ;;  %vm2472_vm2 = vmor %vm2470_vm0, %vm2471_vm14  ;;  %vm2509_vm8 = vweird.f32 %v2503_v12 }
 0x4bb   :  { %v2467_v20 = vsub.f32 1.0, %v2466_v55  ;;  %2994 = vmatmul.msk.f32.vlgmr.msra.gmra.mxu2 %vm49_vm9, %v2349_v39  ;;  %2995 = vmatmul.msk.f32.vlgmr.msra.gmra.mxu3 %vm49_vm9, %v2349_v39  ;;  %vm2491_vm3 = vmor %vm2489_vm1, %vm2490_vm15  ;;  %v2513_v52 = vand.u32 2147483647, %v2503_v12  ;;  %v2516_v33 = vor.u32 1.1754944e-38, %v2515_v35  ;;  %v2734_v39 = vld [vmem:[#allocation2 + $0x50] sm:$0x3] }
 0x4bc   :  { %v2486_v48 = vsub.f32 1.0, %v2485_v53 }
 0x4bd   :  { %v2468_v31 = vmul.f32 %v3229_v9, %v2467_v20  ;;  %vm2514_vm12 = vcmp.eq.f32.partialorder %v2513_v52, 8.507059e+37 }
 0x4be   :  { %v2487_v54 = vmul.f32 %v3231_v61, %v2486_v48 }
 0x4bf   :  { %v3233_v38 = vpop.eup %3232  ;;  %v2469_v50 = vadd.f32 %v3229_v9, %v2468_v31 }
 0x4c0   :  { %v2488_v63 = vadd.f32 %v3231_v61, %v2487_v54  ;;  %v2505_v46 = vmul.f32 %v3233_v38, %v2503_v12  ;;  %v3235_v17 = vpop.eup %3234  ;;  %vm2510_vm7 = vweird.f32 %v3233_v38 }
 0x4c1   :  { %v2473_v51 = vsel %vm2472_vm2, %v3229_v9, %v2469_v50  ;;  %vm2511_vm10 = vmor %vm2509_vm8, %vm2510_vm7  ;;  %v2705_v9 = vld [vmem:[#allocation2 + $0x40] sm:$0x3] }
 0x4c2   :  { %v2478_v6 = vsel %vm2475_vm4, %v2477_v42, %v2473_v51  ;;  %v2492_v13 = vsel %vm2491_vm3, %v3231_v61, %v2488_v63  ;;  %v2506_v8 = vsub.f32 1.0, %v2505_v46 }
 0x4c3   :  { %v2497_v29 = vsel %vm2494_vm6, %v2496_v36, %v2492_v13  ;;  %v2520_v30 = vmul.f32 %v3235_v17, %v2478_v6 }
 0x4c4   :  { %v2519_v58 = vmul.f32 %v2497_v29, %v4223_v27  ;;  %v2507_v59 = vmul.f32 %v3233_v38, %v2506_v8  ;;  %v2530_v27 = vld [vmem:[#allocation2 + $0xe] sm:$0x3]  ;;  %v2788_v29 = vld [vmem:[#allocation2 + $0x70] sm:$0x3] }
 0x4c6   :  { %v4269_v44 = vadd.f32 %v2520_v30, %v2519_v58  ;;  %v2508_v56 = vadd.f32 %v3233_v38, %v2507_v59 }
 0x4c8   :  { %3236 = vtanh.f32 %v4269_v44  ;;  %v2512_v0 = vsel %vm2511_vm10, %v3233_v38, %v2508_v56 }
 0x4c9   :  { %v2517_v28 = vsel %vm2514_vm12, %v2516_v33, %v2512_v0 }
 0x4ce   :  { %v3237_v1 = vpop.eup %3236 }
 0x4cf   :  { %v2523_v2 = vmul.f32 %v3237_v1, %v2517_v28 }
 0x4d1   :  { %2525 = vrot.lane.b32.xlu0 %v2523_v2, %s3349_s17  ;;  %2999 = vmatmul.msk.f32.vlgmr.msrb.gmra.mxu0 %vm49_vm9, %v2523_v2 }
 0x4d2   :  { %3000 = vmatmul.msk.f32.vlgmr.msrb.gmra.mxu1 %vm49_vm9, %v2523_v2  ;;  %3001 = vmatmul.msk.f32.vlgmr.msrb.gmra.mxu2 %vm49_vm9, %v2523_v2 }
 0x4d3   :  { %3002 = vmatmul.msk.f32.vlgmr.msrb.gmra.mxu3 %vm49_vm9, %v2523_v2 }
 0x537   :  { %v2555_v21 = vpop.f32.mrf.mxu0  ;;  %v2582_v15 = vpop.f32.mrf.mxu1 }
 0x538   :  { %v2558_v10 = vadd.f32 %v2555_v21, %v2530_v27  ;;  %v2585_v41 = vadd.f32 %v2582_v15, %v2560_v16 }
 0x53a   :  { %v2996_v7 = vmul.f32 -1.442695, %v2558_v10  ;;  %v2997_v32 = vmul.f32 -1.442695, %v2585_v41 }
 0x53c   :  { %3238 = vpow2.f32 %v2996_v7 }
 0x53d   :  { %3240 = vpow2.f32 %v2997_v32 }
 0x53e   :  { %v2636_v40 = vpop.f32.mrf.mxu3  ;;  %v2609_v60 = vpop.f32.mrf.mxu2 }
 0x53f   :  { %v2639_v11 = vadd.f32 %v2636_v40, %v2614_v49  ;;  %v2612_v43 = vadd.f32 %v2609_v60, %v2587_v57  ;;  %v2761_v49 = vld [vmem:[#allocation2 + $0x60] sm:$0x3] }
 0x541   :  { %v2998_v47 = vmul.f32 -1.442695, %v2639_v11 }
 0x542   :  { %v3239_v3 = vpop.eup %3238 }
 0x543   :  { %v3241_v18 = vpop.eup %3240  ;;  %v2526_v22 = vpop.permute.xlu0 %2525  ;;  %v2643_v24 = vadd.f32 1.0, %v3239_v3  ;;  %3242 = vpow2.f32 %v2998_v47 }
 0x544   :  { %2528 = vst.msk [vmem:[#allocation7 + $0x2] sm:$0x3] %vm403_vm11, %v2526_v22  ;;  %v2662_v45 = vadd.f32 1.0, %v3241_v18 }
 0x545   :  { %3244 = vrcp.f32 %v2643_v24  ;;  %v2653_v20 = vand.u32 2147483647, %v2643_v24  ;;  %v2655_v48 = vand.u32 2147483648, %v2643_v24  ;;  %vm2649_vm15 = vweird.f32 %v2643_v24 }
 0x546   :  { %3246 = vrcp.f32 %v2662_v45  ;;  %v2674_v31 = vand.u32 2147483648, %v2662_v45  ;;  %v2672_v38 = vand.u32 2147483647, %v2662_v45  ;;  %vm2668_vm14 = vweird.f32 %v2662_v45 }
 0x547   :  { %v2656_v36 = vor.u32 1.1754944e-38, %v2655_v48  ;;  %vm2654_vm2 = vcmp.eq.f32.partialorder %v2653_v20, 8.507059e+37 }
 0x548   :  { %v2675_v13 = vor.u32 1.1754944e-38, %v2674_v31  ;;  %vm2673_vm3 = vcmp.eq.f32.partialorder %v2672_v38, 8.507059e+37 }
 0x549   :  { %v3243_v14 = vpop.eup %3242 }
 0x54a   :  { %v4278_v34 = vadd.f32 1.0, %v3243_v14 }
 0x54b   :  { %v3245_v5 = vpop.eup %3244 }
 0x54c   :  { %v3247_v12 = vpop.eup %3246  ;;  %v2645_v23 = vmul.f32 %v3245_v5, %v2643_v24  ;;  %3248 = vrcp.f32 %v4278_v34  ;;  %vm2650_vm9 = vweird.f32 %v3245_v5  ;;  %v2694_v10 = vand.u32 2147483648, %v4278_v34 }
 0x54d   :  { %v2664_v4 = vmul.f32 %v3247_v12, %v2662_v45  ;;  %3250 = vtanh.f32 %v2612_v43  ;;  %vm2669_vm13 = vweird.f32 %v3247_v12  ;;  %vm2651_vm0 = vmor %vm2649_vm15, %vm2650_vm9  ;;  %vm2688_vm6 = vweird.f32 %v4278_v34 }
 0x54e   :  { %v2646_v61 = vsub.f32 1.0, %v2645_v23  ;;  %v2729_v55 = vpop.f32.mrf.mxu0  ;;  %vm2670_vm1 = vmor %vm2668_vm14, %vm2669_vm13  ;;  %v2692_v7 = vand.u32 2147483647, %v4278_v34  ;;  %v2695_v32 = vor.u32 1.1754944e-38, %v2694_v10 }
 0x54f   :  { %v2665_v53 = vsub.f32 1.0, %v2664_v4  ;;  %v2732_v25 = vadd.f32 %v2729_v55, %v2705_v9  ;;  %v2756_v26 = vpop.f32.mrf.mxu1 }
 0x550   :  { %v2647_v62 = vmul.f32 %v3245_v5, %v2646_v61  ;;  %v2759_v54 = vadd.f32 %v2756_v26, %v2734_v39  ;;  %vm2693_vm8 = vcmp.eq.f32.partialorder %v2692_v7, 8.507059e+37 }
 0x551   :  { %v2666_v37 = vmul.f32 %v3247_v12, %v2665_v53  ;;  %v3003_v50 = vmul.f32 -1.442695, %v2732_v25 }
 0x552   :  { %v3249_v42 = vpop.eup %3248  ;;  %v2648_v63 = vadd.f32 %v3245_v5, %v2647_v62  ;;  %v3004_v46 = vmul.f32 -1.442695, %v2759_v54 }
 0x553   :  { %v2667_v51 = vadd.f32 %v3247_v12, %v2666_v37  ;;  %v2684_v17 = vmul.f32 %v3249_v42, %v4278_v34  ;;  %3252 = vpow2.f32 %v3003_v50  ;;  %v3251_v6 = vpop.eup %3250  ;;  %vm2689_vm4 = vweird.f32 %v3249_v42 }
 0x554   :  { %v2652_v8 = vsel %vm2651_vm0, %v3245_v5, %v2648_v63  ;;  %3254 = vpow2.f32 %v3004_v46  ;;  %vm2690_vm7 = vmor %vm2688_vm6, %vm2689_vm4 }
 0x555   :  { %v2657_v30 = vsel %vm2654_vm2, %v2656_v36, %v2652_v8  ;;  %v2671_v58 = vsel %vm2670_vm1, %v3247_v12, %v2667_v51  ;;  %v2685_v59 = vsub.f32 1.0, %v2684_v17  ;;  %v2783_v40 = vpop.f32.mrf.mxu2 }
 0x556   :  { %v2676_v56 = vsel %vm2673_vm3, %v2675_v13, %v2671_v58  ;;  %v2699_v35 = vmul.f32 %v3251_v6, %v2657_v30  ;;  %v2810_v52 = vpop.f32.mrf.mxu3  ;;  %v2786_v22 = vadd.f32 %v2783_v40, %v2761_v49 }
 0x557   :  { %v2698_v0 = vmul.f32 %v2676_v56, %v4257_v19  ;;  %v2686_v33 = vmul.f32 %v3249_v42, %v2685_v59  ;;  %v2813_v1 = vadd.f32 %v2810_v52, %v2788_v29 }
 0x559   :  { %v3253_v28 = vpop.eup %3252  ;;  %v2700_v2 = vadd.f32 %v2699_v35, %v2698_v0  ;;  %v2687_v16 = vadd.f32 %v3249_v42, %v2686_v33  ;;  %v3005_v15 = vmul.f32 -1.442695, %v2813_v1 }
 0x55a   :  { %v3255_v27 = vpop.eup %3254  ;;  %v2817_v21 = vadd.f32 1.0, %v3253_v28 }
 0x55b   :  { %3256 = vtanh.f32 %v2700_v2  ;;  %v2836_v41 = vadd.f32 1.0, %v3255_v27  ;;  %v2691_v19 = vsel %vm2690_vm7, %v3249_v42, %v2687_v16 }
 0x55c   :  { %3258 = vrcp.f32 %v2817_v21  ;;  %v2696_v47 = vsel %vm2693_vm8, %v2695_v32, %v2691_v19  ;;  %v2827_v5 = vand.u32 2147483647, %v2817_v21  ;;  %v2829_v12 = vand.u32 2147483648, %v2817_v21 }
 0x55d   :  { %3260 = vrcp.f32 %v2836_v41  ;;  %v2848_v23 = vand.u32 2147483648, %v2836_v41  ;;  %v2846_v39 = vand.u32 2147483647, %v2836_v41  ;;  %vm2823_vm9 = vweird.f32 %v2817_v21 }
 0x55e   :  { %3262 = vpow2.f32 %v3005_v15  ;;  %vm2842_vm13 = vweird.f32 %v2836_v41  ;;  %v2830_v55 = vor.u32 1.1754944e-38, %v2829_v12 }
 0x55f   :  { %3264 = vtanh.f32 %v2786_v22  ;;  %v2849_v20 = vor.u32 1.1754944e-38, %v2848_v23  ;;  %vm2847_vm0 = vcmp.eq.f32.partialorder %v2846_v39, 8.507059e+37 }
 0x561   :  { %v3257_v11 = vpop.eup %3256 }
 0x562   :  { %v3259_v3 = vpop.eup %3258  ;;  %v2702_v18 = vmul.f32 %v3257_v11, %v2696_v47 }
 0x563   :  { %v3261_v24 = vpop.eup %3260  ;;  %v2819_v45 = vmul.f32 %v3259_v3, %v2817_v21  ;;  %vm2824_vm10 = vweird.f32 %v3259_v3 }
 0x564   :  { %v3263_v57 = vpop.eup %3262  ;;  %2703 = vst.msk [vmem:[#allocation7 + $0xe] sm:$0x3] %vm221_vm5, %v2702_v18  ;;  %v2838_v60 = vmul.f32 %v3261_v24, %v2836_v41  ;;  %vm2843_vm12 = vweird.f32 %v3261_v24  ;;  %vm2825_vm14 = vmor %vm2823_vm9, %vm2824_vm10  ;;  %vm2828_vm5 = vcmp.eq.f32.partialorder %v2827_v5, 8.507059e+37 }
 0x565   :  { %v2820_v14 = vsub.f32 1.0, %v2819_v45  ;;  %v2856_v43 = vadd.f32 1.0, %v3263_v57  ;;  %vm2844_vm15 = vmor %vm2842_vm13, %vm2843_vm12  ;;  %v3265_v25 = vpop.eup %3264 }
 0x566   :  { %v2839_v34 = vsub.f32 1.0, %v2838_v60 }
 0x567   :  { %v2821_v9 = vmul.f32 %v3259_v3, %v2820_v14  ;;  %3266 = vrcp.f32 %v2856_v43  ;;  %v2868_v36 = vand.u32 2147483648, %v2856_v43  ;;  %v2866_v51 = vand.u32 2147483647, %v2856_v43 }
 0x568   :  { %v2840_v4 = vmul.f32 %v3261_v24, %v2839_v34  ;;  %vm2862_vm2 = vweird.f32 %v2856_v43 }
 0x569   :  { %v2822_v61 = vadd.f32 %v3259_v3, %v2821_v9  ;;  %v2869_v13 = vor.u32 1.1754944e-38, %v2868_v36  ;;  %vm2867_vm4 = vcmp.eq.f32.partialorder %v2866_v51, 8.507059e+37 }
 0x56a   :  { %v2841_v53 = vadd.f32 %v3261_v24, %v2840_v4 }
 0x56b   :  { %v2826_v48 = vsel %vm2825_vm14, %v3259_v3, %v2822_v61 }
 0x56c   :  { %v2831_v26 = vsel %vm2828_vm5, %v2830_v55, %v2826_v48  ;;  %v2845_v31 = vsel %vm2844_vm15, %v3261_v24, %v2841_v53 }
 0x56d   :  { %v3267_v62 = vpop.eup %3266  ;;  %v2873_v54 = vmul.f32 %v3265_v25, %v2831_v26  ;;  %v2850_v37 = vsel %vm2847_vm0, %v2849_v20, %v2845_v31 }
 0x56e   :  { %v2858_v38 = vmul.f32 %v3267_v62, %v2856_v43  ;;  %v2872_v50 = vmul.f32 %v2850_v37, %v4269_v44  ;;  %vm2863_vm1 = vweird.f32 %v3267_v62 }
 0x56f   :  { %vm2864_vm3 = vmor %vm2862_vm2, %vm2863_vm1 }
 0x570   :  { %v2859_v42 = vsub.f32 1.0, %v2858_v38  ;;  %v2874_v63 = vadd.f32 %v2873_v54, %v2872_v50 }
 0x572   :  { %v2860_v46 = vmul.f32 %v3267_v62, %v2859_v42  ;;  %3268 = vtanh.f32 %v2874_v63 }
 0x574   :  { %v2861_v17 = vadd.f32 %v3267_v62, %v2860_v46 }
 0x576   :  { %v2865_v6 = vsel %vm2864_vm3, %v3267_v62, %v2861_v17 }
 0x577   :  { %v2870_v29 = vsel %vm2867_vm4, %v2869_v13, %v2865_v6 }
 0x578   :  { %v3269_v8 = vpop.eup %3268 }
 0x579   :  { %v2876_v30 = vmul.f32 %v3269_v8, %v2870_v29 }
 0x57b   :  { %2878 = vrot.lane.b32.xlu1 %v2876_v30, %s3349_s17 }
 0x5ed   :  { %v2879_v44 = vpop.permute.xlu1 %2878 }
 0x5ee   :  { %2881 = vst.msk [vmem:[#allocation7] sm:$0x3] %vm403_vm11, %v2879_v44 }
 0x5ef   :  { %2894 = dma.vmem_to_hbm [thread:$0]  %s2887_s22, 256, %s2889_s25, [#allocation4], %s3349_s17, %s3349_s17, %s3350_s18  }
 0x5f0   :  { %3346 = dma.done.wait [#allocation4], 256  }
 0x5f1   :  { %3347 = vsyncadd [#allocation4], 4294967040 }
 0x5f2   :  { %2899 = vsyncpa [#allocation3], 1 }
 0x5f3   :  { %2900 = vsyncpa [#allocation6], 1 }
 0x5f4   :  { %2901 = vsyncpa [#allocation4], 1 }

</bundles_post_ra>
